<compile_context>
chip_gen: v5e
topology: v5e:2x2
jax: 0.10.0
libtpu: 0.0.40
codegen_flags: <defaults>
</compile_context>

<pallas_src>
import functools

import jax
import jax.numpy as jnp
from jax import lax
from jax.experimental import pallas as pl
from jax.experimental.pallas import tpu as pltpu

LANE = 128


def _round_up(x, m):
    return (x + m - 1) // m * m


def _pick_tile_h(H, batch=1, cap=32):
    """Largest multiple-of-8 divisor of H that is <= cap (bounds per-step VMEM).

    Never silently falls back to H: if no divisor fits the cap, the smallest
    valid divisor is used.  For batch-1 inputs we prefer >= 2 row tiles so the
    grid splits across both v7x TensorCores.
    """
    divs = [t for t in range(8, H + 1, 8) if H % t == 0]
    if not divs:
        return H
    if batch == 1 and H >= 16:
        cap = min(cap, H // 2)
    under = [t for t in divs if t <= cap]
    return max(under) if under else min(divs)


def _vmem_limit_bytes(tile_h, W, Cin, CMP, COP, in_dt, out_dt):
    """Rough per-step live-set estimate -> scoped VMEM limit (with headroom)."""
    ii = jnp.dtype(in_dt).itemsize
    oi = jnp.dtype(out_dt).itemsize
    dbuf_in = 2 * (tile_h + 4) * W * Cin * ii               # body + halos, x2 buffers
    dbuf_out = 2 * tile_h * W * COP * oi
    weights = 2 * ((9 * Cin * CMP + 9 * CMP * COP) * ii + (CMP + COP) * 4)
    tmp = ((tile_h + 4) * W * 3 * Cin * ii                  # xcat
           + (tile_h + 2) * W * CMP * (4 + ii)              # acc1 (f32) + h
           + (tile_h + 2) * W * 3 * CMP * ii                # hcat
           + tile_h * W * COP * (4 + oi))                   # acc2 + store temp
    est = dbuf_in + dbuf_out + weights + tmp
    return int(min(max(2 * est, 32 * 2**20), 100 * 2**20))


def _double_conv_kernel(xt_ref, xb_ref, xd_ref,
                        w1_ref, b1_ref, w2_ref, b2_ref,
                        o_ref, *, H):
    """Fused (conv3x3 -> BN -> ReLU) x2 for one (batch, row-tile) block.

    xt_ref : (1, 2, W, Cin)   the 2 rows just above the tile (clamped at top)
    xb_ref : (1, TH, W, Cin)  the tile's own TH rows
    xd_ref : (1, 2, W, Cin)   the 2 rows just below the tile (clamped at bottom)
    w1_ref : (3, 3*Cin, CM)   conv1 weights (BN1 scale folded in), rows (kx, ci)
    b1_ref : (1, CM)          folded BN1 bias (f32)
    w2_ref : (3, 3*CM, CO)    conv2 weights (BN2 scale folded in)
    b2_ref : (1, CO)
    o_ref  : (1, TH, W, CO)   output tile (compute dtype)
    """
    t = pl.program_id(1)
    nt = pl.num_programs(1)
    TH, W, Cin = xb_ref.shape[1], xb_ref.shape[2], xb_ref.shape[3]
    CM = w1_ref.shape[2]
    CO = w2_ref.shape[2]
    cdt = xb_ref.dtype

    # ---- row window [t*TH-2, t*TH+TH+2): only the halos can be off-image ----
    rid2 = lax.broadcasted_iota(jnp.int32, (2, 1, 1), 0)
    top2 = xt_ref[0]
    bot2 = xd_ref[0]
    top2 = jnp.where(t * TH - 2 + rid2 >= 0, top2, jnp.zeros_like(top2))
    bot2 = jnp.where((t + 1) * TH + rid2 < H, bot2, jnp.zeros_like(bot2))
    xw = jnp.concatenate([top2, xb_ref[0], bot2], axis=0)        # (TH+4, W, Cin)

    colw = lax.broadcasted_iota(jnp.int32, (1, W, 1), 1)

    def shift_w(a, left):
        """Column tap a[:, c-1/ c+1, :] with zero SAME padding at the border."""
        if a.dtype.itemsize == 4:
            # XLU sublane rotate (otherwise-idle slot) + zero the wrapped column.
            rolled = pltpu.roll(a, 1 if left else W - 1, axis=1)
            keep = (colw >= 1) if left else (colw < W - 1)
            return jnp.where(keep, rolled, jnp.zeros_like(rolled))
        # Packed dtypes (bf16/fp8): sublane rolls of packed data are not
        # universally supported by Mosaic; keep the slice+concat construction.
        z = jnp.zeros(a.shape[:1] + (1,) + a.shape[2:], a.dtype)
        if left:
            return jnp.concatenate([z, a[:, :W - 1, :]], axis=1)
        return jnp.concatenate([a[:, 1:, :], z], axis=1)

    def taps3(a):
        # Lane-concat of the three kx taps -> one K = 3*C operand per ky.
        return jnp.concatenate([shift_w(a, True), a, shift_w(a, False)], axis=-1)

    # TODO(synk): for deep UNet blocks fuse all 9 conv1 taps into one K=9*Cin
    # matmul (better MXU K-fill on v6e/v7x); negligible at Cin=4.
    xcat = taps3(xw)                                              # (TH+4, W, 3*Cin)

    # ---- conv1 (BN1 scale pre-folded) + bias + ReLU --------------------------
    P1 = (TH + 2) * W
    acc1 = jnp.zeros((P1, CM), jnp.float32)
    for ky in range(3):                      # ky shifts are free outer-dim slices
        patch = xcat[ky:ky + TH + 2].reshape(P1, 3 * Cin)
        acc1 = acc1 + jnp.dot(patch, w1_ref[ky],
                              preferred_element_type=jnp.float32)
    h = jnp.maximum(acc1 + b1_ref[...], 0.0)                      # f32 epilogue
    h = h.reshape(TH + 2, W, CM).astype(cdt)

    # conv2's SAME padding needs zeros outside the image; only h rows 0 and
    # TH+1 can ever be outside, so scale just those two rows (scalar per row).
    keep_top = (t > 0).astype(cdt)           # h row 0    = image row t*TH - 1
    keep_bot = (t < nt - 1).astype(cdt)      # h row TH+1 = image row (t+1)*TH
    h = jnp.concatenate([h[0:1] * keep_top, h[1:TH + 1],
                         h[TH + 1:TH + 2] * keep_bot], axis=0)

    hcat = taps3(h)                                               # (TH+2, W, 3*CM)

    # ---- conv2 (BN2 scale pre-folded) + bias + ReLU ---------------------------
    P2 = TH * W
    acc2 = jnp.zeros((P2, CO), jnp.float32)
    for ky in range(3):
        patch = hcat[ky:ky + TH].reshape(P2, 3 * CM)
        acc2 = acc2 + jnp.dot(patch, w2_ref[ky],
                              preferred_element_type=jnp.float32)
    y = jnp.maximum(acc2 + b2_ref[...], 0.0)
    o_ref[0] = y.reshape(TH, W, CO).astype(o_ref.dtype)


def prepare_params(params, compute_dtype=jnp.bfloat16):
    """Fold BN scales into the conv weights, pad mid/out channels to multiples
    of 128, and reshape weights for the per-ky im2col matmuls.
    (In real use, do this once at load time.)"""
    w1, s1, b1, w2, s2, b2 = params
    Cin, Cm = w1.shape[2], w1.shape[3]
    Co = w2.shape[3]
    CMP, COP = _round_up(Cm, LANE), _round_up(Co, LANE)

    # TODO(synk): on v7x consider fp8 weights for conv2 if accuracy allows.
    w1f = (w1 * s1[None, None, None, :]).astype(compute_dtype)   # fold BN1 scale
    w2f = (w2 * s2[None, None, None, :]).astype(compute_dtype)   # fold BN2 scale
    w1p = jnp.zeros((3, 3, Cin, CMP), compute_dtype).at[:, :, :, :Cm].set(w1f)
    w2p = jnp.zeros((3, 3, CMP, COP), compute_dtype).at[:, :, :Cm, :Co].set(w2f)
    w1r = w1p.reshape(3, 3 * Cin, CMP)          # (ky, kx*Cin + ci, co)
    w2r = w2p.reshape(3, 3 * CMP, COP)

    def pad_vec(v, n):
        return jnp.zeros((1, n), jnp.float32).at[0, :v.shape[0]].set(
            v.astype(jnp.float32))

    return (w1r, pad_vec(b1, CMP), w2r, pad_vec(b2, COP)), Co


def double_conv_nhwc(x_nhwc, kparams, *, tile_h=None):
    """Fused DoubleConv on NHWC input. Returns (N, H, W, COP) in x's dtype."""
    w1r, b1p, w2r, b2p = kparams
    N, H, W, Cin = x_nhwc.shape
    CMP, COP = w1r.shape[-1], w2r.shape[-1]
    assert H % 8 == 0 and W % 8 == 0, "H and W must be multiples of 8"
    if tile_h is None:
        tile_h = _pick_tile_h(H, N)
    assert tile_h % 8 == 0 and H % tile_h == 0
    nt = H // tile_h
    hb2 = tile_h // 2                       # tile height in 2-row halo blocks
    nhb2 = H // 2                           # number of 2-row blocks in H

    # TODO(synk): for Cin >= ~64 switch the input to memory_space=pl.ANY + one
    # manual double-buffered make_async_copy of rows [t*TH-2, t*TH+TH+2).
    top_map = lambda n, t: (n, jnp.maximum(t * hb2 - 1, 0), 0, 0)
    body_map = lambda n, t: (n, t, 0, 0)
    bot_map = lambda n, t: (n, jnp.minimum((t + 1) * hb2, nhb2 - 1), 0, 0)
    const3 = lambda n, t: (0, 0, 0)
    const2 = lambda n, t: (0, 0)

    out_dtype = x_nhwc.dtype                # compute-dtype output (bf16 in prod)
    in_isz = jnp.dtype(x_nhwc.dtype).itemsize
    out_isz = jnp.dtype(out_dtype).itemsize
    flops = 2 * N * H * W * 9 * (Cin * CMP + CMP * COP)
    bytes_accessed = (N * (H + 4 * nt) * W * Cin * in_isz
                      + N * H * W * COP * out_isz
                      + (w1r.size + w2r.size) * in_isz
                      + (b1p.size + b2p.size) * 4)
    vmem_limit = _vmem_limit_bytes(tile_h, W, Cin, CMP, COP,
                                   x_nhwc.dtype, out_dtype)

    kernel = functools.partial(_double_conv_kernel, H=H)
    return pl.pallas_call(
        kernel,
        out_shape=jax.ShapeDtypeStruct((N, H, W, COP), out_dtype),
        grid_spec=pltpu.PrefetchScalarGridSpec(
            num_scalar_prefetch=0,
            grid=(N, nt),
            in_specs=[
                pl.BlockSpec((1, 2, W, Cin), top_map),         # 2-row halo above
                pl.BlockSpec((1, tile_h, W, Cin), body_map),   # tile body
                pl.BlockSpec((1, 2, W, Cin), bot_map),         # 2-row halo below
                pl.BlockSpec((3, 3 * Cin, CMP), const3),
                pl.BlockSpec((1, CMP), const2),
                pl.BlockSpec((3, 3 * CMP, COP), const3),
                pl.BlockSpec((1, COP), const2),
            ],
            out_specs=pl.BlockSpec((1, tile_h, W, COP), body_map),
        ),
        compiler_params=pltpu.CompilerParams(
            dimension_semantics=("parallel", "parallel"),
            vmem_limit_bytes=vmem_limit),
        cost_estimate=pl.CostEstimate(
            flops=flops, transcendentals=0, bytes_accessed=bytes_accessed),
    )(x_nhwc, x_nhwc, x_nhwc, w1r, b1p, w2r, b2p)


def double_conv(x_nchw, params, *, tile_h=None, compute_dtype=jnp.bfloat16):
    """PyTorch-compatible interface: NCHW float32 in, NCHW float32 out."""
    # TODO(synk): in a full UNet keep activations NHWC, channel-padded and in
    # bf16 end-to-end so the boundary transposes / casts / channel slice vanish.
    kparams, cout = prepare_params(params, compute_dtype)
    x = jnp.transpose(x_nchw, (0, 2, 3, 1)).astype(compute_dtype)
    y = double_conv_nhwc(x, kparams, tile_h=tile_h)
    return jnp.transpose(y[..., :cout], (0, 3, 1, 2)).astype(jnp.float32)


# ----------------------------- reference / params -----------------------------

def fold_bn(gamma, beta, running_mean, running_var, eps=1e-5):
    scale = gamma / jnp.sqrt(running_var + eps)
    bias = beta - running_mean * scale
    return scale, bias


def ref_double_conv(x_nchw, params):
    """Pure-JAX (XLA) reference for correctness checking."""
    w1, s1, b1, w2, s2, b2 = params
    x = jnp.transpose(x_nchw, (0, 2, 3, 1))
    dn = ("NHWC", "HWIO", "NHWC")
    h = lax.conv_general_dilated(x, w1, (1, 1), "SAME", dimension_numbers=dn)
    h = jnp.maximum(h * s1 + b1, 0.0)
    y = lax.conv_general_dilated(h, w2, (1, 1), "SAME", dimension_numbers=dn)
    y = jnp.maximum(y * s2 + b2, 0.0)
    return jnp.transpose(y, (0, 3, 1, 2))


def init_params(key, in_channels, out_channels, mid_channels=None):
    if mid_channels is None:
        mid_channels = out_channels
    k1, k2, k3, k4, k5, k6, k7, k8 = jax.random.split(key, 8)
    w1 = 0.1 * jax.random.normal(k1, (3, 3, in_channels, mid_channels), jnp.float32)
    w2 = 0.1 * jax.random.normal(k2, (3, 3, mid_channels, out_channels), jnp.float32)
    g1 = 1.0 + 0.1 * jax.random.normal(k3, (mid_channels,), jnp.float32)
    be1 = 0.1 * jax.random.normal(k4, (mid_channels,), jnp.float32)
    m1 = 0.05 * jax.random.normal(k5, (mid_channels,), jnp.float32)
    v1 = jnp.abs(1.0 + 0.1 * jax.random.normal(k6, (mid_channels,), jnp.float32))
    g2 = 1.0 + 0.1 * jax.random.normal(k7, (out_channels,), jnp.float32)
    be2 = 0.1 * jax.random.normal(k8, (out_channels,), jnp.float32)
    m2 = jnp.zeros((out_channels,), jnp.float32)
    v2 = jnp.ones((out_channels,), jnp.float32)
    s1, b1 = fold_bn(g1, be1, m1, v1)
    s2, b2 = fold_bn(g2, be2, m2, v2)
    return (w1, s1, b1, w2, s2, b2)


if __name__ == "__main__":
    key = jax.random.PRNGKey(0)
    kx, kp = jax.random.split(key)

    N, Cin, H, W = 2, 4, 16, 16
    Cout = 8
    x = jax.random.normal(kx, (N, Cin, H, W), jnp.float32)   # PyTorch NCHW input
    params = init_params(kp, Cin, Cout)

    y_ref = ref_double_conv(x, params)

    # f32 MXU path (test-only), one row-tile per image -> boundary clamp path
    # and the pltpu.roll tap construction are exercised.
    y32 = double_conv(x, params, tile_h=16, compute_dtype=jnp.float32)
    jax.block_until_ready(y32)
    assert y32.shape == (N, Cout, H, W)
    assert jnp.allclose(y32, y_ref, atol=5e-3, rtol=5e-3)

    # bf16 production path, two row-tiles per image -> interior halo path and
    # the packed-dtype tap fallback are exercised; output emitted in bf16.
    ybf = double_conv(x, params, tile_h=8, compute_dtype=jnp.bfloat16)
    jax.block_until_ready(ybf)
    assert ybf.shape == (N, Cout, H, W)
    assert jnp.allclose(ybf, y_ref, atol=5e-2, rtol=5e-2)

    print("KERNEL_OK")
</pallas_src>

<mosaic_0001>
module attributes {stable_mosaic.version = 11 : i64} {
  func.func @_double_conv_kernel(%arg0: i32, %arg1: i32, %arg2: memref<1x2x16x4xf32, #tpu.memory_space<vmem>>, %arg3: memref<1x16x16x4xf32, #tpu.memory_space<vmem>>, %arg4: memref<1x2x16x4xf32, #tpu.memory_space<vmem>>, %arg5: memref<3x12x128xf32, #tpu.memory_space<vmem>>, %arg6: memref<1x128xf32, #tpu.memory_space<vmem>>, %arg7: memref<3x384x128xf32, #tpu.memory_space<vmem>>, %arg8: memref<1x128xf32, #tpu.memory_space<vmem>>, %arg9: memref<1x16x16x128xf32, #tpu.memory_space<vmem>>) attributes {dimension_semantics = [#tpu.dimension_semantics<parallel>, #tpu.dimension_semantics<parallel>], iteration_bounds = array<i64: 2, 1>, scalar_prefetch = 0 : i64, scratch_operands = 0 : i64, tpu.core_type = #tpu.core_type<tc>, window_params = [{transform_indices = @transform_0, window_bounds = array<i64: 1, 2, 16, 4>}, {transform_indices = @transform_1, window_bounds = array<i64: 1, 16, 16, 4>}, {transform_indices = @transform_2, window_bounds = array<i64: 1, 2, 16, 4>}, {pipeline_mode = #tpu.pipeline_mode<synchronous>, transform_indices = @transform_3, window_bounds = array<i64: 3, 12, 128>}, {pipeline_mode = #tpu.pipeline_mode<synchronous>, transform_indices = @transform_4, window_bounds = array<i64: 1, 128>}, {pipeline_mode = #tpu.pipeline_mode<synchronous>, transform_indices = @transform_5, window_bounds = array<i64: 3, 384, 128>}, {pipeline_mode = #tpu.pipeline_mode<synchronous>, transform_indices = @transform_6, window_bounds = array<i64: 1, 128>}, {transform_indices = @transform_7, window_bounds = array<i64: 1, 16, 16, 128>}]} {
    %0 = tpu.iota {dimensions = array<i32: 0>} : vector<2x1x1xi32>
    %c0 = arith.constant 0 : index
    %c0_0 = arith.constant 0 : index
    %c0_1 = arith.constant 0 : index
    %c0_2 = arith.constant 0 : index
    %1 = vector.load %arg2[%c0, %c0_0, %c0_1, %c0_2] : memref<1x2x16x4xf32, #tpu.memory_space<vmem>>, vector<1x2x16x4xf32>
    %2 = vector.shape_cast %1 : vector<1x2x16x4xf32> to vector<2x16x4xf32>
    %c0_3 = arith.constant 0 : index
    %c0_4 = arith.constant 0 : index
    %c0_5 = arith.constant 0 : index
    %c0_6 = arith.constant 0 : index
    %3 = vector.load %arg4[%c0_3, %c0_4, %c0_5, %c0_6] : memref<1x2x16x4xf32, #tpu.memory_space<vmem>>, vector<1x2x16x4xf32>
    %4 = vector.shape_cast %3 : vector<1x2x16x4xf32> to vector<2x16x4xf32>
    %c16_i32 = arith.constant 16 : i32
    %5 = arith.muli %arg1, %c16_i32 : i32
    %c2_i32 = arith.constant 2 : i32
    %6 = arith.subi %5, %c2_i32 : i32
    %7 = vector.broadcast %6 : i32 to vector<2x1x1xi32>
    %8 = arith.addi %7, %0 : vector<2x1x1xi32>
    %c0_i32 = arith.constant 0 : i32
    %9 = vector.broadcast %c0_i32 : i32 to vector<2x1x1xi32>
    %10 = arith.cmpi sge, %8, %9 : vector<2x1x1xi32>
    %cst = arith.constant 0.000000e+00 : f32
    %11 = vector.broadcast %cst : f32 to vector<2x16x4xf32>
    %12 = vector.shape_cast %10 : vector<2x1x1xi1> to vector<2x1x1xi1>
    %13 = vector.broadcast %12 : vector<2x1x1xi1> to vector<2x16x4xi1>
    %14 = arith.select %13, %2, %11 : vector<2x16x4xi1>, vector<2x16x4xf32>
    %c1_i32 = arith.constant 1 : i32
    %15 = arith.addi %arg1, %c1_i32 : i32
    %c16_i32_7 = arith.constant 16 : i32
    %16 = arith.muli %15, %c16_i32_7 : i32
    %17 = vector.broadcast %16 : i32 to vector<2x1x1xi32>
    %18 = arith.addi %17, %0 : vector<2x1x1xi32>
    %c16_i32_8 = arith.constant 16 : i32
    %19 = vector.broadcast %c16_i32_8 : i32 to vector<2x1x1xi32>
    %20 = arith.cmpi slt, %18, %19 : vector<2x1x1xi32>
    %cst_9 = arith.constant 0.000000e+00 : f32
    %21 = vector.broadcast %cst_9 : f32 to vector<2x16x4xf32>
    %22 = vector.shape_cast %20 : vector<2x1x1xi1> to vector<2x1x1xi1>
    %23 = vector.broadcast %22 : vector<2x1x1xi1> to vector<2x16x4xi1>
    %24 = arith.select %23, %4, %21 : vector<2x16x4xi1>, vector<2x16x4xf32>
    %c0_10 = arith.constant 0 : index
    %c0_11 = arith.constant 0 : index
    %c0_12 = arith.constant 0 : index
    %c0_13 = arith.constant 0 : index
    %25 = vector.load %arg3[%c0_10, %c0_11, %c0_12, %c0_13] : memref<1x16x16x4xf32, #tpu.memory_space<vmem>>, vector<1x16x16x4xf32>
    %26 = vector.shape_cast %25 : vector<1x16x16x4xf32> to vector<16x16x4xf32>
    %27 = tpu.concatenate %14, %26, %24 in 0 : vector<2x16x4xf32>, vector<16x16x4xf32>, vector<2x16x4xf32> -> vector<20x16x4xf32>
    %28 = tpu.iota {dimensions = array<i32: 1>} : vector<1x16x1xi32>
    %c1_i32_14 = arith.constant 1 : i32
    %29 = tpu.dynamic_rotate %27 by %c1_i32_14 dim 1 : vector<20x16x4xf32>, i32 -> vector<20x16x4xf32>
    %c1_i32_15 = arith.constant 1 : i32
    %30 = vector.broadcast %c1_i32_15 : i32 to vector<1x16x1xi32>
    %31 = arith.cmpi sge, %28, %30 : vector<1x16x1xi32>
    %cst_16 = arith.constant 0.000000e+00 : f32
    %32 = vector.broadcast %cst_16 : f32 to vector<20x16x4xf32>
    %33 = vector.shape_cast %31 : vector<1x16x1xi1> to vector<1x16x1xi1>
    %34 = vector.broadcast %33 : vector<1x16x1xi1> to vector<20x16x4xi1>
    %35 = arith.select %34, %29, %32 : vector<20x16x4xi1>, vector<20x16x4xf32>
    %c15_i32 = arith.constant 15 : i32
    %36 = tpu.dynamic_rotate %27 by %c15_i32 dim 1 : vector<20x16x4xf32>, i32 -> vector<20x16x4xf32>
    %c15_i32_17 = arith.constant 15 : i32
    %37 = vector.broadcast %c15_i32_17 : i32 to vector<1x16x1xi32>
    %38 = arith.cmpi slt, %28, %37 : vector<1x16x1xi32>
    %cst_18 = arith.constant 0.000000e+00 : f32
    %39 = vector.broadcast %cst_18 : f32 to vector<20x16x4xf32>
    %40 = vector.shape_cast %38 : vector<1x16x1xi1> to vector<1x16x1xi1>
    %41 = vector.broadcast %40 : vector<1x16x1xi1> to vector<20x16x4xi1>
    %42 = arith.select %41, %36, %39 : vector<20x16x4xi1>, vector<20x16x4xf32>
    %43 = tpu.concatenate %35, %27, %42 in 2 : vector<20x16x4xf32>, vector<20x16x4xf32>, vector<20x16x4xf32> -> vector<20x16x12xf32>
    %cst_19 = arith.constant 0.000000e+00 : f32
    %44 = vector.broadcast %cst_19 : f32 to vector<288x128xf32>
    %45 = vector.extract_strided_slice %43 {offsets = [0, 0, 0], sizes = [18, 16, 12], strides = [1, 1, 1]} : vector<20x16x12xf32> to vector<18x16x12xf32>
    %46 = vector.shape_cast %45 : vector<18x16x12xf32> to vector<288x12xf32>
    %c0_20 = arith.constant 0 : index
    %c0_21 = arith.constant 0 : index
    %c0_22 = arith.constant 0 : index
    %47 = vector.load %arg5[%c0_20, %c0_21, %c0_22] : memref<3x12x128xf32, #tpu.memory_space<vmem>>, vector<1x12x128xf32>
    %48 = vector.shape_cast %47 : vector<1x12x128xf32> to vector<12x128xf32>
    %cst_23 = arith.constant dense<0.000000e+00> : vector<288x128xf32>
    %49 = tpu.matmul %46, %48, %cst_23 {dimension_numbers = #tpu.dot_dimension_numbers<[1], [0], [0], [1], [0, 0, 1, 1], [], []>} : vector<288x12xf32>, vector<12x128xf32>, vector<288x128xf32> -> vector<288x128xf32>
    %50 = arith.addf %44, %49 : vector<288x128xf32>
    %51 = vector.extract_strided_slice %43 {offsets = [1, 0, 0], sizes = [18, 16, 12], strides = [1, 1, 1]} : vector<20x16x12xf32> to vector<18x16x12xf32>
    %52 = vector.shape_cast %51 : vector<18x16x12xf32> to vector<288x12xf32>
    %c1 = arith.constant 1 : index
    %c0_24 = arith.constant 0 : index
    %c0_25 = arith.constant 0 : index
    %53 = vector.load %arg5[%c1, %c0_24, %c0_25] : memref<3x12x128xf32, #tpu.memory_space<vmem>>, vector<1x12x128xf32>
    %54 = vector.shape_cast %53 : vector<1x12x128xf32> to vector<12x128xf32>
    %cst_26 = arith.constant dense<0.000000e+00> : vector<288x128xf32>
    %55 = tpu.matmul %52, %54, %cst_26 {dimension_numbers = #tpu.dot_dimension_numbers<[1], [0], [0], [1], [0, 0, 1, 1], [], []>} : vector<288x12xf32>, vector<12x128xf32>, vector<288x128xf32> -> vector<288x128xf32>
    %56 = arith.addf %50, %55 : vector<288x128xf32>
    %57 = vector.extract_strided_slice %43 {offsets = [2, 0, 0], sizes = [18, 16, 12], strides = [1, 1, 1]} : vector<20x16x12xf32> to vector<18x16x12xf32>
    %58 = vector.shape_cast %57 : vector<18x16x12xf32> to vector<288x12xf32>
    %c2 = arith.constant 2 : index
    %c0_27 = arith.constant 0 : index
    %c0_28 = arith.constant 0 : index
    %59 = vector.load %arg5[%c2, %c0_27, %c0_28] : memref<3x12x128xf32, #tpu.memory_space<vmem>>, vector<1x12x128xf32>
    %60 = vector.shape_cast %59 : vector<1x12x128xf32> to vector<12x128xf32>
    %cst_29 = arith.constant dense<0.000000e+00> : vector<288x128xf32>
    %61 = tpu.matmul %58, %60, %cst_29 {dimension_numbers = #tpu.dot_dimension_numbers<[1], [0], [0], [1], [0, 0, 1, 1], [], []>} : vector<288x12xf32>, vector<12x128xf32>, vector<288x128xf32> -> vector<288x128xf32>
    %62 = arith.addf %56, %61 : vector<288x128xf32>
    %c0_30 = arith.constant 0 : index
    %c0_31 = arith.constant 0 : index
    %63 = vector.load %arg6[%c0_30, %c0_31] : memref<1x128xf32, #tpu.memory_space<vmem>>, vector<1x128xf32>
    %64 = vector.broadcast %63 : vector<1x128xf32> to vector<288x128xf32>
    %65 = arith.addf %62, %64 : vector<288x128xf32>
    %cst_32 = arith.constant 0.000000e+00 : f32
    %66 = vector.broadcast %cst_32 : f32 to vector<288x128xf32>
    %67 = arith.maximumf %65, %66 : vector<288x128xf32>
    %68 = vector.shape_cast %67 : vector<288x128xf32> to vector<18x16x128xf32>
    %c0_i32_33 = arith.constant 0 : i32
    %69 = arith.cmpi sgt, %arg1, %c0_i32_33 : i32
    %70 = arith.extui %69 : i1 to i32
    %71 = arith.sitofp %70 : i32 to f32
    %c0_i32_34 = arith.constant 0 : i32
    %72 = arith.cmpi slt, %arg1, %c0_i32_34 : i32
    %73 = arith.extui %72 : i1 to i32
    %74 = arith.sitofp %73 : i32 to f32
    %75 = vector.extract_strided_slice %68 {offsets = [0, 0, 0], sizes = [1, 16, 128], strides = [1, 1, 1]} : vector<18x16x128xf32> to vector<1x16x128xf32>
    %76 = vector.broadcast %71 : f32 to vector<1x16x128xf32>
    %77 = arith.mulf %75, %76 : vector<1x16x128xf32>
    %78 = vector.extract_strided_slice %68 {offsets = [1, 0, 0], sizes = [16, 16, 128], strides = [1, 1, 1]} : vector<18x16x128xf32> to vector<16x16x128xf32>
    %79 = vector.extract_strided_slice %68 {offsets = [17, 0, 0], sizes = [1, 16, 128], strides = [1, 1, 1]} : vector<18x16x128xf32> to vector<1x16x128xf32>
    %80 = vector.broadcast %74 : f32 to vector<1x16x128xf32>
    %81 = arith.mulf %79, %80 : vector<1x16x128xf32>
    %82 = tpu.concatenate %77, %78, %81 in 0 : vector<1x16x128xf32>, vector<16x16x128xf32>, vector<1x16x128xf32> -> vector<18x16x128xf32>
    %c1_i32_35 = arith.constant 1 : i32
    %83 = tpu.dynamic_rotate %82 by %c1_i32_35 dim 1 : vector<18x16x128xf32>, i32 -> vector<18x16x128xf32>
    %c1_i32_36 = arith.constant 1 : i32
    %84 = vector.broadcast %c1_i32_36 : i32 to vector<1x16x1xi32>
    %85 = arith.cmpi sge, %28, %84 : vector<1x16x1xi32>
    %cst_37 = arith.constant 0.000000e+00 : f32
    %86 = vector.broadcast %cst_37 : f32 to vector<18x16x128xf32>
    %87 = vector.shape_cast %85 : vector<1x16x1xi1> to vector<1x16x1xi1>
    %88 = vector.broadcast %87 : vector<1x16x1xi1> to vector<18x16x128xi1>
    %89 = arith.select %88, %83, %86 : vector<18x16x128xi1>, vector<18x16x128xf32>
    %c15_i32_38 = arith.constant 15 : i32
    %90 = tpu.dynamic_rotate %82 by %c15_i32_38 dim 1 : vector<18x16x128xf32>, i32 -> vector<18x16x128xf32>
    %c15_i32_39 = arith.constant 15 : i32
    %91 = vector.broadcast %c15_i32_39 : i32 to vector<1x16x1xi32>
    %92 = arith.cmpi slt, %28, %91 : vector<1x16x1xi32>
    %cst_40 = arith.constant 0.000000e+00 : f32
    %93 = vector.broadcast %cst_40 : f32 to vector<18x16x128xf32>
    %94 = vector.shape_cast %92 : vector<1x16x1xi1> to vector<1x16x1xi1>
    %95 = vector.broadcast %94 : vector<1x16x1xi1> to vector<18x16x128xi1>
    %96 = arith.select %95, %90, %93 : vector<18x16x128xi1>, vector<18x16x128xf32>
    %97 = tpu.concatenate %89, %82, %96 in 2 : vector<18x16x128xf32>, vector<18x16x128xf32>, vector<18x16x128xf32> -> vector<18x16x384xf32>
    %cst_41 = arith.constant 0.000000e+00 : f32
    %98 = vector.broadcast %cst_41 : f32 to vector<256x128xf32>
    %99 = vector.extract_strided_slice %97 {offsets = [0, 0, 0], sizes = [16, 16, 384], strides = [1, 1, 1]} : vector<18x16x384xf32> to vector<16x16x384xf32>
    %100 = vector.shape_cast %99 : vector<16x16x384xf32> to vector<256x384xf32>
    %c0_42 = arith.constant 0 : index
    %c0_43 = arith.constant 0 : index
    %c0_44 = arith.constant 0 : index
    %101 = vector.load %arg7[%c0_42, %c0_43, %c0_44] : memref<3x384x128xf32, #tpu.memory_space<vmem>>, vector<1x384x128xf32>
    %102 = vector.shape_cast %101 : vector<1x384x128xf32> to vector<384x128xf32>
    %cst_45 = arith.constant dense<0.000000e+00> : vector<256x128xf32>
    %103 = tpu.matmul %100, %102, %cst_45 {dimension_numbers = #tpu.dot_dimension_numbers<[1], [0], [0], [1], [0, 0, 1, 1], [], []>} : vector<256x384xf32>, vector<384x128xf32>, vector<256x128xf32> -> vector<256x128xf32>
    %104 = arith.addf %98, %103 : vector<256x128xf32>
    %105 = vector.extract_strided_slice %97 {offsets = [1, 0, 0], sizes = [16, 16, 384], strides = [1, 1, 1]} : vector<18x16x384xf32> to vector<16x16x384xf32>
    %106 = vector.shape_cast %105 : vector<16x16x384xf32> to vector<256x384xf32>
    %c1_46 = arith.constant 1 : index
    %c0_47 = arith.constant 0 : index
    %c0_48 = arith.constant 0 : index
    %107 = vector.load %arg7[%c1_46, %c0_47, %c0_48] : memref<3x384x128xf32, #tpu.memory_space<vmem>>, vector<1x384x128xf32>
    %108 = vector.shape_cast %107 : vector<1x384x128xf32> to vector<384x128xf32>
    %cst_49 = arith.constant dense<0.000000e+00> : vector<256x128xf32>
    %109 = tpu.matmul %106, %108, %cst_49 {dimension_numbers = #tpu.dot_dimension_numbers<[1], [0], [0], [1], [0, 0, 1, 1], [], []>} : vector<256x384xf32>, vector<384x128xf32>, vector<256x128xf32> -> vector<256x128xf32>
    %110 = arith.addf %104, %109 : vector<256x128xf32>
    %111 = vector.extract_strided_slice %97 {offsets = [2, 0, 0], sizes = [16, 16, 384], strides = [1, 1, 1]} : vector<18x16x384xf32> to vector<16x16x384xf32>
    %112 = vector.shape_cast %111 : vector<16x16x384xf32> to vector<256x384xf32>
    %c2_50 = arith.constant 2 : index
    %c0_51 = arith.constant 0 : index
    %c0_52 = arith.constant 0 : index
    %113 = vector.load %arg7[%c2_50, %c0_51, %c0_52] : memref<3x384x128xf32, #tpu.memory_space<vmem>>, vector<1x384x128xf32>
    %114 = vector.shape_cast %113 : vector<1x384x128xf32> to vector<384x128xf32>
    %cst_53 = arith.constant dense<0.000000e+00> : vector<256x128xf32>
    %115 = tpu.matmul %112, %114, %cst_53 {dimension_numbers = #tpu.dot_dimension_numbers<[1], [0], [0], [1], [0, 0, 1, 1], [], []>} : vector<256x384xf32>, vector<384x128xf32>, vector<256x128xf32> -> vector<256x128xf32>
    %116 = arith.addf %110, %115 : vector<256x128xf32>
    %c0_54 = arith.constant 0 : index
    %c0_55 = arith.constant 0 : index
    %117 = vector.load %arg8[%c0_54, %c0_55] : memref<1x128xf32, #tpu.memory_space<vmem>>, vector<1x128xf32>
    %118 = vector.broadcast %117 : vector<1x128xf32> to vector<256x128xf32>
    %119 = arith.addf %116, %118 : vector<256x128xf32>
    %cst_56 = arith.constant 0.000000e+00 : f32
    %120 = vector.broadcast %cst_56 : f32 to vector<256x128xf32>
    %121 = arith.maximumf %119, %120 : vector<256x128xf32>
    %122 = vector.shape_cast %121 : vector<256x128xf32> to vector<16x16x128xf32>
    %c0_57 = arith.constant 0 : index
    %c0_58 = arith.constant 0 : index
    %c0_59 = arith.constant 0 : index
    %c0_60 = arith.constant 0 : index
    %123 = vector.load %arg9[%c0_57, %c0_58, %c0_59, %c0_60] : memref<1x16x16x128xf32, #tpu.memory_space<vmem>>, vector<1x16x16x128xf32>
    %124 = vector.shape_cast %123 : vector<1x16x16x128xf32> to vector<16x16x128xf32>
    %125 = vector.shape_cast %122 : vector<16x16x128xf32> to vector<1x16x16x128xf32>
    tpu.vector_store %arg9[%c0_57, %c0_58, %c0_59, %c0_60], %125 {strides = array<i32>} : memref<1x16x16x128xf32, #tpu.memory_space<vmem>>, vector<1x16x16x128xf32>,
    return
  }
  func.func @transform_0(%arg0: i32, %arg1: i32) -> (i32, i32, i32, i32) {
    %c8_i32 = arith.constant 8 : i32
    %0 = arith.muli %arg1, %c8_i32 : i32
    %c1_i32 = arith.constant 1 : i32
    %1 = arith.subi %0, %c1_i32 : i32
    %c0_i32 = arith.constant 0 : i32
    %2 = arith.maxsi %1, %c0_i32 : i32
    %c0_i32_0 = arith.constant 0 : i32
    %c0_i32_1 = arith.constant 0 : i32
    %c0_i32_2 = arith.constant 0 : i32
    return %arg0, %2, %c0_i32_0, %c0_i32_1 : i32, i32, i32, i32
  }
  func.func @transform_1(%arg0: i32, %arg1: i32) -> (i32, i32, i32, i32) {
    %c0_i32 = arith.constant 0 : i32
    %c0_i32_0 = arith.constant 0 : i32
    %c0_i32_1 = arith.constant 0 : i32
    return %arg0, %arg1, %c0_i32, %c0_i32_0 : i32, i32, i32, i32
  }
  func.func @transform_2(%arg0: i32, %arg1: i32) -> (i32, i32, i32, i32) {
    %c1_i32 = arith.constant 1 : i32
    %0 = arith.addi %arg1, %c1_i32 : i32
    %c8_i32 = arith.constant 8 : i32
    %1 = arith.muli %0, %c8_i32 : i32
    %c7_i32 = arith.constant 7 : i32
    %2 = arith.minsi %1, %c7_i32 : i32
    %c0_i32 = arith.constant 0 : i32
    %c0_i32_0 = arith.constant 0 : i32
    %c0_i32_1 = arith.constant 0 : i32
    return %arg0, %2, %c0_i32, %c0_i32_0 : i32, i32, i32, i32
  }
  func.func @transform_3(%arg0: i32, %arg1: i32) -> (i32, i32, i32) {
    %c0_i32 = arith.constant 0 : i32
    %c0_i32_0 = arith.constant 0 : i32
    %c0_i32_1 = arith.constant 0 : i32
    %c0_i32_2 = arith.constant 0 : i32
    return %c0_i32, %c0_i32_0, %c0_i32_1 : i32, i32, i32
  }
  func.func @transform_4(%arg0: i32, %arg1: i32) -> (i32, i32) {
    %c0_i32 = arith.constant 0 : i32
    %c0_i32_0 = arith.constant 0 : i32
    %c0_i32_1 = arith.constant 0 : i32
    return %c0_i32, %c0_i32_0 : i32, i32
  }
  func.func @transform_5(%arg0: i32, %arg1: i32) -> (i32, i32, i32) {
    %c0_i32 = arith.constant 0 : i32
    %c0_i32_0 = arith.constant 0 : i32
    %c0_i32_1 = arith.constant 0 : i32
    %c0_i32_2 = arith.constant 0 : i32
    return %c0_i32, %c0_i32_0, %c0_i32_1 : i32, i32, i32
  }
  func.func @transform_6(%arg0: i32, %arg1: i32) -> (i32, i32) {
    %c0_i32 = arith.constant 0 : i32
    %c0_i32_0 = arith.constant 0 : i32
    %c0_i32_1 = arith.constant 0 : i32
    return %c0_i32, %c0_i32_0 : i32, i32
  }
  func.func @transform_7(%arg0: i32, %arg1: i32) -> (i32, i32, i32, i32) {
    %c0_i32 = arith.constant 0 : i32
    %c0_i32_0 = arith.constant 0 : i32
    %c0_i32_1 = arith.constant 0 : i32
    return %arg0, %arg1, %c0_i32, %c0_i32_0 : i32, i32, i32, i32
  }
}

</mosaic_0001>

<bundles_post_ra>
// kernel: tpu_custom_call.1
= control target key start
LH: loop header
LB: loop body
LE: loop exit
PB: predicated region body
PF: predicated region fallthrough
CT: control target
= control target key end

     0   :  { %12 = vsyncpa [#allocation3], 0  ;;  %s7097_s0 = inlined_call_operand.vmem [shape: f32[2,16,16,4], index: 0, kind: input, shape index: {}]   ;;  %s7098_s1 = inlined_call_operand.vmem [shape: f32[2,16,16,4], index: 1, kind: input, shape index: {}]   ;;  %s7099_s2 = inlined_call_operand.vmem [shape: f32[2,16,16,4], index: 2, kind: input, shape index: {}]   ;;  %s7100_s3 = inlined_call_operand.vmem [shape: f32[3,12,128], index: 3, kind: input, shape index: {}]   ;;  %s7101_s4 = inlined_call_operand.vmem [shape: f32[1,128], index: 4, kind: input, shape index: {}]   ;;  %s7102_s5 = inlined_call_operand.vmem [shape: f32[3,384,128], index: 5, kind: input, shape index: {}]   ;;  %s7103_s6 = inlined_call_operand.vmem [shape: f32[1,128], index: 6, kind: input, shape index: {}]   ;;  %s7104_s7 = inlined_call_operand.hbm [shape: f32[2,16,16,128], index: 7, kind: output, shape index: {}]  }
   0x1   :  { %14 = vsyncpa [#allocation3 + $0x1], 0  ;;  %s3999_s23 = smov 0   ;;  %s4001_s2 = smov 0  }
   0x2   :  { %s4003_s24 = smov 0   ;;  %s4005_s25 = smov 0  }
   0x3   :  { %s4007_s26 = smov 0   ;;  %s4009_s27 = smov 0  }
   0x4 LB: > { %s3464_s28 = sadd.s32 4294967295, %s3953_s27   ;;  %s3465_s29 = sadd.s32 4294967294, %s3953_s27   ;;  %s3953_s27 = sphi %s4009_s27, %s20_s27   ;;  %s3949_s26 = sphi %s4007_s26, %s7582_s26   ;;  %s3945_s25 = sphi %s4005_s25, %s7581_s25   ;;  %s3941_s24 = sphi %s4003_s24, %s7580_s24   ;;  %s3937_s2 = sphi %s4001_s2, %s7579_s2   ;;  %s3933_s23 = sphi %s3999_s23, %s7578_s23  }
   0x5   : > { %s32_s30 = sadd.s32 1, %s3949_s26  ;;  %s225_s8 = sadd.s32 1, %s3941_s24 }
   0x6   : > { %p34_p0 = scmp.ge.s32.totalorder %s32_s30, 2  ;;  %p235_p1 = scmp.ne.s32.totalorder %s3941_s24, %s3937_s2 }
   0x7   : > { %p236_p2 = scmp.eq.s32.totalorder %s3464_s28, 1  ;;  %p241_p3 = scmp.ne.s32.totalorder %s3937_s2, %s3933_s23 }
   0x8   : > { %s7584_s30 = smov (%p34_p0, %s32_s30), 0  ;;  %p242_p5 = scmp.eq.s32.totalorder %s3465_s29, 1 }
   0x9   : > { %p4039_p4 = por %p236_p2, %p235_p1  ;;  %s220_s10 = ssub.s32 %s3949_s26, %s7584_s30 }
   0xa   : > { %p3468_p6 = scmp.ge.s32.totalorder %s3953_s27, 1  ;;  %p223_p7 = scmp.eq.s32.totalorder %s220_s10, 0 }
   0xb   : > { %p4046_p8 = por %p242_p5, %p241_p3  ;;  %p330_p9 = scmp.lt.s32.totalorder %s3953_s27, 3 }
   0xc   : > { %s4052_s12 = scalar_select %p223_p7, %s3941_s24, %s225_s8  }
   0xd   : > { %p331_p10 = pnand %p3468_p6, %p330_p9 }
   0xf   : > { %334 = sbr.rel (%p331_p10) target bundleno = 1221 (0x4c5), region = 48 }
  0x14   : > { %p415_p11 = scmp.lt.s32.totalorder %s3945_s25, 1  ;;  %v513_v0 = vlaneseq  ;;  %v3955_v1 = vmov 0.0   ;;  %s3956_s14 = smov 4   ;;  %v3477_v60 = vld [vmem:[%s7100_s3 + $0x18] sm:$0xf]  ;;  %vm1286_vm2 = vcmask 1043456  }
  0x15   : > { %3853 = vrot.lane.b32.xlu1 %v3955_v1, %s3956_s14  ;;  %v4059_v2 = vrot.slane %v3955_v1, 1  ;;  %s3957_s19 = smov 8   ;;  %v1173_v61 = vld [vmem:[%s7100_s3 + $0x8] sm:$0xf]  ;;  %3478 = vmatpush.msk.msra.mxu0 %vm1286_vm2, %v3477_v60  ;;  %v3476_v63 = vld [vmem:[%s7100_s3 + $0x10] sm:$0xff]  ;;  %vm1090_vm5 = vcmask 31744  }
  0x16   : > { %s416_s13 = scalar_select %p415_p11, %s3945_s25, 1  ;;  %v4061_v3 = vshrl.u32 %v513_v0, 7  ;;  %3515 = vmatpush.msk.msra.mxu1 %vm1286_vm2, %v1173_v61  ;;  %v1172_v0 = vld [vmem:[%s7100_s3] sm:$0xff]  ;;  %vm1131_vm6 = vcmask 64512   ;;  %vm1177_vm7 = vcmask 97280  }
  0x17   : > { %v3857_v8 = vpack.i.bf16 %v4059_v2, %v4059_v2  ;;  %1305 = vmatpush.msra.mxu0 %v3476_v63  ;;  %s392_s20 = sand.u32 1, %s3937_s2   ;;  %s3792_s29 = sshll.u32 %s3945_s25, 8 }
  0x18   : > { %s3789_s15 = sshll.u32 %s416_s13, 8  ;;  %v4069_v4 = vadd.s32 8, %v4061_v3  ;;  %vm683_vm0 = vcmp.lt.s32.totalorder %v4061_v3, 7  ;;  %1439 = vmatpush.msra.mxu1 %v1172_v0  ;;  %vm556_vm3 = vcmp.lt.s32.totalorder %v4061_v3, 1  ;;  %vm597_vm4 = vcmp.ge.s32.totalorder %v4061_v3, 1  ;;  %s3469_s0 = sshll.u32 %s392_s20, 8 }
  0x19   : > { %s4066_s18 = scalar_lea.vmem %s7098_s1, %s3789_s15  ;;  %s6724_s28 = scalar_lea.vmem [#allocation2], %s3469_s0 }
  0x1a   : > { %v4072_v5 = vld [vmem:[%s4066_s18] sm:$0xff]  ;;  %v4075_v6 = vld [vmem:[%s4066_s18 + $0x8] sm:$0xff]  ;;  %vm725_vm1 = vcmp.lt.s32.totalorder %v4069_v4, 15  ;;  %v4105_v15 = vld [vmem:[%s4066_s18 + $0x10] sm:$0xff]  ;;  %s3336_s13 = scalar_lea.hbm %s7104_s7, %s3792_s29  ;;  %s3337_s15 = sshll.u32 %s6724_s28, 4  ;;  %s3338_s15 = int_to_ptr.vmem [resolvable:$true] %s3337_s15 }
  0x1b   : > { %818 = vrot.lane.b32.xlu0 %v4072_v5, %s3956_s14  ;;  %v645_v7 = vrot.slane %v4072_v5, 1  ;;  %v665_v9 = vrot.slane %v4075_v6, 1  ;;  %820 = vrot.lane.b32.xlu2 %v4075_v6, %s3956_s14  ;;  %v4095_v12 = vsel %vm725_vm1, %v4059_v2, 0.0  ;;  %v4108_v16 = vld [vmem:[%s4066_s18 + $0x18] sm:$0xff]  ;;  %v646_v17 = vrot.slane %v4105_v15, 1  ;;  %v4117_v19 = vld [vmem:[%s4066_s18 + $0x20] sm:$0xff] }
  0x1c   : > { %v3867_v14 = vpack.i.bf16 %v4095_v12, %v4095_v12  ;;  %v666_v18 = vrot.slane %v4108_v16, 1  ;;  %v4120_v20 = vld [vmem:[%s4066_s18 + $0x28] sm:$0xff]  ;;  %v647_v23 = vrot.slane %v4117_v19, 1  ;;  %v4138_v27 = vld [vmem:[%s4066_s18 + $0x38] sm:$0xff]  ;;  %v4145_v28 = vld [vmem:[%s4066_s18 + $0x30] sm:$0xff]  ;;  %v539_v60 = vrot.slane %v4108_v16, 7 }
  0x1d   : > { %v706_v10 = vsel %vm683_vm0, %v665_v9, %v645_v7  ;;  %3858 = vrot.lane.b32.xlu1 %v3857_v8, %s3957_s19  ;;  %v686_v11 = vsel %vm683_vm0, %v645_v7, %v665_v9  ;;  %v667_v24 = vrot.slane %v4120_v20, 1  ;;  %v648_v30 = vrot.slane %v4145_v28, 1  ;;  %v4165_v36 = vld [vmem:[%s4066_s18 + $0x40] sm:$0xff]  ;;  %v4168_v37 = vld [vmem:[%s4066_s18 + $0x48] sm:$0xff]  ;;  %v4177_v40 = vld [vmem:[%s4066_s18 + $0x50] sm:$0xff]  ;;  %s3339_s16 = sshll.u32 %s3336_s13, 4  ;;  %s3340_s16 = int_to_ptr.hbm [resolvable:$true] %s3339_s16 }
  0x1e   : > { %v735_v13 = vsel %vm725_vm1, %v706_v10, 0.0  ;;  %v707_v21 = vsel %vm683_vm0, %v666_v18, %v646_v17  ;;  %v687_v22 = vsel %vm683_vm0, %v646_v17, %v666_v18  ;;  %v668_v31 = vrot.slane %v4138_v27, 1  ;;  %v4180_v41 = vld [vmem:[%s4066_s18 + $0x58] sm:$0xff]  ;;  %v4202_v48 = vld [vmem:[%s4066_s18 + $0x60] sm:$0xff]  ;;  %v4213_v52 = vld [vmem:[%s4066_s18 + $0x68] sm:$0xff]  ;;  %s3322_s25 = scalar_lea.sflag [#allocation3], %s392_s20 }
  0x1f   : > { %v737_v25 = vsel %vm725_vm1, %v707_v21, 0.0  ;;  %v688_v26 = vsel %vm683_vm0, %v647_v23, %v667_v24  ;;  %v708_v29 = vsel %vm683_vm0, %v667_v24, %v647_v23  ;;  %v649_v38 = vrot.slane %v4165_v36, 1  ;;  %v4224_v56 = vld [vmem:[%s4066_s18 + $0x70] sm:$0xff]  ;;  %v4227_v57 = vld [vmem:[%s4066_s18 + $0x78] sm:$0xff]  ;;  %v3553_v7 = vld [vmem:[%s7100_s3 + $0x28] sm:$0xf] }
  0x20   : > { %v739_v32 = vsel %vm725_vm1, %v708_v29, 0.0  ;;  %v689_v33 = vsel %vm683_vm0, %v648_v30, %v668_v31  ;;  %v709_v34 = vsel %vm683_vm0, %v668_v31, %v648_v30  ;;  %v669_v39 = vrot.slane %v4168_v37, 1  ;;  %3554 = vmatpush.msk.msra.mxu2 %vm1286_vm2, %v3553_v7  ;;  %v3552_v8 = vld [vmem:[%s7100_s3 + $0x20] sm:$0xff]  ;;  %s3889_s17 = sshra.s32 %s3340_s16, 4  ;;  %s3895_s22 = scalar_lea.hbm %s7104_s7, 512  ;;  %s3890_s17 = int_to_ptr.hbm [resolvable:$true] %s3889_s17 }
  0x21   : > { %v741_v35 = vsel %vm725_vm1, %v709_v34, 0.0  ;;  %v650_v44 = vrot.slane %v4177_v40, 1  ;;  %v670_v45 = vrot.slane %v4180_v41, 1  ;;  %v651_v51 = vrot.slane %v4202_v48, 1  ;;  %v4258_v10 = vld [vmem:[%s4066_s18 + $0x80] sm:$0xff]  ;;  %p3896_p1 = scmp.lt.s32.totalorder %s3890_s17, %s7104_s7 }
  0x22   : > { %v710_v42 = vsel %vm683_vm0, %v669_v39, %v649_v38  ;;  %v690_v43 = vsel %vm683_vm0, %v649_v38, %v669_v39  ;;  %v671_v53 = vrot.slane %v4213_v52, 1  ;;  %v652_v58 = vrot.slane %v4224_v56, 1  ;;  %1576 = vmatpush.msra.mxu2 %v3552_v8 }
  0x23   : > { %978 = vrot.lane.b32.xlu0 %v686_v11, %s3957_s19  ;;  %980 = vrot.lane.b32.xlu2 %v735_v13, %s3957_s19  ;;  %v743_v46 = vsel %vm725_vm1, %v710_v42, 0.0  ;;  %v691_v47 = vsel %vm683_vm0, %v650_v44, %v670_v45  ;;  %v711_v49 = vsel %vm683_vm0, %v670_v45, %v650_v44  ;;  %v672_v59 = vrot.slane %v4227_v57, 1  ;;  %v4261_v11 = vld [vmem:[%s4066_s18 + $0x88] sm:$0xff] }
  0x24   : > { %v745_v50 = vsel %vm725_vm1, %v711_v49, 0.0  ;;  %v712_v54 = vsel %vm683_vm0, %v671_v53, %v651_v51  ;;  %v692_v9 = vsel %vm683_vm0, %v651_v51, %v671_v53  ;;  %v653_v13 = vrot.slane %v4258_v10, 1  ;;  %v4317_v53 = vld [vmem:[%s4066_s18 + $0x98] sm:$0xff] }
  0x25   : > { %3868 = vrot.lane.b32.xlu1 %v3867_v14, %s3957_s19  ;;  %v747_v55 = vsel %vm725_vm1, %v712_v54, 0.0  ;;  %v693_v62 = vsel %vm683_vm0, %v652_v58, %v672_v59  ;;  %v673_v14 = vrot.slane %v4261_v11, 1  ;;  %v518_v18 = vrot.slane %v4072_v5, 7 }
  0x26   : > { %v4278_v24 = vrot.slane %v3955_v1, 7  ;;  %v713_v39 = vsel %vm683_vm0, %v672_v59, %v652_v58  ;;  %v519_v59 = vrot.slane %v4105_v15, 7 }
  0x27   : > { %v694_v17 = vsel %vm683_vm0, %v653_v13, %v673_v14  ;;  %v714_v23 = vsel %vm683_vm0, %v673_v14, %v653_v13  ;;  %v749_v44 = vsel %vm725_vm1, %v713_v39, 0.0  ;;  %v541_v13 = vrot.slane %v4138_v27, 7 }
  0x28   : > { %v4289_v31 = vsel %vm597_vm4, %v4278_v24, 0.0 }
  0x2b   : > { %3863 = vrot.lane.b32.xlu0 %v3955_v1, %s3956_s14  ;;  %822 = vrot.lane.b32.xlu2 %v4105_v15, %s3956_s14  ;;  %v580_v15 = vsel %vm556_vm3, %v539_v60, %v519_v59 }
  0x2d   : > { %824 = vrot.lane.b32.xlu1 %v4108_v16, %s3956_s14  ;;  %v521_v16 = vrot.slane %v4145_v28, 7 }
  0x33   : > { %982 = vrot.lane.b32.xlu0 %v687_v22, %s3957_s19  ;;  %984 = vrot.lane.b32.xlu2 %v737_v25, %s3957_s19  ;;  %v538_v22 = vrot.slane %v4075_v6, 7  ;;  %v751_v25 = vsel %vm725_vm1, %v714_v23, 0.0  ;;  %v4348_v23 = vld [vmem:[%s4066_s18 + $0xa0] sm:$0xff] }
  0x35   : > { %986 = vrot.lane.b32.xlu1 %v688_v26, %s3957_s19  ;;  %v579_v6 = vsel %vm556_vm3, %v538_v22, %v518_v18  ;;  %v559_v58 = vsel %vm556_vm3, %v518_v18, %v538_v22 }
  0x3b   : > { %826 = vrot.lane.b32.xlu0 %v4117_v19, %s3956_s14  ;;  %828 = vrot.lane.b32.xlu2 %v4120_v20, %s3956_s14 }
  0x3d   : > { %830 = vrot.lane.b32.xlu1 %v4145_v28, %s3956_s14  ;;  %v4351_v28 = vld [vmem:[%s4066_s18 + $0xa8] sm:$0xff] }
  0x43   : > { %988 = vrot.lane.b32.xlu0 %v739_v32, %s3957_s19  ;;  %990 = vrot.lane.b32.xlu2 %v689_v33, %s3957_s19  ;;  %v4292_v32 = vld [vmem:[%s4066_s18 + $0x90] sm:$0xff]  ;;  %v607_v33 = vsel %vm597_vm4, %v579_v6, 0.0 }
  0x45   : > { %992 = vrot.lane.b32.xlu1 %v741_v35, %s3957_s19 }
  0x4b   : > { %832 = vrot.lane.b32.xlu0 %v4138_v27, %s3956_s14  ;;  %834 = vrot.lane.b32.xlu2 %v4165_v36, %s3956_s14 }
  0x4d   : > { %836 = vrot.lane.b32.xlu1 %v4168_v37, %s3956_s14 }
  0x53   : > { %994 = vrot.lane.b32.xlu0 %v690_v43, %s3957_s19  ;;  %996 = vrot.lane.b32.xlu2 %v743_v46, %s3957_s19 }
  0x55   : > { %998 = vrot.lane.b32.xlu1 %v691_v47, %s3957_s19 }
  0x5b   : > { %838 = vrot.lane.b32.xlu0 %v4177_v40, %s3956_s14  ;;  %840 = vrot.lane.b32.xlu2 %v4180_v41, %s3956_s14 }
  0x5d   : > { %842 = vrot.lane.b32.xlu1 %v4202_v48, %s3956_s14 }
  0x63   : > { %1000 = vrot.lane.b32.xlu0 %v745_v50, %s3957_s19  ;;  %1002 = vrot.lane.b32.xlu2 %v692_v9, %s3957_s19  ;;  %v654_v50 = vrot.slane %v4292_v32, 1 }
  0x65   : > { %1004 = vrot.lane.b32.xlu1 %v747_v55, %s3957_s19  ;;  %v674_v55 = vrot.slane %v4317_v53, 1 }
  0x67   : > { %v715_v61 = vsel %vm683_vm0, %v674_v55, %v654_v50 }
  0x68   : > { %v753_v63 = vsel %vm725_vm1, %v715_v61, 0.0 }
  0x6b   : > { %844 = vrot.lane.b32.xlu0 %v4213_v52, %s3956_s14  ;;  %846 = vrot.lane.b32.xlu2 %v4224_v56, %s3956_s14 }
  0x6d   : > { %848 = vrot.lane.b32.xlu1 %v4227_v57, %s3956_s14 }
  0x73   : > { %1006 = vrot.lane.b32.xlu0 %v693_v62, %s3957_s19  ;;  %1008 = vrot.lane.b32.xlu2 %v749_v44, %s3957_s19  ;;  %v540_v44 = vrot.slane %v4120_v20, 7 }
  0x75   : > { %1010 = vrot.lane.b32.xlu1 %v694_v17, %s3957_s19  ;;  %v821_v30 = vpop.permute.xlu2 %820 }
  0x76   : > { %v1096_v0 = vsel %vm1090_vm5, %v559_v58, %v821_v30 }
  0x7b   : > { %850 = vrot.lane.b32.xlu0 %v4258_v10, %s3956_s14  ;;  %852 = vrot.lane.b32.xlu2 %v4261_v11, %s3956_s14 }
  0x7d   : > { %854 = vrot.lane.b32.xlu1 %v4292_v32, %s3956_s14  ;;  %v981_v54 = vpop.permute.xlu2 %980 }
  0x7e   : > { %v4341_v18 = vsel %vm1131_vm6, %v1096_v0, %v981_v54 }
  0x83   : > { %1012 = vrot.lane.b32.xlu0 %v751_v25, %s3957_s19 }
  0x85   : > { %1016 = vrot.lane.b32.xlu1 %v753_v63, %s3957_s19  ;;  %v823_v22 = vpop.permute.xlu2 %822 }
  0x87   : > { %v3854_v21 = vpop.permute.xlu1 %3853 }
  0x88   : > { %v3856_v26 = vunpack.i.h.bf16 %v3854_v21  ;;  %v3855_v29 = vunpack.i.l.bf16 %v3854_v21  ;;  %v609_v21 = vsel %vm597_vm4, %v580_v15, 0.0 }
  0x8a   : > { %v1093_v35 = vsel %vm1090_vm5, %v4289_v31, %v3856_v26  ;;  %v1091_v38 = vsel %vm1090_vm5, %v4289_v31, %v3855_v29  ;;  %v655_v26 = vrot.slane %v4348_v23, 1  ;;  %v675_v29 = vrot.slane %v4351_v28, 1 }
  0x8b   : > { %856 = vrot.lane.b32.xlu0 %v4317_v53, %s3956_s14 }
  0x8c   : > { %v696_v6 = vsel %vm683_vm0, %v655_v26, %v675_v29 }
  0x8d   : > { %v819_v5 = vpop.permute.xlu0 %818  ;;  %860 = vrot.lane.b32.xlu1 %v4351_v28, %s3956_s14 }
  0x8e   : > { %v1095_v47 = vsel %vm1090_vm5, %v607_v33, %v819_v5  ;;  %v582_v33 = vsel %vm556_vm3, %v541_v13, %v521_v16 }
  0x8f   : > { %v3859_v34 = vpop.permute.xlu1 %3858 }
  0x90   : > { %v3861_v42 = vunpack.i.h.bf16 %v3859_v34  ;;  %v3860_v43 = vunpack.i.l.bf16 %v3859_v34  ;;  %v1097_v34 = vsel %vm1090_vm5, %v609_v21, %v823_v22  ;;  %v4442_v22 = vld [vmem:[%s4066_s18 + $0xc0] sm:$0xff] }
  0x92   : > { %v1134_v45 = vsel %vm1131_vm6, %v1093_v35, %v3861_v42  ;;  %v1132_v46 = vsel %vm1131_vm6, %v1091_v38, %v3860_v43  ;;  %v560_v42 = vsel %vm556_vm3, %v519_v59, %v539_v60  ;;  %v520_v43 = vrot.slane %v4117_v19, 7 }
  0x93   : > { %3479 = vmatmul.msk.f32.vlgmr.msra.gmra.mxu0 %vm1177_vm7, %v1134_v45  ;;  %3516 = vmatmul.msk.f32.vlgmr.msra.gmra.mxu1 %vm1177_vm7, %v1132_v46  ;;  %v562_v19 = vsel %vm556_vm3, %v521_v16, %v541_v13 }
  0x94   : > { %1018 = vrot.lane.b32.xlu0 %v696_v6, %s3957_s19  ;;  %v581_v54 = vsel %vm556_vm3, %v540_v44, %v520_v43  ;;  %v561_v15 = vsel %vm556_vm3, %v520_v43, %v540_v44  ;;  %v657_v6 = vrot.slane %v4442_v22, 1  ;;  %v524_v44 = vrot.slane %v4202_v48, 7 }
  0x95   : > { %v979_v49 = vpop.permute.xlu0 %978  ;;  %v611_v58 = vsel %vm597_vm4, %v581_v54, 0.0 }
  0x96   : > { %v4314_v51 = vsel %vm1131_vm6, %v1095_v47, %v979_v49  ;;  %v985_v47 = vpop.permute.xlu2 %984  ;;  %v695_v49 = vsel %vm683_vm0, %v654_v50, %v674_v55  ;;  %v4402_v50 = vld [vmem:[%s4066_s18 + $0xb8] sm:$0xff] }
  0x97   : > { %3555 = vmatmul.msk.f32.vlgmr.msra.gmra.mxu2 %vm1177_vm7, %v4314_v51  ;;  %v3869_v62 = vpop.permute.xlu1 %3868  ;;  %1014 = vrot.lane.b32.xlu2 %v695_v49, %s3957_s19  ;;  %v676_v60 = vrot.slane %v4402_v50, 1  ;;  %v4494_v49 = vld [vmem:[%s4066_s18 + $0xd0] sm:$0xff] }
  0x98   : > { %v3871_v8 = vunpack.i.h.bf16 %v3869_v62  ;;  %v3870_v9 = vunpack.i.l.bf16 %v3869_v62  ;;  %v658_v54 = vrot.slane %v4494_v49, 1 }
  0x9d   : > { %v3864_v7 = vpop.permute.xlu0 %3863 }
  0x9e   : > { %v3866_v14 = vunpack.i.h.bf16 %v3864_v7  ;;  %v3865_v17 = vunpack.i.l.bf16 %v3864_v7  ;;  %v829_v16 = vpop.permute.xlu2 %828 }
  0x9f   : > { %3556 = vmatmul.msk.f32.gmra.mxu2 %vm1177_vm7, %v4341_v18  ;;  %v825_v39 = vpop.permute.xlu1 %824  ;;  %858 = vrot.lane.b32.xlu2 %v4348_v23, %s3956_s14  ;;  %v1100_v7 = vsel %vm1090_vm5, %v561_v15, %v829_v16 }
  0xa0   : > { %v1094_v25 = vsel %vm1090_vm5, %v4278_v24, %v3866_v14  ;;  %v1092_v27 = vsel %vm1090_vm5, %v4278_v24, %v3865_v17  ;;  %v1098_v46 = vsel %vm1090_vm5, %v560_v42, %v825_v39  ;;  %v613_v17 = vsel %vm597_vm4, %v582_v33, 0.0 }
  0xa1   : > { %v1135_v30 = vsel %vm1131_vm6, %v1094_v25, %v3871_v8  ;;  %v1133_v5 = vsel %vm1131_vm6, %v1092_v27, %v3870_v9  ;;  %v4392_v20 = vsel %vm1131_vm6, %v1098_v46, %v985_v47  ;;  %v716_v27 = vsel %vm683_vm0, %v675_v29, %v655_v26 }
  0xa2   : > { %3480 = vmatmul.msk.f32.gmra.mxu0 %vm1177_vm7, %v1135_v30  ;;  %3517 = vmatmul.msk.f32.gmra.mxu1 %vm1177_vm7, %v1133_v5  ;;  %v522_v26 = vrot.slane %v4165_v36, 7  ;;  %v544_v46 = vrot.slane %v4213_v52, 7 }
  0xa5   : > { %v983_v35 = vpop.permute.xlu0 %982 }
  0xa6   : > { %v4372_v38 = vsel %vm1131_vm6, %v1097_v34, %v983_v35  ;;  %v991_v25 = vpop.permute.xlu2 %990  ;;  %v4461_v34 = vld [vmem:[%s4066_s18 + $0xc8] sm:$0xff] }
  0xa7   : > { %3557 = vmatmul.msk.f32.gmra.mxu2 %vm1177_vm7, %v4372_v38  ;;  %v987_v62 = vpop.permute.xlu1 %986  ;;  %v677_v29 = vrot.slane %v4461_v34, 1 }
  0xa9   : > { %v718_v42 = vsel %vm683_vm0, %v677_v29, %v657_v6 }
  0xaa   : > { %3481 = vmatmul.msk.f32.gmra.mxu0 %vm1177_vm7, %v4314_v51  ;;  %3518 = vmatmul.msk.f32.gmra.mxu1 %vm1177_vm7, %v1134_v45  ;;  %v4399_v45 = vld [vmem:[%s4066_s18 + $0xb0] sm:$0xff]  ;;  %v759_v36 = vsel %vm725_vm1, %v718_v42, 0.0 }
  0xab   : > { %v656_v55 = vrot.slane %v4399_v45, 1  ;;  %862 = vrot.lane.b32.xlu0 %v4399_v45, %s3956_s14 }
  0xad   : > { %v827_v59 = vpop.permute.xlu0 %826  ;;  %v697_v63 = vsel %vm683_vm0, %v656_v55, %v676_v60  ;;  %v717_v9 = vsel %vm683_vm0, %v676_v60, %v656_v55  ;;  %v585_v55 = vsel %vm556_vm3, %v544_v46, %v524_v44 }
  0xae   : > { %v1099_v61 = vsel %vm1090_vm5, %v611_v58, %v827_v59  ;;  %1022 = vrot.lane.b32.xlu1 %v697_v63, %s3957_s19  ;;  %v757_v13 = vsel %vm725_vm1, %v717_v9, 0.0  ;;  %v835_v47 = vpop.permute.xlu2 %834  ;;  %v543_v63 = vrot.slane %v4180_v41, 7  ;;  %v619_v42 = vsel %vm597_vm4, %v585_v55, 0.0 }
  0xaf   : > { %3558 = vmatmul.msk.f32.gmra.mxu2 %vm1177_vm7, %v4392_v20  ;;  %v4418_v0 = vsel %vm1131_vm6, %v1099_v61, %v987_v62  ;;  %v831_v21 = vpop.permute.xlu1 %830 }
  0xb2   : > { %3482 = vmatmul.msk.f32.gmra.mxu0 %vm1177_vm7, %v4341_v18  ;;  %3519 = vmatmul.msk.f32.gmra.mxu1 %vm1177_vm7, %v1135_v30  ;;  %v755_v30 = vsel %vm725_vm1, %v716_v27, 0.0 }
  0xb3   : > { %1024 = vrot.lane.b32.xlu0 %v757_v13, %s3957_s19  ;;  %1020 = vrot.lane.b32.xlu2 %v755_v30, %s3957_s19 }
  0xb5   : > { %v989_v8 = vpop.permute.xlu0 %988 }
  0xb6   : > { %v4435_v14 = vsel %vm1131_vm6, %v1100_v7, %v989_v8  ;;  %866 = vrot.lane.b32.xlu1 %v4442_v22, %s3956_s14  ;;  %v997_v16 = vpop.permute.xlu2 %996  ;;  %v698_v7 = vsel %vm683_vm0, %v657_v6, %v677_v29 }
  0xb7   : > { %3559 = vmatmul.msk.f32.gmra.mxu2 %vm1177_vm7, %v4418_v0  ;;  %v993_v39 = vpop.permute.xlu1 %992 }
  0xba   : > { %3483 = vmatmul.msk.f32.gmra.mxu0 %vm1177_vm7, %v4372_v38  ;;  %3520 = vmatmul.msk.f32.gmra.mxu1 %vm1177_vm7, %v4314_v51  ;;  %v1101_v51 = vsel %vm1090_vm5, %v613_v17, %v831_v21  ;;  %v4545_v17 = vld [vmem:[%s4066_s18 + $0xe8] sm:$0xff] }
  0xbb   : > { %v4457_v5 = vsel %vm1131_vm6, %v1101_v51, %v991_v25  ;;  %868 = vrot.lane.b32.xlu0 %v4461_v34, %s3956_s14  ;;  %864 = vrot.lane.b32.xlu2 %v4402_v50, %s3956_s14  ;;  %v679_v51 = vrot.slane %v4545_v17, 1 }
  0xbd   : > { %v833_v33 = vpop.permute.xlu0 %832 }
  0xbe   : > { %v1102_v35 = vsel %vm1090_vm5, %v562_v19, %v833_v33  ;;  %1028 = vrot.lane.b32.xlu1 %v759_v36, %s3957_s19  ;;  %v4497_v19 = vld [vmem:[%s4066_s18 + $0xd8] sm:$0xff] }
  0xbf   : > { %3560 = vmatmul.msk.f32.gmra.mxu2 %vm1177_vm7, %v4435_v14  ;;  %v4485_v43 = vsel %vm1131_vm6, %v1102_v35, %v993_v39  ;;  %v678_v58 = vrot.slane %v4497_v19, 1  ;;  %v837_v62 = vpop.permute.xlu1 %836 }
  0xc1   : > { %v699_v52 = vsel %vm683_vm0, %v658_v54, %v678_v58 }
  0xc2   : > { %3484 = vmatmul.msk.f32.gmra.mxu0 %vm1177_vm7, %v4392_v20  ;;  %3521 = vmatmul.msk.f32.gmra.mxu1 %vm1177_vm7, %v4341_v18  ;;  %v542_v18 = vrot.slane %v4168_v37, 7 }
  0xc3   : > { %1030 = vrot.lane.b32.xlu0 %v699_v52, %s3957_s19  ;;  %1026 = vrot.lane.b32.xlu2 %v698_v7, %s3957_s19  ;;  %v527_v7 = vrot.slane %v4292_v32, 7  ;;  %v3603_v32 = vld [vmem:[%s7102_s5 + $0x1e0] sm:$0xff] }
  0xc4   : > { %v583_v37 = vsel %vm556_vm3, %v542_v18, %v522_v26  ;;  %v563_v61 = vsel %vm556_vm3, %v522_v26, %v542_v18  ;;  %v841_v26 = vpop.permute.xlu2 %840 }
  0xc5   : > { %v995_v48 = vpop.permute.xlu0 %994  ;;  %v1104_v15 = vsel %vm1090_vm5, %v563_v61, %v837_v62 }
  0xc6   : > { %872 = vrot.lane.b32.xlu1 %v4497_v19, %s3956_s14  ;;  %v4535_v41 = vsel %vm1131_vm6, %v1104_v15, %v997_v16  ;;  %v3605_v16 = vld [vmem:[%s7102_s5 + $0x1f0] sm:$0xff] }
  0xc7   : > { %3561 = vmatmul.msk.f32.gmra.mxu2 %vm1177_vm7, %v4457_v5  ;;  %v999_v27 = vpop.permute.xlu1 %998 }
  0xca   : > { %3485 = vmatmul.msk.f32.gmra.mxu0 %vm1177_vm7, %v4418_v0  ;;  %3522 = vmatmul.msk.f32.gmra.mxu1 %vm1177_vm7, %v4372_v38  ;;  %v615_v38 = vsel %vm597_vm4, %v583_v37, 0.0 }
  0xcb   : > { %v1103_v59 = vsel %vm1090_vm5, %v615_v38, %v835_v47  ;;  %870 = vrot.lane.b32.xlu2 %v4494_v49, %s3956_s14 }
  0xcc   : > { %v4514_v60 = vsel %vm1131_vm6, %v1103_v59, %v995_v48  ;;  %v545_v48 = vrot.slane %v4227_v57, 7 }
  0xcd   : > { %v839_v13 = vpop.permute.xlu0 %838 }
  0xcf   : > { %3562 = vmatmul.msk.f32.gmra.mxu2 %vm1177_vm7, %v4485_v43  ;;  %v843_v36 = vpop.permute.xlu1 %842 }
  0xd0   : > { %v1107_v37 = vsel %vm1090_vm5, %v619_v42, %v843_v36 }
  0xd2   : > { %3486 = vmatmul.msk.f32.gmra.mxu0 %vm1177_vm7, %v4435_v14  ;;  %3523 = vmatmul.msk.f32.gmra.mxu1 %vm1177_vm7, %v4392_v20  ;;  %v523_v20 = vrot.slane %v4177_v40, 7  ;;  %v565_v40 = vsel %vm556_vm3, %v524_v44, %v544_v46  ;;  %v1003_v44 = vpop.permute.xlu2 %1002  ;;  %v719_v46 = vsel %vm683_vm0, %v678_v58, %v658_v54  ;;  %v4605_v58 = vld [vmem:[%s4066_s18 + $0xf8] sm:$0xff] }
  0xd3   : > { %v761_v38 = vsel %vm725_vm1, %v719_v46, 0.0  ;;  %v4601_v47 = vsel %vm1131_vm6, %v1107_v37, %v1003_v44  ;;  %v680_v52 = vrot.slane %v4605_v58, 1  ;;  %v3598_v44 = vld [vmem:[%s7102_s5 + $0x1b8] sm:$0xff] }
  0xd4   : > { %v584_v8 = vsel %vm556_vm3, %v543_v63, %v523_v20  ;;  %v564_v33 = vsel %vm556_vm3, %v523_v20, %v543_v63  ;;  %1032 = vrot.lane.b32.xlu2 %v761_v38, %s3957_s19  ;;  %v3606_v63 = vld [vmem:[%s7102_s5 + $0x1f8] sm:$0xff] }
  0xd5   : > { %v617_v9 = vsel %vm597_vm4, %v584_v8, 0.0  ;;  %v1001_v18 = vpop.permute.xlu0 %1000  ;;  %2123 = vmatpush.msra.mxu3 %v3606_v63  ;;  %v3604_v8 = vld [vmem:[%s7102_s5 + $0x1e8] sm:$0xff]  ;;  %v3593_v63 = vld [vmem:[%s7102_s5 + $0x190] sm:$0xff] }
  0xd6   : > { %v1105_v25 = vsel %vm1090_vm5, %v617_v9, %v839_v13 }
  0xd7   : > { %3563 = vmatmul.msk.f32.gmra.mxu2 %vm1177_vm7, %v4514_v60  ;;  %v4562_v6 = vsel %vm1131_vm6, %v1105_v25, %v999_v27  ;;  %v1005_v61 = vpop.permute.xlu1 %1004  ;;  %2124 = vmatpush.msra.mxu3 %v3605_v16  ;;  %v3602_v27 = vld [vmem:[%s7102_s5 + $0x1d8] sm:$0xff]  ;;  %v3592_v16 = vld [vmem:[%s7102_s5 + $0x188] sm:$0xff] }
  0xd9   : > { %2125 = vmatpush.msra.mxu3 %v3604_v8 }
  0xda   : > { %3487 = vmatmul.msk.f32.gmra.mxu0 %vm1177_vm7, %v4457_v5  ;;  %3524 = vmatmul.msk.f32.gmra.mxu1 %vm1177_vm7, %v4418_v0  ;;  %v4542_v0 = vld [vmem:[%s4066_s18 + $0xe0] sm:$0xff]  ;;  %v847_v15 = vpop.permute.xlu2 %846 }
  0xdb   : > { %v659_v21 = vrot.slane %v4542_v0, 1  ;;  %874 = vrot.lane.b32.xlu0 %v4542_v0, %s3956_s14  ;;  %2126 = vmatpush.msra.mxu3 %v3603_v32 }
  0xdc   : > { %876 = vrot.lane.b32.xlu2 %v4545_v17, %s3956_s14 }
  0xdd   : > { %v700_v30 = vsel %vm683_vm0, %v659_v21, %v679_v51  ;;  %v720_v29 = vsel %vm683_vm0, %v679_v51, %v659_v21  ;;  %v845_v54 = vpop.permute.xlu0 %844  ;;  %v3638_v21 = vld [vmem:[%s7102_s5 + $0x2f8] sm:$0xff]  ;;  %2127 = vmatpush.msra.mxu3 %v3602_v27 }
  0xde   : > { %1034 = vrot.lane.b32.xlu1 %v700_v30, %s3957_s19  ;;  %v763_v35 = vsel %vm725_vm1, %v720_v29, 0.0  ;;  %v1108_v55 = vsel %vm1090_vm5, %v565_v40, %v845_v54  ;;  %v547_v40 = vrot.slane %v4317_v53, 7  ;;  %v2057_v53 = vld [vmem:[%s7102_s5 + $0xf8] sm:$0xff]  ;;  %2349 = vmatpush.msrb.mxu0 %v3638_v21  ;;  %v3600_v29 = vld [vmem:[%s7102_s5 + $0x1c8] sm:$0xff]  ;;  %v2056_v54 = vld [vmem:[%s7102_s5 + $0xf0] sm:$0xff] }
  0xdf   : > { %3564 = vmatmul.msk.f32.gmra.mxu2 %vm1177_vm7, %v4535_v41  ;;  %v4631_v20 = vsel %vm1131_vm6, %v1108_v55, %v1005_v61  ;;  %v2041_v51 = vld [vmem:[%s7102_s5 + $0x78] sm:$0xff]  ;;  %v3595_v61 = vld [vmem:[%s7102_s5 + $0x1a0] sm:$0xff] }
  0xe0   : > { %2575 = vmatpush.msrb.mxu2 %v2057_v53  ;;  %2462 = vmatpush.msrb.mxu1 %v2041_v51  ;;  %v3622_v51 = vld [vmem:[%s7102_s5 + $0x278] sm:$0xff] }
  0xe2   : > { %3488 = vmatmul.msk.f32.gmra.mxu0 %vm1177_vm7, %v4485_v43  ;;  %3525 = vmatmul.msk.f32.gmra.mxu1 %vm1177_vm7, %v4435_v14  ;;  %v1106_v14 = vsel %vm1090_vm5, %v564_v33, %v841_v26  ;;  %v849_v33 = vpop.permute.xlu1 %848  ;;  %v3601_v26 = vld [vmem:[%s7102_s5 + $0x1d0] sm:$0xff]  ;;  %v1009_v42 = vpop.permute.xlu2 %1008 }
  0xe3   : > { %1036 = vrot.lane.b32.xlu0 %v763_v35, %s3957_s19  ;;  %v4579_v39 = vsel %vm1131_vm6, %v1106_v14, %v1001_v18  ;;  %v526_v14 = vrot.slane %v4258_v10, 7  ;;  %v546_v18 = vrot.slane %v4261_v11, 7  ;;  %2128 = vmatpush.msra.mxu3 %v3601_v26  ;;  %v3599_v10 = vld [vmem:[%s7102_s5 + $0x1c0] sm:$0xff] }
  0xe4   : > { %2576 = vmatpush.msrb.mxu2 %v2056_v54 }
  0xe5   : > { %v1007_v13 = vpop.permute.xlu0 %1006  ;;  %2129 = vmatpush.msra.mxu3 %v3600_v29  ;;  %v587_v36 = vsel %vm556_vm3, %v546_v18, %v526_v14  ;;  %v528_v29 = vrot.slane %v4348_v23, 7 }
  0xe6   : > { %v623_v46 = vsel %vm597_vm4, %v587_v36, 0.0 }
  0xe7   : > { %3565 = vmatmul.msk.f32.gmra.mxu2 %vm1177_vm7, %v4562_v6  ;;  %2130 = vmatpush.msra.mxu3 %v3599_v10 }
  0xe9   : > { %2131 = vmatpush.msra.mxu3 %v3598_v44 }
  0xea   : > { %3489 = vmatmul.msk.f32.gmra.mxu0 %vm1177_vm7, %v4514_v60  ;;  %3526 = vmatmul.msk.f32.gmra.mxu1 %vm1177_vm7, %v4457_v5  ;;  %v4587_v5 = vld [vmem:[%s4066_s18 + $0xf0] sm:$0xff]  ;;  %v1011_v55 = vpop.permute.xlu1 %1010 }
  0xeb   : > { %878 = vrot.lane.b32.xlu1 %v4587_v5, %s3956_s14  ;;  %v660_v59 = vrot.slane %v4587_v5, 1  ;;  %880 = vrot.lane.b32.xlu0 %v4605_v58, %s3956_s14 }
  0xed   : > { %v721_v62 = vsel %vm683_vm0, %v680_v52, %v660_v59  ;;  %v701_v11 = vsel %vm683_vm0, %v660_v59, %v680_v52  ;;  %v851_v38 = vpop.permute.xlu0 %850  ;;  %v3597_v59 = vld [vmem:[%s7102_s5 + $0x1b0] sm:$0xff] }
  0xee   : > { %1038 = vrot.lane.b32.xlu2 %v701_v11, %s3957_s19  ;;  %2132 = vmatpush.msra.mxu3 %v3597_v59  ;;  %v1111_v52 = vsel %vm1090_vm5, %v623_v46, %v851_v38  ;;  %v550_v59 = vrot.slane %v4461_v34, 7 }
  0xef   : > { %3566 = vmatmul.msk.f32.gmra.mxu2 %vm1177_vm7, %v4579_v39 }
  0xf2   : > { %3490 = vmatmul.msk.f32.gmra.mxu0 %vm1177_vm7, %v4535_v41  ;;  %3527 = vmatmul.msk.f32.gmra.mxu1 %vm1177_vm7, %v4485_v43  ;;  %v525_v43 = vrot.slane %v4224_v56, 7  ;;  %v765_v56 = vsel %vm725_vm1, %v721_v62, 0.0  ;;  %v4750_v62 = vsel %vm1131_vm6, %v1111_v52, %v1011_v55  ;;  %v855_v53 = vpop.permute.xlu1 %854 }
  0xf3   : > { %1040 = vrot.lane.b32.xlu1 %v765_v56, %s3957_s19  ;;  %1042 = vrot.lane.b32.xlu0 %v4059_v2, %s3957_s19  ;;  %v3594_v56 = vld [vmem:[%s7102_s5 + $0x198] sm:$0xff] }
  0xf4   : > { %v586_v57 = vsel %vm556_vm3, %v545_v48, %v525_v43  ;;  %v566_v30 = vsel %vm556_vm3, %v525_v43, %v545_v48  ;;  %v3637_v43 = vld [vmem:[%s7102_s5 + $0x2f0] sm:$0xff] }
  0xf5   : > { %v1110_v35 = vsel %vm1090_vm5, %v566_v30, %v849_v33  ;;  %v2040_v48 = vld [vmem:[%s7102_s5 + $0x70] sm:$0xff]  ;;  %2350 = vmatpush.msrb.mxu0 %v3637_v43 }
  0xf6   : > { %v4709_v37 = vsel %vm1131_vm6, %v1110_v35, %v1009_v42  ;;  %2463 = vmatpush.msrb.mxu1 %v2040_v48  ;;  %882 = vrot.lane.b32.xlu2 %v3955_v1, %s3956_s14  ;;  %v548_v35 = vrot.slane %v4351_v28, 7  ;;  %v2039_v42 = vld [vmem:[%s7102_s5 + $0x68] sm:$0xff]  ;;  %v3621_v43 = vld [vmem:[%s7102_s5 + $0x270] sm:$0xff] }
  0xf7   : > { %3567 = vmatmul.msk.f32.gmra.mxu2 %vm1177_vm7, %v4601_v47 }
  0xf8   : > { %2464 = vmatpush.msrb.mxu1 %v2039_v42  ;;  %v589_v28 = vsel %vm556_vm3, %v548_v35, %v528_v29 }
  0xf9   : > { %v627_v46 = vsel %vm597_vm4, %v589_v28, 0.0  ;;  %v3620_v28 = vld [vmem:[%s7102_s5 + $0x268] sm:$0xff] }
  0xfa   : > { %3491 = vmatmul.msk.f32.gmra.mxu0 %vm1177_vm7, %v4562_v6  ;;  %3528 = vmatmul.msk.f32.gmra.mxu1 %vm1177_vm7, %v4514_v60  ;;  %v621_v60 = vsel %vm597_vm4, %v586_v57, 0.0  ;;  %v853_v57 = vpop.permute.xlu2 %852  ;;  %v1017_v11 = vpop.permute.xlu1 %1016 }
  0xfb   : > { %v1109_v9 = vsel %vm1090_vm5, %v621_v60, %v847_v15  ;;  %884 = vrot.lane.b32.xlu1 %v3955_v1, %s3956_s14  ;;  %886 = vrot.lane.b32.xlu0 %v3955_v1, %s3956_s14 }
  0xfc   : > { %v4674_v25 = vsel %vm1131_vm6, %v1109_v9, %v1007_v13  ;;  %v3591_v9 = vld [vmem:[%s7102_s5 + $0x180] sm:$0xff] }
  0xfe   : > { %1044 = vrot.lane.b32.xlu2 %v4095_v12, %s3957_s19 }
  0xff   : > { %3568 = vmatmul.msk.f32.gmra.mxu2 %vm1177_vm7, %v4631_v20 }
 0x102   : > { %3492 = vmatmul.msk.f32.gmra.mxu0 %vm1177_vm7, %v4579_v39  ;;  %3529 = vmatmul.msk.f32.gmra.mxu1 %vm1177_vm7, %v4535_v41  ;;  %v4669_v41 = vsel %vm556_vm3, %v547_v40, %v527_v7 }
 0x103   : > { %1046 = vrot.lane.b32.xlu1 %v4059_v2, %s3957_s19  ;;  %v3596_v2 = vld [vmem:[%s7102_s5 + $0x1a8] sm:$0xff]  ;;  %1048 = vrot.lane.b32.xlu0 %v4095_v12, %s3957_s19  ;;  %v625_v32 = vsel %vm597_vm4, %v4669_v41, 0.0  ;;  %v1015_v41 = vpop.permute.xlu2 %1014 }
 0x104   : > { %2133 = vmatpush.msra.mxu3 %v3596_v2  ;;  %v2055_v12 = vld [vmem:[%s7102_s5 + $0xe8] sm:$0xff]  ;;  %v1113_v27 = vsel %vm1090_vm5, %v625_v32, %v855_v53 }
 0x105   : > { %2577 = vmatpush.msrb.mxu2 %v2055_v12  ;;  %v4809_v33 = vsel %vm1131_vm6, %v1113_v27, %v1015_v41  ;;  %v3635_v12 = vld [vmem:[%s7102_s5 + $0x2e0] sm:$0xff] }
 0x106   : > { %2134 = vmatpush.msra.mxu3 %v3595_v61  ;;  %888 = vrot.lane.b32.xlu2 %v3955_v1, %s3956_s14  ;;  %v2038_v27 = vld [vmem:[%s7102_s5 + $0x60] sm:$0xff]  ;;  %s3891_s14 = scalar_lea.hbm %s3890_s17, 256 }
 0x107   : > { %3569 = vmatmul.msk.f32.gmra.mxu2 %vm1177_vm7, %v4674_v25  ;;  %2465 = vmatpush.msrb.mxu1 %v2038_v27  ;;  %p3892_p12 = scmp.ne.s32.totalorder %s3890_s17, %s3891_s14  ;;  %p3897_p2 = scmp.lt.s32.totalorder %s3895_s22, %s3891_s14 }
 0x108   : > { %2135 = vmatpush.msra.mxu3 %v3594_v56 }
 0x109   : > { %p3893_p13 = pnand %p3892_p12, %p4039_p4  ;;  %p3898_p3 = por %p3897_p2, %p3896_p1 }
 0x10a   : > { %3493 = vmatmul.msk.f32.gmra.mxu0 %vm1177_vm7, %v4601_v47  ;;  %3530 = vmatmul.msk.f32.gmra.mxu1 %vm1177_vm7, %v4562_v6  ;;  %v4713_v6 = vsel %vm556_vm3, %v527_v7, %v547_v40  ;;  %v1013_v40 = vpop.permute.xlu0 %1012 }
 0x10b   : > { %2136 = vmatpush.msra.mxu3 %v3593_v63  ;;  %v859_v38 = vpop.permute.xlu2 %858  ;;  %p3894_p0 = pneg %p3893_p13 }
 0x10c   : > { %v1115_v52 = vsel %vm1090_vm5, %v627_v46, %v859_v38 }
 0x10d   : > { %2137 = vmatpush.msra.mxu3 %v3592_v16  ;;  %p3899_p5 = pnand %p3898_p3, %p3894_p0 }
 0x10f   : > { %3570 = vmatmul.msk.f32.gmra.mxu2 %vm1177_vm7, %v4709_v37  ;;  %2138 = vmatpush.msra.mxu3 %v3591_v9  ;;  %v529_v9 = vrot.slane %v4399_v45, 7 }
 0x110   : > { %v4762_v60 = vpop.f32.mrf.mxu0  ;;  %v4764_v15 = vpop.f32.mrf.mxu1 }
 0x111   : > { %2236 = vmatpush.msrb.mxu3 %v3622_v51  ;;  %v549_v51 = vrot.slane %v4402_v50, 7 }
 0x112   : > { %3494 = vmatmul.msk.f32.gmra.mxu0 %vm1177_vm7, %v4631_v20  ;;  %3531 = vmatmul.msk.f32.gmra.mxu1 %vm1177_vm7, %v4579_v39  ;;  %v567_v39 = vsel %vm556_vm3, %v526_v14, %v546_v18  ;;  %v857_v26 = vpop.permute.xlu0 %856 }
 0x113   : > { %v1112_v7 = vsel %vm1090_vm5, %v567_v39, %v853_v57  ;;  %v1114_v10 = vsel %vm1090_vm5, %v4713_v6, %v857_v26  ;;  %v530_v6 = vrot.slane %v4442_v22, 7  ;;  %2237 = vmatpush.msrb.mxu3 %v3621_v43  ;;  %v2054_v22 = vld [vmem:[%s7102_s5 + $0xe0] sm:$0xff] }
 0x114   : > { %v4782_v13 = vsel %vm1131_vm6, %v1112_v7, %v1013_v40  ;;  %v4832_v36 = vsel %vm1131_vm6, %v1114_v10, %v1017_v11  ;;  %2578 = vmatpush.msrb.mxu2 %v2054_v22  ;;  %v569_v7 = vsel %vm556_vm3, %v528_v29, %v548_v35  ;;  %v861_v40 = vpop.permute.xlu1 %860  ;;  %v590_v35 = vsel %vm556_vm3, %v549_v51, %v529_v9 }
 0x115   : > { %v4859_v39 = vsel %vm556_vm3, %v550_v59, %v530_v6  ;;  %v1116_v41 = vsel %vm1090_vm5, %v569_v7, %v861_v40  ;;  %v4902_v42 = vsel %vm556_vm3, %v530_v6, %v550_v59  ;;  %2238 = vmatpush.msrb.mxu3 %v3620_v28  ;;  %v2037_v7 = vld [vmem:[%s7102_s5 + $0x58] sm:$0xff] }
 0x116   : > { %2466 = vmatpush.msrb.mxu1 %v2037_v7 }
 0x117   : > { %3571 = vmatmul.msk.f32.gmra.mxu2 %vm1177_vm7, %v4750_v62 }
 0x11a   : > { %3495 = vmatmul.msk.f32.gmra.mxu0 %vm1177_vm7, %v4674_v25  ;;  %3532 = vmatmul.msk.f32.gmra.mxu1 %vm1177_vm7, %v4601_v47  ;;  %v4776_v8 = vpop.f32.mrf.mxu2  ;;  %v1019_v55 = vpop.permute.xlu0 %1018 }
 0x11b   : > { %v4862_v57 = vsel %vm1131_vm6, %v1115_v52, %v1019_v55 }
 0x11f   : > { %v4789_v21 = vpop.f32.mrf.mxu0  ;;  %v4791_v47 = vpop.f32.mrf.mxu1  ;;  %3572 = vmatmul.msk.f32.gmra.mxu2 %vm1177_vm7, %v4782_v13 }
 0x120   : > { %v1023_v6 = vpop.permute.xlu1 %1022 }
 0x122   : > { %3496 = vmatmul.msk.f32.gmra.mxu0 %vm1177_vm7, %v4709_v37  ;;  %3533 = vmatmul.msk.f32.gmra.mxu1 %vm1177_vm7, %v4631_v20  ;;  %v4806_v30 = vpop.f32.mrf.mxu2  ;;  %v3636_v20 = vld [vmem:[%s7102_s5 + $0x2e8] sm:$0xff]  ;;  %v863_v10 = vpop.permute.xlu0 %862 }
 0x123   : > { %2351 = vmatpush.msrb.mxu0 %v3636_v20 }
 0x125   : > { %2352 = vmatpush.msrb.mxu0 %v3635_v12 }
 0x127   : > { %v1313_v14 = vpop.f32.mrf.mxu0  ;;  %v1447_v18 = vpop.f32.mrf.mxu1  ;;  %3573 = vmatmul.msk.f32.gmra.mxu2 %vm1177_vm7, %v4809_v33 }
 0x128   : > { %v1448_v1 = vadd.f32 %v1447_v18, %v1313_v14  ;;  %v1021_v18 = vpop.permute.xlu2 %1020 }
 0x129   : > { %v4898_v20 = vsel %vm1131_vm6, %v1116_v41, %v1021_v18 }
 0x12a   : > { %3497 = vmatmul.msk.f32.gmra.mxu0 %vm1177_vm7, %v4750_v62  ;;  %3534 = vmatmul.msk.f32.gmra.mxu1 %vm1177_vm7, %v4674_v25  ;;  %v1584_v23 = vpop.f32.mrf.mxu2  ;;  %v4841_v25 = vld [vmem:[%s7101_s4] ss:$0 sm:$0xff] }
 0x12b   : > { %v1688_v44 = vadd.f32 %v1584_v23, %v1448_v1  ;;  %v629_v1 = vsel %vm597_vm4, %v590_v35, 0.0 }
 0x12c   : > { %v1117_v38 = vsel %vm1090_vm5, %v629_v1, %v863_v10 }
 0x12d   : > { %v1728_v34 = vadd.f32 %v4841_v25, %v1688_v44  ;;  %v4923_v43 = vsel %vm1131_vm6, %v1117_v38, %v1023_v6 }
 0x12f   : > { %v1316_v54 = vpop.f32.mrf.mxu0  ;;  %v1450_v2 = vpop.f32.mrf.mxu1  ;;  %3574 = vmatmul.msk.f32.gmra.mxu2 %vm1177_vm7, %v4832_v36  ;;  %v4864_v63 = vmax.f32 %v1728_v34, 0.0  ;;  %v570_v34 = vsel %vm556_vm3, %v529_v9, %v549_v51 }
 0x130   : > { %v1451_v48 = vadd.f32 %v1450_v2, %v1316_v54  ;;  %v865_v52 = vpop.permute.xlu2 %864  ;;  %v1025_v51 = vpop.permute.xlu0 %1024 }
 0x131   : > { %v1811_v26 = vrot.slane %v4864_v63, 7  ;;  %v1118_v9 = vsel %vm1090_vm5, %v570_v34, %v865_v52  ;;  %v2052_v34 = vld [vmem:[%s7102_s5 + $0xd0] sm:$0xff] }
 0x132   : > { %3498 = vmatmul.msk.f32.gmra.mxu0 %vm1177_vm7, %v4782_v13  ;;  %3535 = vmatmul.msk.f32.gmra.mxu1 %vm1177_vm7, %v4709_v37  ;;  %v1587_v61 = vpop.f32.mrf.mxu2 }
 0x133   : > { %v1689_v56 = vadd.f32 %v1587_v61, %v1451_v48 }
 0x135   : > { %v1729_v16 = vadd.f32 %v4841_v25, %v1689_v56  ;;  %v2053_v56 = vld [vmem:[%s7102_s5 + $0xd8] sm:$0xff] }
 0x136   : > { %2579 = vmatpush.msrb.mxu2 %v2053_v56 }
 0x137   : > { %v4870_v37 = vmax.f32 %v1729_v16, 0.0  ;;  %v1319_v32 = vpop.f32.mrf.mxu0  ;;  %v1453_v53 = vpop.f32.mrf.mxu1  ;;  %3575 = vmatmul.msk.f32.gmra.mxu2 %vm1177_vm7, %v4862_v57  ;;  %v3634_v16 = vld [vmem:[%s7102_s5 + $0x2d8] sm:$0xff] }
 0x138   : > { %v1454_v45 = vadd.f32 %v1453_v53, %v1319_v32  ;;  %2353 = vmatpush.msrb.mxu0 %v3634_v16  ;;  %v1027_v10 = vpop.permute.xlu2 %1026  ;;  %v869_v38 = vpop.permute.xlu0 %868  ;;  %2580 = vmatpush.msrb.mxu2 %v2052_v34 }
 0x139   : > { %v1829_v14 = vrot.slane %v4870_v37, 7 }
 0x13a   : > { %3499 = vmatmul.msk.f32.gmra.mxu0 %vm1177_vm7, %v4809_v33  ;;  %3536 = vmatmul.msk.f32.gmra.mxu1 %vm1177_vm7, %v4750_v62  ;;  %v1590_v50 = vpop.f32.mrf.mxu2 }
 0x13b   : > { %v4890_v29 = vsel %vm556_vm3, %v1829_v14, %v1811_v26  ;;  %v1690_v62 = vadd.f32 %v1590_v50, %v1454_v45  ;;  %v4919_v2 = vsel %vm556_vm3, %v1811_v26, %v1829_v14  ;;  %v4958_v45 = vsel %vm1131_vm6, %v1118_v9, %v1025_v51  ;;  %v867_v14 = vpop.permute.xlu1 %866  ;;  %v3619_v50 = vld [vmem:[%s7102_s5 + $0x260] sm:$0xff] }
 0x13c   : > { %3639 = vmatmul.msk.f32.vlgmr.msra.gmra.mxu3 %vm597_vm4, %v4890_v29  ;;  %v631_v26 = vsel %vm597_vm4, %v4859_v39, 0.0 }
 0x13d   : > { %v1730_v46 = vadd.f32 %v4841_v25, %v1690_v62  ;;  %2239 = vmatpush.msrb.mxu3 %v3619_v50  ;;  %v1119_v1 = vsel %vm1090_vm5, %v631_v26, %v867_v14  ;;  %v2036_v26 = vld [vmem:[%s7102_s5 + $0x50] sm:$0xff]  ;;  %v3618_v14 = vld [vmem:[%s7102_s5 + $0x258] sm:$0xff] }
 0x13e   : > { %v4980_v28 = vsel %vm1131_vm6, %v1119_v1, %v1027_v10  ;;  %2467 = vmatpush.msrb.mxu1 %v2036_v26  ;;  %v3632_v26 = vld [vmem:[%s7102_s5 + $0x2c8] sm:$0xff] }
 0x13f   : > { %v1322_v11 = vpop.f32.mrf.mxu0  ;;  %v1456_v23 = vpop.f32.mrf.mxu1  ;;  %3576 = vmatmul.msk.f32.gmra.mxu2 %vm1177_vm7, %v4898_v20  ;;  %v4925_v48 = vmax.f32 %v1730_v46, 0.0  ;;  %2240 = vmatpush.msrb.mxu3 %v3618_v14 }
 0x140   : > { %v1457_v44 = vadd.f32 %v1456_v23, %v1322_v11 }
 0x141   : > { %v1812_v32 = vrot.slane %v4925_v48, 7 }
 0x142   : > { %3500 = vmatmul.msk.f32.gmra.mxu0 %vm1177_vm7, %v4832_v36  ;;  %3537 = vmatmul.msk.f32.gmra.mxu1 %vm1177_vm7, %v4782_v13  ;;  %v1593_v59 = vpop.f32.mrf.mxu2 }
 0x143   : > { %v1691_v54 = vadd.f32 %v1593_v59, %v1457_v44  ;;  %v1029_v16 = vpop.permute.xlu1 %1028 }
 0x144   : > { %2142 = vmatmul.f32.gmra.mxu3 %v4919_v2 }
 0x145   : > { %v1731_v22 = vadd.f32 %v4841_v25, %v1691_v54  ;;  %v531_v54 = vrot.slane %v4494_v49, 7 }
 0x147   : > { %v4930_v13 = vmax.f32 %v1731_v22, 0.0  ;;  %v1325_v55 = vpop.f32.mrf.mxu0  ;;  %v1459_v61 = vpop.f32.mrf.mxu1  ;;  %3577 = vmatmul.msk.f32.gmra.mxu2 %vm1177_vm7, %v4923_v43  ;;  %v551_v22 = vrot.slane %v4497_v19, 7 }
 0x148   : > { %v1460_v40 = vadd.f32 %v1459_v61, %v1325_v55  ;;  %v1120_v55 = vsel %vm1090_vm5, %v4902_v42, %v869_v38  ;;  %v532_v38 = vrot.slane %v4542_v0, 7 }
 0x149   : > { %v1830_v53 = vrot.slane %v4930_v13, 7  ;;  %v592_v7 = vsel %vm556_vm3, %v551_v22, %v531_v54  ;;  %v5012_v42 = vsel %vm1131_vm6, %v1120_v55, %v1029_v16  ;;  %v2051_v55 = vld [vmem:[%s7102_s5 + $0xc8] sm:$0xff] }
 0x14a   : > { %3501 = vmatmul.msk.f32.gmra.mxu0 %vm1177_vm7, %v4862_v57  ;;  %3538 = vmatmul.msk.f32.gmra.mxu1 %vm1177_vm7, %v4809_v33  ;;  %v1596_v12 = vpop.f32.mrf.mxu2  ;;  %v633_v9 = vsel %vm597_vm4, %v592_v7, 0.0 }
 0x14b   : > { %v4952_v27 = vsel %vm556_vm3, %v1830_v53, %v1812_v32  ;;  %v1692_v41 = vadd.f32 %v1596_v12, %v1460_v40  ;;  %v4976_v23 = vsel %vm556_vm3, %v1812_v32, %v1830_v53  ;;  %v533_v32 = vrot.slane %v4587_v5, 7  ;;  %2581 = vmatpush.msrb.mxu2 %v2051_v55 }
 0x14c   : > { %7176 = vst [vmem:[#allocation5_spill] sm:$0xff] %v4952_v27  ;;  %3640 = vmatmul.msk.f32.gmra.mxu3 %vm597_vm4, %v4952_v27  ;;  %v553_v53 = vrot.slane %v4605_v58, 7 }
 0x14d   : > { %v1732_v62 = vadd.f32 %v4841_v25, %v1692_v41  ;;  %7177 = vst [vmem:[#allocation6_spill] sm:$0xff] %v4976_v23  ;;  %v3633_v41 = vld [vmem:[%s7102_s5 + $0x2d0] sm:$0xff] }
 0x14e   : > { %2354 = vmatpush.msrb.mxu0 %v3633_v41  ;;  %v5041_v1 = vsel %vm556_vm3, %v553_v53, %v533_v32  ;;  %v3617_v41 = vld [vmem:[%s7102_s5 + $0x250] sm:$0xff] }
 0x14f   : > { %v1328_v18 = vpop.f32.mrf.mxu0  ;;  %v1462_v33 = vpop.f32.mrf.mxu1  ;;  %3578 = vmatmul.msk.f32.gmra.mxu2 %vm1177_vm7, %v4958_v45  ;;  %v4982_v44 = vmax.f32 %v1732_v62, 0.0  ;;  %2241 = vmatpush.msrb.mxu3 %v3617_v41  ;;  %v3631_v41 = vld [vmem:[%s7102_s5 + $0x2c0] sm:$0xff] }
 0x150   : > { %v1463_v35 = vadd.f32 %v1462_v33, %v1328_v18  ;;  %v1031_v33 = vpop.permute.xlu0 %1030  ;;  %2355 = vmatpush.msrb.mxu0 %v3632_v26 }
 0x151   : > { %v1813_v61 = vrot.slane %v4982_v44, 7 }
 0x152   : > { %3502 = vmatmul.msk.f32.gmra.mxu0 %vm1177_vm7, %v4898_v20  ;;  %3539 = vmatmul.msk.f32.gmra.mxu1 %vm1177_vm7, %v4832_v36  ;;  %v1599_v39 = vpop.f32.mrf.mxu2 }
 0x153   : > { %v1693_v11 = vadd.f32 %v1599_v39, %v1463_v35  ;;  %2356 = vmatpush.msrb.mxu0 %v3631_v41 }
 0x154   : > { %2148 = vmatmul.f32.gmra.mxu3 %v4976_v23 }
 0x155   : > { %v1733_v46 = vadd.f32 %v4841_v25, %v1693_v11 }
 0x157   : > { %v4985_v6 = vmax.f32 %v1733_v46, 0.0  ;;  %v1331_v59 = vpop.f32.mrf.mxu0  ;;  %v1465_v36 = vpop.f32.mrf.mxu1  ;;  %3579 = vmatmul.msk.f32.gmra.mxu2 %vm1177_vm7, %v4980_v28 }
 0x158   : > { %v1466_v52 = vadd.f32 %v1465_v36, %v1331_v59  ;;  %v873_v46 = vpop.permute.xlu1 %872 }
 0x159   : > { %v1831_v56 = vrot.slane %v4985_v6, 7 }
 0x15a   : > { %3503 = vmatmul.msk.f32.gmra.mxu0 %vm1177_vm7, %v4923_v43  ;;  %3540 = vmatmul.msk.f32.gmra.mxu1 %vm1177_vm7, %v4862_v57  ;;  %v1602_v49 = vpop.f32.mrf.mxu2  ;;  %v871_v57 = vpop.permute.xlu2 %870 }
 0x15b   : > { %v5004_v19 = vsel %vm556_vm3, %v1831_v56, %v1813_v61  ;;  %v1694_v40 = vadd.f32 %v1602_v49, %v1466_v52  ;;  %v1121_v18 = vsel %vm1090_vm5, %v633_v9, %v871_v57  ;;  %v5037_v62 = vsel %vm556_vm3, %v1813_v61, %v1831_v56  ;;  %v875_v57 = vpop.permute.xlu0 %874 }
 0x15c   : > { %7178 = vst [vmem:[#allocation7_spill] sm:$0xff] %v5004_v19  ;;  %3641 = vmatmul.msk.f32.gmra.mxu3 %vm597_vm4, %v5004_v19  ;;  %v5045_v10 = vsel %vm1131_vm6, %v1121_v18, %v1031_v33  ;;  %v552_v52 = vrot.slane %v4545_v17, 7 }
 0x15d   : > { %v1734_v58 = vadd.f32 %v4841_v25, %v1694_v40  ;;  %7179 = vst [vmem:[#allocation8_spill] sm:$0xff] %v5037_v62  ;;  %v5082_v40 = vsel %vm556_vm3, %v533_v32, %v553_v53  ;;  %v2035_v32 = vld [vmem:[%s7102_s5 + $0x48] sm:$0xff] }
 0x15e   : > { %v593_v49 = vsel %vm556_vm3, %v552_v52, %v532_v38  ;;  %2468 = vmatpush.msrb.mxu1 %v2035_v32 }
 0x15f   : > { %v1334_v51 = vpop.f32.mrf.mxu0  ;;  %v1468_v12 = vpop.f32.mrf.mxu1  ;;  %3580 = vmatmul.msk.f32.gmra.mxu2 %vm1177_vm7, %v5012_v42  ;;  %v5047_v39 = vmax.f32 %v1734_v58, 0.0  ;;  %v635_v9 = vsel %vm597_vm4, %v593_v49, 0.0 }
 0x160   : > { %v1469_v5 = vadd.f32 %v1468_v12, %v1334_v51  ;;  %v1035_v58 = vpop.permute.xlu1 %1034 }
 0x162   : > { %3504 = vmatmul.msk.f32.gmra.mxu0 %vm1177_vm7, %v4958_v45  ;;  %3541 = vmatmul.msk.f32.gmra.mxu1 %vm1177_vm7, %v4898_v20  ;;  %v1605_v50 = vpop.f32.mrf.mxu2  ;;  %v572_v20 = vsel %vm556_vm3, %v531_v54, %v551_v22  ;;  %v1814_v54 = vrot.slane %v5047_v39, 7  ;;  %v1033_v22 = vpop.permute.xlu2 %1032 }
 0x163   : > { %v1695_v35 = vadd.f32 %v1605_v50, %v1469_v5  ;;  %v1122_v56 = vsel %vm1090_vm5, %v572_v20, %v873_v46  ;;  %v1123_v5 = vsel %vm1090_vm5, %v635_v9, %v875_v57  ;;  %v573_v46 = vsel %vm556_vm3, %v532_v38, %v552_v52 }
 0x164   : > { %2154 = vmatmul.f32.gmra.mxu3 %v5037_v62  ;;  %v5078_v7 = vsel %vm1131_vm6, %v1122_v56, %v1033_v22  ;;  %v1037_v22 = vpop.permute.xlu0 %1036 }
 0x165   : > { %v1735_v11 = vadd.f32 %v4841_v25, %v1695_v35  ;;  %v5109_v35 = vsel %vm1131_vm6, %v1123_v5, %v1035_v58 }
 0x167   : > { %v5053_v59 = vmax.f32 %v1735_v11, 0.0  ;;  %v1337_v36 = vpop.f32.mrf.mxu0  ;;  %v1471_v34 = vpop.f32.mrf.mxu1  ;;  %3581 = vmatmul.msk.f32.gmra.mxu2 %vm1177_vm7, %v5045_v10 }
 0x168   : > { %v1472_v61 = vadd.f32 %v1471_v34, %v1337_v36  ;;  %v879_v9 = vpop.permute.xlu1 %878 }
 0x169   : > { %v1832_v0 = vrot.slane %v5053_v59, 7 }
 0x16a   : > { %3505 = vmatmul.msk.f32.gmra.mxu0 %vm1177_vm7, %v4980_v28  ;;  %3542 = vmatmul.msk.f32.gmra.mxu1 %vm1177_vm7, %v4923_v43  ;;  %v1608_v17 = vpop.f32.mrf.mxu2  ;;  %v877_v36 = vpop.permute.xlu2 %876 }
 0x16b   : > { %v5070_v16 = vsel %vm556_vm3, %v1832_v0, %v1814_v54  ;;  %v1696_v43 = vadd.f32 %v1608_v17, %v1472_v61  ;;  %v5105_v50 = vsel %vm556_vm3, %v1814_v54, %v1832_v0  ;;  %v1124_v56 = vsel %vm1090_vm5, %v573_v46, %v877_v36 }
 0x16c   : > { %7180 = vst [vmem:[#allocation9_spill] sm:$0xff] %v5070_v16  ;;  %3642 = vmatmul.msk.f32.gmra.mxu3 %vm597_vm4, %v5070_v16  ;;  %v5135_v17 = vsel %vm1131_vm6, %v1124_v56, %v1037_v22  ;;  %v881_v36 = vpop.permute.xlu0 %880 }
 0x16d   : > { %v1736_v14 = vadd.f32 %v4841_v25, %v1696_v43  ;;  %7181 = vst [vmem:[#allocation10_spill] sm:$0xff] %v5105_v50  ;;  %v637_v43 = vsel %vm597_vm4, %v5041_v1, 0.0  ;;  %v2034_v1 = vld [vmem:[%s7102_s5 + $0x40] sm:$0xff] }
 0x16e   : > { %2469 = vmatpush.msrb.mxu1 %v2034_v1 }
 0x16f   : > { %v1340_v51 = vpop.f32.mrf.mxu0  ;;  %v1474_v12 = vpop.f32.mrf.mxu1  ;;  %3582 = vmatmul.msk.f32.gmra.mxu2 %vm1177_vm7, %v5078_v7  ;;  %v5111_v11 = vmax.f32 %v1736_v14, 0.0 }
 0x170   : > { %v1475_v53 = vadd.f32 %v1474_v12, %v1340_v51  ;;  %v2050_v51 = vld [vmem:[%s7102_s5 + $0xc0] sm:$0xff]  ;;  %v3616_v12 = vld [vmem:[%s7102_s5 + $0x248] sm:$0xff] }
 0x171   : > { %v1815_v54 = vrot.slane %v5111_v11, 7  ;;  %2582 = vmatpush.msrb.mxu2 %v2050_v51  ;;  %2242 = vmatpush.msrb.mxu3 %v3616_v12  ;;  %v3629_v51 = vld [vmem:[%s7102_s5 + $0x2b0] sm:$0xff] }
 0x172   : > { %3506 = vmatmul.msk.f32.gmra.mxu0 %vm1177_vm7, %v5012_v42  ;;  %3543 = vmatmul.msk.f32.gmra.mxu1 %vm1177_vm7, %v4958_v45  ;;  %v1611_v18 = vpop.f32.mrf.mxu2  ;;  %v1039_v14 = vpop.permute.xlu2 %1038  ;;  %v2032_v12 = vld [vmem:[%s7102_s5 + $0x30] sm:$0xff] }
 0x173   : > { %v1697_v33 = vadd.f32 %v1611_v18, %v1475_v53  ;;  %v1125_v53 = vsel %vm1090_vm5, %v637_v43, %v879_v9  ;;  %v2033_v9 = vld [vmem:[%s7102_s5 + $0x38] sm:$0xff] }
 0x174   : > { %2160 = vmatmul.f32.gmra.mxu3 %v5105_v50  ;;  %2470 = vmatpush.msrb.mxu1 %v2033_v9 }
 0x175   : > { %v1737_v20 = vadd.f32 %v4841_v25, %v1697_v33  ;;  %v5166_v33 = vsel %vm1131_vm6, %v1125_v53, %v1039_v14  ;;  %v2031_v53 = vld [vmem:[%s7102_s5 + $0x28] sm:$0xff] }
 0x176   : > { %2471 = vmatpush.msrb.mxu1 %v2032_v12  ;;  %v2028_v12 = vld [vmem:[%s7102_s5 + $0x10] sm:$0xff] }
 0x177   : > { %v5116_v45 = vmax.f32 %v1737_v20, 0.0  ;;  %v1343_v34 = vpop.f32.mrf.mxu0  ;;  %v1477_v55 = vpop.f32.mrf.mxu1  ;;  %3583 = vmatmul.msk.f32.gmra.mxu2 %vm1177_vm7, %v5109_v35 }
 0x178   : > { %v1478_v61 = vadd.f32 %v1477_v55, %v1343_v34  ;;  %2472 = vmatpush.msrb.mxu1 %v2031_v53 }
 0x179   : > { %v1833_v0 = vrot.slane %v5116_v45, 7 }
 0x17a   : > { %3507 = vmatmul.msk.f32.gmra.mxu0 %vm1177_vm7, %v5045_v10  ;;  %3544 = vmatmul.msk.f32.gmra.mxu1 %vm1177_vm7, %v4980_v28  ;;  %v1614_v38 = vpop.f32.mrf.mxu2  ;;  %v883_v1 = vpop.permute.xlu2 %882 }
 0x17b   : > { %v5129_v52 = vsel %vm556_vm3, %v1833_v0, %v1815_v54  ;;  %v1698_v49 = vadd.f32 %v1614_v38, %v1478_v61  ;;  %v5162_v18 = vsel %vm556_vm3, %v1815_v54, %v1833_v0  ;;  %v2049_v61 = vld [vmem:[%s7102_s5 + $0xb8] sm:$0xff]  ;;  %v1126_v54 = vsel %vm1090_vm5, %v5082_v40, %v881_v36  ;;  %v1041_v38 = vpop.permute.xlu1 %1040 }
 0x17c   : > { %7182 = vst [vmem:[#allocation11_spill] sm:$0xff] %v5129_v52  ;;  %3643 = vmatmul.msk.f32.gmra.mxu3 %vm597_vm4, %v5129_v52  ;;  %2583 = vmatpush.msrb.mxu2 %v2049_v61  ;;  %v3630_v40 = vld [vmem:[%s7102_s5 + $0x2b8] sm:$0xff] }
 0x17d   : > { %v1738_v32 = vadd.f32 %v4841_v25, %v1698_v49  ;;  %7183 = vst [vmem:[#allocation12_spill] sm:$0xff] %v5162_v18  ;;  %v2048_v49 = vld [vmem:[%s7102_s5 + $0xb0] sm:$0xff]  ;;  %2357 = vmatpush.msrb.mxu0 %v3630_v40  ;;  %v2045_v36 = vld [vmem:[%s7102_s5 + $0x98] sm:$0xff] }
 0x17e   : > { %2584 = vmatpush.msrb.mxu2 %v2048_v49  ;;  %v2044_v49 = vld [vmem:[%s7102_s5 + $0x90] sm:$0xff]  ;;  %v2029_v40 = vld [vmem:[%s7102_s5 + $0x18] sm:$0xff] }
 0x17f   : > { %v1346_v57 = vpop.f32.mrf.mxu0  ;;  %v1480_v28 = vpop.f32.mrf.mxu1  ;;  %3584 = vmatmul.msk.f32.gmra.mxu2 %vm1177_vm7, %v5135_v17  ;;  %v5168_v20 = vmax.f32 %v1738_v32, 0.0  ;;  %2358 = vmatpush.msrb.mxu0 %v3629_v51  ;;  %v3628_v32 = vld [vmem:[%s7102_s5 + $0x2a8] sm:$0xff]  ;;  %v3625_v51 = vld [vmem:[%s7102_s5 + $0x290] sm:$0xff] }
 0x180   : > { %v1481_v26 = vadd.f32 %v1480_v28, %v1346_v57  ;;  %v2047_v28 = vld [vmem:[%s7102_s5 + $0xa8] sm:$0xff] }
 0x181   : > { %v1816_v0 = vrot.slane %v5168_v20, 7  ;;  %2585 = vmatpush.msrb.mxu2 %v2047_v28  ;;  %2359 = vmatpush.msrb.mxu0 %v3628_v32  ;;  %v2027_v32 = vld [vmem:[%s7102_s5 + $0x8] sm:$0xff] }
 0x182   : > { %3508 = vmatmul.msk.f32.gmra.mxu0 %vm1177_vm7, %v5078_v7  ;;  %3545 = vmatmul.msk.f32.gmra.mxu1 %vm1177_vm7, %v5012_v42  ;;  %v1617_v5 = vpop.f32.mrf.mxu2 }
 0x183   : > { %v1699_v58 = vadd.f32 %v1617_v5, %v1481_v26  ;;  %v2046_v26 = vld [vmem:[%s7102_s5 + $0xa0] sm:$0xff] }
 0x184   : > { %2166 = vmatmul.f32.gmra.mxu3 %v5162_v18  ;;  %2586 = vmatpush.msrb.mxu2 %v2046_v26  ;;  %v885_v26 = vpop.permute.xlu1 %884 }
 0x185   : > { %v1739_v46 = vadd.f32 %v4841_v25, %v1699_v58  ;;  %v3615_v58 = vld [vmem:[%s7102_s5 + $0x240] sm:$0xff] }
 0x186   : > { %2243 = vmatpush.msrb.mxu3 %v3615_v58  ;;  %2587 = vmatpush.msrb.mxu2 %v2045_v36  ;;  %v2042_v58 = vld [vmem:[%s7102_s5 + $0x80] sm:$0xff] }
 0x187   : > { %v5171_v34 = vmax.f32 %v1739_v46, 0.0  ;;  %v1349_v55 = vpop.f32.mrf.mxu0  ;;  %v1483_v42 = vpop.f32.mrf.mxu1  ;;  %3585 = vmatmul.msk.f32.gmra.mxu2 %vm1177_vm7, %v5166_v33 }
 0x188   : > { %v1484_v56 = vadd.f32 %v1483_v42, %v1349_v55  ;;  %v3627_v55 = vld [vmem:[%s7102_s5 + $0x2a0] sm:$0xff]  ;;  %2588 = vmatpush.msrb.mxu2 %v2044_v49 }
 0x189   : > { %v1834_v22 = vrot.slane %v5171_v34, 7  ;;  %v2030_v42 = vld [vmem:[%s7102_s5 + $0x20] sm:$0xff]  ;;  %2360 = vmatpush.msrb.mxu0 %v3627_v55  ;;  %v1128_v55 = vsel %vm1090_vm5, %v4278_v24, %v885_v26 }
 0x18a   : > { %3509 = vmatmul.msk.f32.gmra.mxu0 %vm1177_vm7, %v5109_v35  ;;  %3546 = vmatmul.msk.f32.gmra.mxu1 %vm1177_vm7, %v5045_v10  ;;  %v1620_v43 = vpop.f32.mrf.mxu2  ;;  %v5206_v10 = vsel %vm1131_vm6, %v1126_v54, %v1041_v38  ;;  %v1043_v54 = vpop.permute.xlu0 %1042 }
 0x18b   : > { %v5197_v57 = vsel %vm556_vm3, %v1834_v22, %v1816_v0  ;;  %v1700_v41 = vadd.f32 %v1620_v43, %v1484_v56  ;;  %v1127_v56 = vsel %vm1090_vm5, %v4289_v31, %v883_v1  ;;  %v3626_v43 = vld [vmem:[%s7102_s5 + $0x298] sm:$0xff]  ;;  %v5255_v28 = vsel %vm556_vm3, %v1816_v0, %v1834_v22  ;;  %2473 = vmatpush.msrb.mxu1 %v2030_v42  ;;  %v2043_v22 = vld [vmem:[%s7102_s5 + $0x88] sm:$0xff] }
 0x18c   : > { %7184 = vst [vmem:[#allocation13_spill] sm:$0xff] %v5197_v57  ;;  %3644 = vmatmul.msk.f32.gmra.mxu3 %vm597_vm4, %v5197_v57  ;;  %2361 = vmatpush.msrb.mxu0 %v3626_v43  ;;  %v3624_v1 = vld [vmem:[%s7102_s5 + $0x288] sm:$0xff] }
 0x18d   : > { %v1740_v61 = vadd.f32 %v4841_v25, %v1700_v41  ;;  %2474 = vmatpush.msrb.mxu1 %v2029_v40  ;;  %2589 = vmatpush.msrb.mxu2 %v2043_v22 }
 0x18e   : > { %2362 = vmatpush.msrb.mxu0 %v3625_v51 }
 0x18f   : > { %v1352_v14 = vpop.f32.mrf.mxu0  ;;  %v1486_v5 = vpop.f32.mrf.mxu1  ;;  %3586 = vmatmul.msk.f32.gmra.mxu2 %vm1177_vm7, %v5206_v10  ;;  %v5267_v41 = vmax.f32 %v1740_v61, 0.0  ;;  %2475 = vmatpush.msrb.mxu1 %v2028_v12 }
 0x190   : > { %v1487_v46 = vadd.f32 %v1486_v5, %v1352_v14  ;;  %2363 = vmatpush.msrb.mxu0 %v3624_v1  ;;  %2590 = vmatpush.msrb.mxu2 %v2042_v58 }
 0x191   : > { %v1817_v42 = vrot.slane %v5267_v41, 7  ;;  %2476 = vmatpush.msrb.mxu1 %v2027_v32  ;;  %v1047_v32 = vpop.permute.xlu1 %1046 }
 0x192   : > { %3510 = vmatmul.msk.f32.gmra.mxu0 %vm1177_vm7, %v5135_v17  ;;  %3547 = vmatmul.msk.f32.gmra.mxu1 %vm1177_vm7, %v5078_v7  ;;  %v1623_v38 = vpop.f32.mrf.mxu2  ;;  %v5259_v7 = vsel %vm1131_vm6, %v1127_v56, %v1043_v54  ;;  %v1045_v56 = vpop.permute.xlu2 %1044  ;;  %v2026_v54 = vld [vmem:[%s7102_s5] sm:$0xff] }
 0x193   : > { %v1701_v9 = vadd.f32 %v1623_v38, %v1487_v46  ;;  %v3623_v46 = vld [vmem:[%s7102_s5 + $0x280] sm:$0xff]  ;;  %v1169_v43 = vsel %vm1131_vm6, %v1128_v55, %v1045_v56  ;;  %2477 = vmatpush.msrb.mxu1 %v2026_v54 }
 0x194   : > { %2172 = vmatmul.f32.gmra.mxu3 %v5255_v28  ;;  %2364 = vmatpush.msrb.mxu0 %v3623_v46 }
 0x195   : > { %v1741_v0 = vadd.f32 %v4841_v25, %v1701_v9  ;;  %v887_v9 = vpop.permute.xlu0 %886 }
 0x196   : > { %v1129_v1 = vsel %vm1090_vm5, %v4289_v31, %v887_v9 }
 0x197   : > { %v5279_v53 = vmax.f32 %v1741_v0, 0.0  ;;  %v1355_v14 = vpop.f32.mrf.mxu0  ;;  %v1489_v5 = vpop.f32.mrf.mxu1  ;;  %3587 = vmatmul.msk.f32.gmra.mxu2 %vm1177_vm7, %v5259_v7  ;;  %v1445_v0 = vadd.f32 %v4791_v47, %v4789_v21  ;;  %v1442_v21 = vadd.f32 %v4764_v15, %v4762_v60  ;;  %v1170_v31 = vsel %vm1131_vm6, %v1129_v1, %v1047_v32 }
 0x198   : > { %v1490_v36 = vadd.f32 %v1489_v5, %v1355_v14 }
 0x199   : > { %v1835_v61 = vrot.slane %v5279_v53, 7  ;;  %v1687_v47 = vadd.f32 %v4806_v30, %v1445_v0 }
 0x19a   : > { %3511 = vmatmul.msk.f32.gmra.mxu0 %vm1177_vm7, %v5166_v33  ;;  %3548 = vmatmul.msk.f32.gmra.mxu1 %vm1177_vm7, %v5109_v35  ;;  %v1626_v38 = vpop.f32.mrf.mxu2  ;;  %v3614_v35 = vld [vmem:[%s7102_s5 + $0x238] sm:$0xff]  ;;  %v889_v55 = vpop.permute.xlu2 %888 }
 0x19b   : > { %v5302_v49 = vsel %vm556_vm3, %v1835_v61, %v1817_v42  ;;  %v1702_v40 = vadd.f32 %v1626_v38, %v1490_v36  ;;  %2244 = vmatpush.msrb.mxu3 %v3614_v35  ;;  %v5323_v58 = vsel %vm556_vm3, %v1817_v42, %v1835_v61  ;;  %v1727_v60 = vadd.f32 %v4841_v25, %v1687_v47 }
 0x19c   : > { %7185 = vst [vmem:[#allocation14_spill] sm:$0xff] %v5302_v49  ;;  %3645 = vmatmul.msk.f32.gmra.mxu3 %vm597_vm4, %v5302_v49  ;;  %v1130_v30 = vsel %vm1090_vm5, %v4278_v24, %v889_v55  ;;  %v1937_v55 = vrot.slane %v4870_v37, 1 }
 0x19d   : > { %v1742_v26 = vadd.f32 %v4841_v25, %v1702_v40  ;;  %v1049_v40 = vpop.permute.xlu0 %1048 }
 0x19e   : > { %v1171_v24 = vsel %vm1131_vm6, %v1130_v30, %v1049_v40 }
 0x19f   : > { %v1358_v51 = vpop.f32.mrf.mxu0  ;;  %v1492_v12 = vpop.f32.mrf.mxu1  ;;  %3588 = vmatmul.msk.f32.gmra.mxu2 %vm1177_vm7, %v1169_v43  ;;  %v5330_v46 = vmax.f32 %v1742_v26, 0.0 }
 0x1a0   : > { %v1493_v22 = vadd.f32 %v1492_v12, %v1358_v51  ;;  %v1763_v12 = vmax.f32 %v1727_v60, 0.0  ;;  %v1919_v60 = vrot.slane %v4864_v63, 1 }
 0x1a1   : > { %v1818_v54 = vrot.slane %v5330_v46, 7 }
 0x1a2   : > { %3512 = vmatmul.msk.f32.gmra.mxu0 %vm1177_vm7, %v5206_v10  ;;  %3549 = vmatmul.msk.f32.gmra.mxu1 %vm1177_vm7, %v5135_v17  ;;  %v1629_v14 = vpop.f32.mrf.mxu2  ;;  %v1686_v17 = vadd.f32 %v4776_v8, %v1442_v21 }
 0x1a3   : > { %v1703_v5 = vadd.f32 %v1629_v14, %v1493_v22 }
 0x1a4   : > { %2178 = vmatmul.f32.gmra.mxu3 %v5323_v58  ;;  %v1726_v8 = vadd.f32 %v4841_v25, %v1686_v17 }
 0x1a5   : > { %v1743_v36 = vadd.f32 %v4841_v25, %v1703_v5 }
 0x1a6   : > { %v1762_v0 = vmax.f32 %v1726_v8, 0.0 }
 0x1a7   : > { %v5334_v56 = vmax.f32 %v1743_v36, 0.0  ;;  %v1361_v42 = vpop.f32.mrf.mxu0  ;;  %v1495_v61 = vpop.f32.mrf.mxu1  ;;  %3589 = vmatmul.msk.f32.gmra.mxu2 %vm1177_vm7, %v1170_v31 }
 0x1a8   : > { %v1496_v15 = vadd.f32 %v1495_v61, %v1361_v42  ;;  %v5362_v14 = vmul.f32 0.0, %v1762_v0  ;;  %v3612_v0 = vld [vmem:[%s7102_s5 + $0x228] sm:$0xff] }
 0x1a9   : > { %v1836_v38 = vrot.slane %v5334_v56, 7 }
 0x1aa   : > { %3513 = vmatmul.msk.f32.gmra.mxu0 %vm1177_vm7, %v5259_v7  ;;  %3550 = vmatmul.msk.f32.gmra.mxu1 %vm1177_vm7, %v5166_v33  ;;  %v1632_v9 = vpop.f32.mrf.mxu2  ;;  %v3613_v33 = vld [vmem:[%s7102_s5 + $0x230] sm:$0xff]  ;;  %v5359_v7 = vmul.f32 0.0, %v1763_v12  ;;  %7187 = vst [vmem:[#allocation16_spill] sm:$0xff] %v5362_v14 }
 0x1ab   : > { %v5349_v51 = vsel %vm556_vm3, %v1836_v38, %v1818_v54  ;;  %v1704_v35 = vadd.f32 %v1632_v9, %v1496_v15  ;;  %2245 = vmatpush.msrb.mxu3 %v3613_v33  ;;  %v5369_v47 = vsel %vm556_vm3, %v1818_v54, %v1836_v38  ;;  %v5386_v54 = vsel %vm683_vm0, %v1919_v60, %v1937_v55 }
 0x1ac   : > { %3646 = vmatmul.msk.f32.gmra.mxu3 %vm597_vm4, %v5349_v51  ;;  %7186 = vst [vmem:[#allocation15_spill] sm:$0xff] %v5359_v7  ;;  %v1828_v31 = vrot.slane %v5359_v7, 7 }
 0x1ad   : > { %v1744_v32 = vadd.f32 %v4841_v25, %v1704_v35  ;;  %7188 = vst [vmem:[#allocation17_spill] sm:$0xff] %v5386_v54  ;;  %2246 = vmatpush.msrb.mxu3 %v3612_v0 }
 0x1af   : > { %v1364_v22 = vpop.f32.mrf.mxu0  ;;  %v1498_v26 = vpop.f32.mrf.mxu1  ;;  %3590 = vmatmul.msk.f32.gmra.mxu2 %vm1177_vm7, %v1171_v24  ;;  %v5373_v36 = vmax.f32 %v1744_v32, 0.0 }
 0x1b0   : > { %v1499_v1 = vadd.f32 %v1498_v26, %v1364_v22 }
 0x1b1   : > { %v1819_v38 = vrot.slane %v5373_v36, 7 }
 0x1b2   : > { %3514 = vmatmul.msk.f32.gmra.mxu0 %vm1177_vm7, %v1169_v43  ;;  %3551 = vmatmul.msk.f32.gmra.mxu1 %vm1177_vm7, %v5206_v10  ;;  %v1635_v5 = vpop.f32.mrf.mxu2  ;;  %v1810_v43 = vrot.slane %v5362_v14, 7 }
 0x1b3   : > { %v1705_v21 = vadd.f32 %v1635_v5, %v1499_v1  ;;  %v5409_v1 = vsel %vm683_vm0, %v1937_v55, %v1919_v60 }
 0x1b4   : > { %2184 = vmatmul.f32.gmra.mxu3 %v5369_v47  ;;  %v1864_v15 = vsel %vm556_vm3, %v1828_v31, %v1810_v43  ;;  %7190 = vst [vmem:[#allocation19_spill] sm:$0xff] %v5409_v1  ;;  %v1846_v32 = vsel %vm556_vm3, %v1810_v43, %v1828_v31 }
 0x1b5   : > { %v1745_v17 = vadd.f32 %v4841_v25, %v1705_v21 }
 0x1b7   : > { %v5378_v42 = vmax.f32 %v1745_v17, 0.0  ;;  %v1367_v10 = vpop.f32.mrf.mxu0  ;;  %v1501_v61 = vpop.f32.mrf.mxu1  ;;  %2591 = vmatmul.f32.vlgmr.msrb.gmra.mxu2 %v5362_v14  ;;  %v3609_v14 = vld [vmem:[%s7102_s5 + $0x210] sm:$0xff] }
 0x1b8   : > { %v1502_v30 = vadd.f32 %v1501_v61, %v1367_v10  ;;  %v1938_v61 = vrot.slane %v4930_v13, 1 }
 0x1b9   : > { %v1837_v40 = vrot.slane %v5378_v42, 7 }
 0x1ba   : > { %v1638_v8 = vpop.f32.mrf.mxu2  ;;  %2365 = vmatmul.f32.vlgmr.msrb.gmra.mxu0 %v5386_v54  ;;  %3671 = vmatmul.msk.f32.vlgmr.msrb.gmra.mxu1 %vm597_vm4, %v1864_v15  ;;  %v1920_v15 = vrot.slane %v4925_v48, 1 }
 0x1bb   : > { %v5395_v9 = vsel %vm556_vm3, %v1837_v40, %v1819_v38  ;;  %v1706_v12 = vadd.f32 %v1638_v8, %v1502_v30  ;;  %v5418_v17 = vsel %vm556_vm3, %v1819_v38, %v1837_v40 }
 0x1bc   : > { %3647 = vmatmul.msk.f32.gmra.mxu3 %vm597_vm4, %v5395_v9  ;;  %v5433_v40 = vsel %vm683_vm0, %v1920_v15, %v1938_v61 }
 0x1bd   : > { %v1746_v33 = vadd.f32 %v4841_v25, %v1706_v12  ;;  %7192 = vst [vmem:[#allocation21_spill] sm:$0xff] %v5433_v40 }
 0x1bf   : > { %v1370_v24 = vpop.f32.mrf.mxu0  ;;  %v1504_v35 = vpop.f32.mrf.mxu1  ;;  %2594 = vmatmul.f32.gmra.mxu2 %v5359_v7  ;;  %v5421_v10 = vmax.f32 %v1746_v33, 0.0 }
 0x1c0   : > { %v1505_v22 = vadd.f32 %v1504_v35, %v1370_v24  ;;  %v5404_v26 = vpop.f32.mrf.mxu3 }
 0x1c1   : > { %7189 = vst [vmem:[#allocation18_spill] sm:$0xff] %v5404_v26  ;;  %v1820_v8 = vrot.slane %v5421_v10, 7 }
 0x1c2   : > { %v1641_v5 = vpop.f32.mrf.mxu2  ;;  %3655 = vmatmul.msk.f32.gmra.mxu0 %vm725_vm1, %v5409_v1  ;;  %2481 = vmatmul.f32.gmra.mxu1 %v1846_v32  ;;  %v3611_v32 = vld [vmem:[%s7102_s5 + $0x220] sm:$0xff] }
 0x1c3   : > { %v1707_v21 = vadd.f32 %v1641_v5, %v1505_v22  ;;  %2247 = vmatpush.msrb.mxu3 %v3611_v32 }
 0x1c4   : > { %2190 = vmatmul.f32.gmra.mxu3 %v5418_v17 }
 0x1c5   : > { %v1747_v55 = vadd.f32 %v4841_v25, %v1707_v21 }
 0x1c7   : > { %v5425_v31 = vmax.f32 %v1747_v55, 0.0  ;;  %v1373_v43 = vpop.f32.mrf.mxu0  ;;  %v1507_v60 = vpop.f32.mrf.mxu1  ;;  %2597 = vmatmul.f32.gmra.mxu2 %v4864_v63  ;;  %v5457_v55 = vsel %vm683_vm0, %v1938_v61, %v1920_v15  ;;  %v1939_v61 = vrot.slane %v4985_v6, 1 }
 0x1c8   : > { %v5429_v30 = vpop.f32.mrf.mxu3  ;;  %v1508_v38 = vadd.f32 %v1507_v60, %v1373_v43  ;;  %7194 = vst [vmem:[#allocation23_spill] sm:$0xff] %v5457_v55 }
 0x1c9   : > { %7191 = vst [vmem:[#allocation20_spill] sm:$0xff] %v5429_v30  ;;  %v1838_v12 = vrot.slane %v5425_v31, 7 }
 0x1ca   : > { %v1644_v24 = vpop.f32.mrf.mxu2  ;;  %2371 = vmatmul.f32.gmra.mxu0 %v5433_v40  ;;  %3672 = vmatmul.msk.f32.gmra.mxu1 %vm597_vm4, %v4890_v29 }
 0x1cb   : > { %v5443_v35 = vsel %vm556_vm3, %v1838_v12, %v1820_v8  ;;  %v1708_v0 = vadd.f32 %v1644_v24, %v1508_v38  ;;  %v5465_v38 = vsel %vm556_vm3, %v1820_v8, %v1838_v12 }
 0x1cc   : > { %3648 = vmatmul.msk.f32.gmra.mxu3 %vm597_vm4, %v5443_v35 }
 0x1cd   : > { %v1748_v29 = vadd.f32 %v4841_v25, %v1708_v0 }
 0x1cf   : > { %v1376_v22 = vpop.f32.mrf.mxu0  ;;  %v1510_v33 = vpop.f32.mrf.mxu1  ;;  %2600 = vmatmul.f32.gmra.mxu2 %v4870_v37  ;;  %v5468_v24 = vmax.f32 %v1748_v29, 0.0 }
 0x1d0   : > { %v1511_v5 = vadd.f32 %v1510_v33, %v1376_v22  ;;  %v5452_v21 = vpop.f32.mrf.mxu3 }
 0x1d1   : > { %7193 = vst [vmem:[#allocation22_spill] sm:$0xff] %v5452_v21 }
 0x1d2   : > { %v1647_v43 = vpop.f32.mrf.mxu2  ;;  %3656 = vmatmul.msk.f32.gmra.mxu0 %vm725_vm1, %v5457_v55  ;;  %2487 = vmatmul.f32.gmra.mxu1 %v4919_v2  ;;  %v1921_v2 = vrot.slane %v4982_v44, 1 }
 0x1d3   : > { %v1709_v60 = vadd.f32 %v1647_v43, %v1511_v5  ;;  %v1821_v5 = vrot.slane %v5468_v24, 7 }
 0x1d4   : > { %2196 = vmatmul.f32.gmra.mxu3 %v5465_v38  ;;  %v5480_v12 = vsel %vm683_vm0, %v1921_v2, %v1939_v61  ;;  %v5504_v1 = vsel %vm683_vm0, %v1939_v61, %v1921_v2  ;;  %v1940_v2 = vrot.slane %v5053_v59, 1 }
 0x1d5   : > { %v1749_v0 = vadd.f32 %v4841_v25, %v1709_v60  ;;  %7196 = vst [vmem:[#allocation25_spill] sm:$0xff] %v5480_v12 }
 0x1d6   : > { %7198 = vst [vmem:[#allocation27_spill] sm:$0xff] %v5504_v1 }
 0x1d7   : > { %v5472_v15 = vmax.f32 %v1749_v0, 0.0  ;;  %v1379_v22 = vpop.f32.mrf.mxu0  ;;  %v1513_v33 = vpop.f32.mrf.mxu1  ;;  %2603 = vmatmul.f32.gmra.mxu2 %v4925_v48 }
 0x1d8   : > { %v5476_v32 = vpop.f32.mrf.mxu3  ;;  %v1514_v8 = vadd.f32 %v1513_v33, %v1379_v22 }
 0x1d9   : > { %7195 = vst [vmem:[#allocation24_spill] sm:$0xff] %v5476_v32  ;;  %v1839_v29 = vrot.slane %v5472_v15, 7  ;;  %v3610_v32 = vld [vmem:[%s7102_s5 + $0x218] sm:$0xff] }
 0x1da   : > { %v1650_v43 = vpop.f32.mrf.mxu2  ;;  %2377 = vmatmul.f32.gmra.mxu0 %v5480_v12  ;;  %3673 = vmatmul.msk.f32.gmra.mxu1 %vm597_vm4, %v4952_v27  ;;  %v3607_v27 = vld [vmem:[%s7102_s5 + $0x200] sm:$0xff] }
 0x1db   : > { %v5490_v60 = vsel %vm556_vm3, %v1839_v29, %v1821_v5  ;;  %v1710_v0 = vadd.f32 %v1650_v43, %v1514_v8  ;;  %2248 = vmatpush.msrb.mxu3 %v3610_v32  ;;  %v5512_v43 = vsel %vm556_vm3, %v1821_v5, %v1839_v29  ;;  %v1922_v5 = vrot.slane %v5047_v39, 1 }
 0x1dc   : > { %3649 = vmatmul.msk.f32.gmra.mxu3 %vm597_vm4, %v5490_v60 }
 0x1dd   : > { %v1750_v26 = vadd.f32 %v4841_v25, %v1710_v0  ;;  %v5520_v25 = vld [vmem:[%s7101_s4] ss:$0 sm:$0xff]  ;;  %2249 = vmatpush.msrb.mxu3 %v3609_v14 }
 0x1df   : > { %v1382_v22 = vpop.f32.mrf.mxu0  ;;  %v1516_v33 = vpop.f32.mrf.mxu1  ;;  %2606 = vmatmul.f32.gmra.mxu2 %v4930_v13  ;;  %v5515_v32 = vmax.f32 %v1750_v26, 0.0 }
 0x1e0   : > { %v1517_v21 = vadd.f32 %v1516_v33, %v1382_v22  ;;  %v5499_v30 = vpop.f32.mrf.mxu3  ;;  %v5532_v22 = vsel %vm683_vm0, %v1922_v5, %v1940_v2 }
 0x1e1   : > { %7197 = vst [vmem:[#allocation26_spill] sm:$0xff] %v5499_v30  ;;  %v1822_v33 = vrot.slane %v5515_v32, 7 }
 0x1e2   : > { %v1653_v54 = vpop.f32.mrf.mxu2  ;;  %3657 = vmatmul.msk.f32.gmra.mxu0 %vm725_vm1, %v5504_v1  ;;  %2493 = vmatmul.f32.gmra.mxu1 %v4976_v23  ;;  %7200 = vst [vmem:[#allocation29_spill] sm:$0xff] %v5532_v22 }
 0x1e3   : > { %v1711_v8 = vadd.f32 %v1653_v54, %v1517_v21 }
 0x1e4   : > { %2202 = vmatmul.f32.gmra.mxu3 %v5512_v43 }
 0x1e5   : > { %v1751_v61 = vadd.f32 %v5520_v25, %v1711_v8 }
 0x1e7   : > { %v5524_v0 = vmax.f32 %v1751_v61, 0.0  ;;  %v1385_v54 = vpop.f32.mrf.mxu0  ;;  %v1519_v21 = vpop.f32.mrf.mxu1  ;;  %2609 = vmatmul.f32.gmra.mxu2 %v4982_v44 }
 0x1e8   : > { %v5528_v29 = vpop.f32.mrf.mxu3  ;;  %v1520_v26 = vadd.f32 %v1519_v21, %v1385_v54 }
 0x1e9   : > { %7199 = vst [vmem:[#allocation28_spill] sm:$0xff] %v5528_v29  ;;  %v1840_v8 = vrot.slane %v5524_v0, 7 }
 0x1ea   : > { %v1656_v30 = vpop.f32.mrf.mxu2  ;;  %2383 = vmatmul.f32.gmra.mxu0 %v5532_v22  ;;  %3674 = vmatmul.msk.f32.gmra.mxu1 %vm597_vm4, %v5004_v19  ;;  %v5556_v19 = vsel %vm683_vm0, %v1940_v2, %v1922_v5  ;;  %v1941_v2 = vrot.slane %v5116_v45, 1 }
 0x1eb   : > { %v5542_v61 = vsel %vm556_vm3, %v1840_v8, %v1822_v33  ;;  %v1712_v54 = vadd.f32 %v1656_v30, %v1520_v26  ;;  %7202 = vst [vmem:[#allocation31_spill] sm:$0xff] %v5556_v19 }
 0x1ec   : > { %3650 = vmatmul.msk.f32.gmra.mxu3 %vm597_vm4, %v5542_v61 }
 0x1ed   : > { %v1752_v1 = vadd.f32 %v5520_v25, %v1712_v54 }
 0x1ef   : > { %v1388_v21 = vpop.f32.mrf.mxu0  ;;  %v1522_v29 = vpop.f32.mrf.mxu1  ;;  %2612 = vmatmul.f32.gmra.mxu2 %v4985_v6  ;;  %v5567_v14 = vmax.f32 %v1752_v1, 0.0 }
 0x1f0   : > { %v1523_v7 = vadd.f32 %v1522_v29, %v1388_v21  ;;  %v5551_v22 = vpop.f32.mrf.mxu3  ;;  %v5564_v29 = vsel %vm556_vm3, %v1822_v33, %v1840_v8 }
 0x1f1   : > { %7201 = vst [vmem:[#allocation30_spill] sm:$0xff] %v5551_v22  ;;  %v1823_v1 = vrot.slane %v5567_v14, 7 }
 0x1f2   : > { %v1659_v12 = vpop.f32.mrf.mxu2  ;;  %3658 = vmatmul.msk.f32.gmra.mxu0 %vm725_vm1, %v5556_v19  ;;  %2499 = vmatmul.f32.gmra.mxu1 %v5037_v62  ;;  %7203 = vst [vmem:[#allocation32_spill] sm:$0xff] %v5564_v29 }
 0x1f3   : > { %v1713_v30 = vadd.f32 %v1659_v12, %v1523_v7  ;;  %v1923_v7 = vrot.slane %v5111_v11, 1 }
 0x1f4   : > { %2208 = vmatmul.f32.gmra.mxu3 %v5564_v29 }
 0x1f5   : > { %v1753_v26 = vadd.f32 %v5520_v25, %v1713_v30  ;;  %v5579_v8 = vsel %vm683_vm0, %v1923_v7, %v1941_v2  ;;  %v5603_v23 = vsel %vm683_vm0, %v1941_v2, %v1923_v7  ;;  %v1942_v2 = vrot.slane %v5171_v34, 1 }
 0x1f6   : > { %7205 = vst [vmem:[#allocation34_spill] sm:$0xff] %v5579_v8 }
 0x1f7   : > { %v5571_v5 = vmax.f32 %v1753_v26, 0.0  ;;  %v1391_v54 = vpop.f32.mrf.mxu0  ;;  %v1525_v21 = vpop.f32.mrf.mxu1  ;;  %2615 = vmatmul.f32.gmra.mxu2 %v5047_v39  ;;  %7208 = vst [vmem:[#allocation37_spill] sm:$0xff] %v5603_v23 }
 0x1f8   : > { %v5575_v12 = vpop.f32.mrf.mxu3  ;;  %v1526_v33 = vadd.f32 %v1525_v21, %v1391_v54 }
 0x1f9   : > { %7204 = vst [vmem:[#allocation33_spill] sm:$0xff] %v5575_v12  ;;  %v1841_v30 = vrot.slane %v5571_v5, 7 }
 0x1fa   : > { %v1662_v22 = vpop.f32.mrf.mxu2  ;;  %2389 = vmatmul.f32.gmra.mxu0 %v5579_v8  ;;  %3675 = vmatmul.msk.f32.gmra.mxu1 %vm597_vm4, %v5070_v16  ;;  %v3608_v8 = vld [vmem:[%s7102_s5 + $0x208] sm:$0xff] }
 0x1fb   : > { %v5589_v26 = vsel %vm556_vm3, %v1841_v30, %v1823_v1  ;;  %v1714_v54 = vadd.f32 %v1662_v22, %v1526_v33  ;;  %2250 = vmatpush.msrb.mxu3 %v3608_v8 }
 0x1fc   : > { %7206 = vst [vmem:[#allocation35_spill] sm:$0xff] %v5589_v26  ;;  %3651 = vmatmul.msk.f32.gmra.mxu3 %vm597_vm4, %v5589_v26 }
 0x1fd   : > { %v1754_v16 = vadd.f32 %v5520_v25, %v1714_v54  ;;  %2251 = vmatpush.msrb.mxu3 %v3607_v27 }
 0x1ff   : > { %v1394_v21 = vpop.f32.mrf.mxu0  ;;  %v1528_v12 = vpop.f32.mrf.mxu1  ;;  %2618 = vmatmul.f32.gmra.mxu2 %v5053_v59  ;;  %v5614_v33 = vmax.f32 %v1754_v16, 0.0 }
 0x200   : > { %v1529_v19 = vadd.f32 %v1528_v12, %v1394_v21  ;;  %v5598_v62 = vpop.f32.mrf.mxu3  ;;  %v5611_v12 = vsel %vm556_vm3, %v1823_v1, %v1841_v30 }
 0x201   : > { %7207 = vst [vmem:[#allocation36_spill] sm:$0xff] %v5598_v62  ;;  %v1824_v16 = vrot.slane %v5614_v33, 7 }
 0x202   : > { %v1665_v55 = vpop.f32.mrf.mxu2  ;;  %3659 = vmatmul.msk.f32.gmra.mxu0 %vm725_vm1, %v5603_v23  ;;  %2505 = vmatmul.f32.gmra.mxu1 %v5105_v50 }
 0x203   : > { %v1715_v22 = vadd.f32 %v1665_v55, %v1529_v19  ;;  %v1924_v19 = vrot.slane %v5168_v20, 1 }
 0x204   : > { %2214 = vmatmul.f32.gmra.mxu3 %v5611_v12 }
 0x205   : > { %v1755_v8 = vadd.f32 %v5520_v25, %v1715_v22  ;;  %v5626_v30 = vsel %vm683_vm0, %v1924_v19, %v1942_v2 }
 0x206   : > { %7210 = vst [vmem:[#allocation39_spill] sm:$0xff] %v5626_v30 }
 0x207   : > { %v5618_v7 = vmax.f32 %v1755_v8, 0.0  ;;  %v1397_v54 = vpop.f32.mrf.mxu0  ;;  %v1531_v21 = vpop.f32.mrf.mxu1  ;;  %2621 = vmatmul.f32.gmra.mxu2 %v5111_v11 }
 0x208   : > { %v5622_v55 = vpop.f32.mrf.mxu3  ;;  %v1532_v1 = vadd.f32 %v1531_v21, %v1397_v54 }
 0x209   : > { %7209 = vst [vmem:[#allocation38_spill] sm:$0xff] %v5622_v55  ;;  %v1842_v22 = vrot.slane %v5618_v7, 7 }
 0x20a   : > { %v1668_v62 = vpop.f32.mrf.mxu2  ;;  %2395 = vmatmul.f32.gmra.mxu0 %v5626_v30  ;;  %3676 = vmatmul.msk.f32.gmra.mxu1 %vm597_vm4, %v5129_v52  ;;  %v5647_v52 = vsel %vm683_vm0, %v1942_v2, %v1924_v19 }
 0x20b   : > { %v5636_v8 = vsel %vm556_vm3, %v1842_v22, %v1824_v16  ;;  %v1716_v54 = vadd.f32 %v1668_v62, %v1532_v1  ;;  %7213 = vst [vmem:[#allocation42_spill] sm:$0xff] %v5647_v52  ;;  %v1943_v1 = vrot.slane %v5279_v53, 1 }
 0x20c   : > { %7211 = vst [vmem:[#allocation40_spill] sm:$0xff] %v5636_v8  ;;  %3652 = vmatmul.msk.f32.gmra.mxu3 %vm597_vm4, %v5636_v8 }
 0x20d   : > { %v1756_v30 = vadd.f32 %v5520_v25, %v1716_v54 }
 0x20f   : > { %v1400_v21 = vpop.f32.mrf.mxu0  ;;  %v1534_v55 = vpop.f32.mrf.mxu1  ;;  %2624 = vmatmul.f32.gmra.mxu2 %v5116_v45  ;;  %v5661_v2 = vmax.f32 %v1756_v30, 0.0 }
 0x210   : > { %v1535_v23 = vadd.f32 %v1534_v55, %v1400_v21  ;;  %v5642_v50 = vpop.f32.mrf.mxu3  ;;  %v5658_v55 = vsel %vm556_vm3, %v1824_v16, %v1842_v22 }
 0x211   : > { %7212 = vst [vmem:[#allocation41_spill] sm:$0xff] %v5642_v50  ;;  %v1825_v30 = vrot.slane %v5661_v2, 7 }
 0x212   : > { %v1671_v40 = vpop.f32.mrf.mxu2  ;;  %3660 = vmatmul.msk.f32.gmra.mxu0 %vm725_vm1, %v5647_v52  ;;  %2511 = vmatmul.f32.gmra.mxu1 %v5162_v18  ;;  %7214 = vst [vmem:[#allocation43_spill] sm:$0xff] %v5658_v55 }
 0x213   : > { %v1717_v62 = vadd.f32 %v1671_v40, %v1535_v23  ;;  %v1925_v23 = vrot.slane %v5267_v41, 1 }
 0x214   : > { %2220 = vmatmul.f32.gmra.mxu3 %v5658_v55  ;;  %v3734_v55 = vld [vmem:[%s7102_s5 + $0x3f8] sm:$0xff] }
 0x215   : > { %v1757_v19 = vadd.f32 %v5520_v25, %v1717_v62  ;;  %v5673_v27 = vsel %vm683_vm0, %v1925_v23, %v1943_v1  ;;  %2963 = vmatpush.msra.mxu1 %v3734_v55  ;;  %v1944_v55 = vrot.slane %v5334_v56, 1 }
 0x216   : > { %7216 = vst [vmem:[#allocation45_spill] sm:$0xff] %v5673_v27 }
 0x217   : > { %v5665_v54 = vmax.f32 %v1757_v19, 0.0  ;;  %v1403_v21 = vpop.f32.mrf.mxu0  ;;  %v1537_v50 = vpop.f32.mrf.mxu1  ;;  %2627 = vmatmul.f32.gmra.mxu2 %v5168_v20 }
 0x218   : > { %v5669_v40 = vpop.f32.mrf.mxu3  ;;  %v1538_v16 = vadd.f32 %v1537_v50, %v1403_v21  ;;  %v2073_v50 = vld [vmem:[%s7102_s5 + $0x178] sm:$0xff] }
 0x219   : > { %7215 = vst [vmem:[#allocation44_spill] sm:$0xff] %v5669_v40  ;;  %v1843_v22 = vrot.slane %v5665_v54, 7  ;;  %v3750_v21 = vld [vmem:[%s7102_s5 + $0x478] sm:$0xff]  ;;  %2688 = vmatpush.msra.mxu3 %v2073_v50 }
 0x21a   : > { %v1674_v62 = vpop.f32.mrf.mxu2  ;;  %2401 = vmatmul.f32.gmra.mxu0 %v5673_v27  ;;  %3677 = vmatmul.msk.f32.gmra.mxu1 %vm597_vm4, %v5197_v57 }
 0x21b   : > { %v5683_v19 = vsel %vm556_vm3, %v1843_v22, %v1825_v30  ;;  %v1718_v40 = vadd.f32 %v1674_v62, %v1538_v16  ;;  %3076 = vmatpush.msra.mxu2 %v3750_v21  ;;  %v5706_v16 = vsel %vm683_vm0, %v1943_v1, %v1925_v23 }
 0x21c   : > { %7217 = vst [vmem:[#allocation46_spill] sm:$0xff] %v5683_v19  ;;  %3653 = vmatmul.msk.f32.gmra.mxu3 %vm597_vm4, %v5683_v19  ;;  %v3718_v19 = vld [vmem:[%s7102_s5 + $0x378] sm:$0xff] }
 0x21d   : > { %v1758_v8 = vadd.f32 %v5520_v25, %v1718_v40  ;;  %7219 = vst [vmem:[#allocation48_spill] sm:$0xff] %v5706_v16  ;;  %2850 = vmatpush.msra.mxu0 %v3718_v19 }
 0x21f   : > { %v1406_v27 = vpop.f32.mrf.mxu0  ;;  %v1540_v52 = vpop.f32.mrf.mxu1  ;;  %2630 = vmatmul.f32.gmra.mxu2 %v5171_v34  ;;  %v5717_v40 = vmax.f32 %v1758_v8, 0.0 }
 0x220   : > { %v1541_v57 = vadd.f32 %v1540_v52, %v1406_v27  ;;  %v5695_v18 = vpop.f32.mrf.mxu3  ;;  %v5714_v27 = vsel %vm556_vm3, %v1825_v30, %v1843_v22 }
 0x221   : > { %7218 = vst [vmem:[#allocation47_spill] sm:$0xff] %v5695_v18  ;;  %v1826_v8 = vrot.slane %v5717_v40, 7 }
 0x222   : > { %v1677_v62 = vpop.f32.mrf.mxu2  ;;  %3661 = vmatmul.msk.f32.gmra.mxu0 %vm725_vm1, %v5706_v16  ;;  %2517 = vmatmul.f32.gmra.mxu1 %v5255_v28  ;;  %7220 = vst [vmem:[#allocation49_spill] sm:$0xff] %v5714_v27 }
 0x223   : > { %v1719_v52 = vadd.f32 %v1677_v62, %v1541_v57  ;;  %v1926_v57 = vrot.slane %v5330_v46, 1 }
 0x224   : > { %2226 = vmatmul.f32.gmra.mxu3 %v5714_v27 }
 0x225   : > { %v1759_v1 = vadd.f32 %v5520_v25, %v1719_v52  ;;  %v5729_v30 = vsel %vm683_vm0, %v1926_v57, %v1944_v55 }
 0x226   : > { %7222 = vst [vmem:[#allocation51_spill] sm:$0xff] %v5729_v30 }
 0x227   : > { %v5721_v23 = vmax.f32 %v1759_v1, 0.0  ;;  %v1409_v19 = vpop.f32.mrf.mxu0  ;;  %v1543_v50 = vpop.f32.mrf.mxu1  ;;  %2633 = vmatmul.f32.gmra.mxu2 %v5267_v41 }
 0x228   : > { %v1544_v21 = vadd.f32 %v1543_v50, %v1409_v19  ;;  %v5725_v62 = vpop.f32.mrf.mxu3  ;;  %v2072_v50 = vld [vmem:[%s7102_s5 + $0x170] sm:$0xff] }
 0x229   : > { %7221 = vst [vmem:[#allocation50_spill] sm:$0xff] %v5725_v62  ;;  %v1844_v22 = vrot.slane %v5721_v23, 7  ;;  %v3749_v62 = vld [vmem:[%s7102_s5 + $0x470] sm:$0xff]  ;;  %2689 = vmatpush.msra.mxu3 %v2072_v50 }
 0x22a   : > { %v1680_v52 = vpop.f32.mrf.mxu2  ;;  %2407 = vmatmul.f32.gmra.mxu0 %v5729_v30  ;;  %3678 = vmatmul.msk.f32.gmra.mxu1 %vm597_vm4, %v5302_v49  ;;  %v3733_v49 = vld [vmem:[%s7102_s5 + $0x3f0] sm:$0xff] }
 0x22b   : > { %v1720_v1 = vadd.f32 %v1680_v52, %v1544_v21  ;;  %v5739_v19 = vsel %vm556_vm3, %v1844_v22, %v1826_v8  ;;  %3077 = vmatpush.msra.mxu2 %v3749_v62  ;;  %v5762_v62 = vsel %vm683_vm0, %v1944_v55, %v1926_v57  ;;  %2964 = vmatpush.msra.mxu1 %v3733_v49  ;;  %v1945_v57 = vrot.slane %v5378_v42, 1 }
 0x22c   : > { %7223 = vst [vmem:[#allocation52_spill] sm:$0xff] %v5739_v19  ;;  %3654 = vmatmul.msk.f32.gmra.mxu3 %vm597_vm4, %v5739_v19  ;;  %v3717_v19 = vld [vmem:[%s7102_s5 + $0x370] sm:$0xff] }
 0x22d   : > { %v1760_v21 = vadd.f32 %v5520_v25, %v1720_v1  ;;  %7225 = vst [vmem:[#allocation54_spill] sm:$0xff] %v5762_v62  ;;  %2851 = vmatpush.msra.mxu0 %v3717_v19 }
 0x22f   : > { %v1412_v52 = vpop.f32.mrf.mxu0  ;;  %v1546_v18 = vpop.f32.mrf.mxu1  ;;  %2636 = vmatmul.f32.gmra.mxu2 %v5279_v53 }
 0x230   : > { %v1547_v30 = vadd.f32 %v1546_v18, %v1412_v52  ;;  %v5752_v16 = vpop.f32.mrf.mxu3  ;;  %v1796_v18 = vmax.f32 %v1760_v21, 0.0  ;;  %v5770_v52 = vsel %vm556_vm3, %v1826_v8, %v1844_v22 }
 0x231   : > { %7224 = vst [vmem:[#allocation53_spill] sm:$0xff] %v5752_v16 }
 0x232   : > { %v1683_v1 = vpop.f32.mrf.mxu2  ;;  %3662 = vmatmul.msk.f32.gmra.mxu0 %vm725_vm1, %v5762_v62  ;;  %2523 = vmatmul.f32.gmra.mxu1 %v5323_v58  ;;  %7226 = vst [vmem:[#allocation55_spill] sm:$0xff] %v5770_v52  ;;  %v5775_v49 = vmul.f32 0.0, %v1796_v18 }
 0x233   : > { %v1721_v50 = vadd.f32 %v1683_v1, %v1547_v30  ;;  %v1927_v30 = vrot.slane %v5373_v36, 1 }
 0x234   : > { %2232 = vmatmul.f32.gmra.mxu3 %v5770_v52  ;;  %7227 = vst [vmem:[#allocation56_spill] sm:$0xff] %v5775_v49  ;;  %v1935_v1 = vrot.slane %v5775_v49, 1 }
 0x235   : > { %v1761_v55 = vadd.f32 %v5520_v25, %v1721_v50  ;;  %v5789_v25 = vsel %vm683_vm0, %v1927_v30, %v1945_v57  ;;  %v1827_v50 = vrot.slane %v5775_v49, 7  ;;  %v3716_v49 = vld [vmem:[%s7102_s5 + $0x368] sm:$0xff] }
 0x236   : > { %2852 = vmatpush.msra.mxu0 %v3716_v49 }
 0x237   : > { %v1797_v19 = vmax.f32 %v1761_v55, 0.0  ;;  %v5777_v16 = vpop.f32.mrf.mxu0  ;;  %v5779_v62 = vpop.f32.mrf.mxu1  ;;  %2639 = vmatmul.f32.gmra.mxu2 %v5330_v46 }
 0x238   : > { %7228 = vst [vmem:[#allocation57_spill] sm:$0xff] %v5777_v16  ;;  %v5783_v21 = vpop.f32.mrf.mxu3 }
 0x239   : > { %7229 = vst [vmem:[#allocation58_spill] sm:$0xff] %v5779_v62  ;;  %v5785_v8 = vmul.f32 0.0, %v1797_v19  ;;  %v2071_v19 = vld [vmem:[%s7102_s5 + $0x168] sm:$0xff] }
 0x23a   : > { %7230 = vst [vmem:[#allocation59_spill] sm:$0xff] %v5783_v21  ;;  %2413 = vmatmul.f32.gmra.mxu0 %v5789_v25  ;;  %3679 = vmatmul.msk.f32.gmra.mxu1 %vm597_vm4, %v5349_v51  ;;  %v5795_v22 = vpop.f32.mrf.mxu2  ;;  %v3748_v21 = vld [vmem:[%s7102_s5 + $0x468] sm:$0xff] }
 0x23b   : > { %7231 = vst [vmem:[#allocation60_spill] sm:$0xff] %v5785_v8  ;;  %v1953_v18 = vrot.slane %v5785_v8, 1  ;;  %v1845_v55 = vrot.slane %v5785_v8, 7  ;;  %2690 = vmatpush.msra.mxu3 %v2071_v19  ;;  %3078 = vmatpush.msra.mxu2 %v3748_v21 }
 0x23c   : > { %7232 = vst [vmem:[#allocation61_spill] sm:$0xff] %v5795_v22  ;;  %2252 = vmatmul.f32.vlgmr.msrb.gmra.mxu3 %v4864_v63 }
 0x23d   : > { %v5810_v22 = vsel %vm683_vm0, %v1935_v1, %v1953_v18  ;;  %v5814_v62 = vsel %vm556_vm3, %v1845_v55, %v1827_v50  ;;  %v5818_v63 = vsel %vm683_vm0, %v1953_v18, %v1935_v1  ;;  %v5822_v16 = vsel %vm556_vm3, %v1827_v50, %v1845_v55  ;;  %v3732_v1 = vld [vmem:[%s7102_s5 + $0x3e8] sm:$0xff] }
 0x23e   : > { %7233 = vst [vmem:[#allocation62_spill] sm:$0xff] %v5810_v22  ;;  %v5839_v18 = vsel %vm683_vm0, %v1945_v57, %v1927_v30  ;;  %2965 = vmatpush.msra.mxu1 %v3732_v1  ;;  %v1946_v55 = vrot.slane %v5425_v31, 1  ;;  %v1928_v57 = vrot.slane %v5421_v10, 1  ;;  %v2070_v1 = vld [vmem:[%s7102_s5 + $0x160] sm:$0xff] }
 0x23f   : > { %7234 = vst [vmem:[#allocation63_spill] sm:$0xff] %v5814_v62  ;;  %v5824_v8 = vpop.f32.mrf.mxu0  ;;  %v5826_v19 = vpop.f32.mrf.mxu1  ;;  %2642 = vmatmul.f32.gmra.mxu2 %v5334_v56  ;;  %2691 = vmatpush.msra.mxu3 %v2070_v1 }
 0x240   : > { %7235 = vst [vmem:[#allocation64_spill] sm:$0xff] %v5818_v63  ;;  %v5829_v21 = vpop.f32.mrf.mxu3  ;;  %v5859_v30 = vsel %vm683_vm0, %v1928_v57, %v1946_v55  ;;  %v5889_v1 = vsel %vm683_vm0, %v1946_v55, %v1928_v57  ;;  %v3730_v63 = vld [vmem:[%s7102_s5 + $0x3d8] sm:$0xff] }
 0x241   : > { %7236 = vst [vmem:[#allocation65_spill] sm:$0xff] %v5822_v16 }
 0x242   : > { %7237 = vst [vmem:[#allocation66_spill] sm:$0xff] %v5824_v8  ;;  %3663 = vmatmul.msk.f32.gmra.mxu0 %vm725_vm1, %v5839_v18  ;;  %2529 = vmatmul.f32.gmra.mxu1 %v5369_v47  ;;  %v5845_v50 = vpop.f32.mrf.mxu2  ;;  %v3731_v8 = vld [vmem:[%s7102_s5 + $0x3e0] sm:$0xff]  ;;  %v7426_v3 = vld [vmem:[#allocation60_spill] sm:$0xff] }
 0x243   : > { %7238 = vst [vmem:[#allocation67_spill] sm:$0xff] %v5826_v19  ;;  %2966 = vmatpush.msra.mxu1 %v3731_v8  ;;  %v1929_v8 = vrot.slane %v5468_v24, 1 }
 0x244   : > { %7239 = vst [vmem:[#allocation68_spill] sm:$0xff] %v5829_v21  ;;  %2255 = vmatmul.f32.gmra.mxu3 %v4870_v37 }
 0x245   : > { %7240 = vst [vmem:[#allocation69_spill] sm:$0xff] %v5845_v50  ;;  %2967 = vmatpush.msra.mxu1 %v3730_v63 }
 0x247   : > { %v5849_v21 = vpop.f32.mrf.mxu0  ;;  %v5851_v19 = vpop.f32.mrf.mxu1  ;;  %2645 = vmatmul.f32.gmra.mxu2 %v5373_v36 }
 0x248   : > { %7241 = vst [vmem:[#allocation70_spill] sm:$0xff] %v5849_v21  ;;  %v5855_v49 = vpop.f32.mrf.mxu3 }
 0x249   : > { %7242 = vst [vmem:[#allocation71_spill] sm:$0xff] %v5851_v19 }
 0x24a   : > { %7243 = vst [vmem:[#allocation72_spill] sm:$0xff] %v5855_v49  ;;  %2419 = vmatmul.f32.gmra.mxu0 %v5859_v30  ;;  %3680 = vmatmul.msk.f32.gmra.mxu1 %vm597_vm4, %v5395_v9  ;;  %v5865_v37 = vpop.f32.mrf.mxu2  ;;  %v3747_v49 = vld [vmem:[%s7102_s5 + $0x460] sm:$0xff] }
 0x24b   : > { %7244 = vst [vmem:[#allocation73_spill] sm:$0xff] %v5865_v37  ;;  %3079 = vmatpush.msra.mxu2 %v3747_v49  ;;  %v3715_v37 = vld [vmem:[%s7102_s5 + $0x360] sm:$0xff] }
 0x24c   : > { %2258 = vmatmul.f32.gmra.mxu3 %v4925_v48  ;;  %2853 = vmatpush.msra.mxu0 %v3715_v37 }
 0x24f   : > { %v5874_v19 = vpop.f32.mrf.mxu0  ;;  %v5876_v50 = vpop.f32.mrf.mxu1  ;;  %2648 = vmatmul.f32.gmra.mxu2 %v5378_v42 }
 0x250   : > { %7245 = vst [vmem:[#allocation74_spill] sm:$0xff] %v5874_v19  ;;  %v5879_v21 = vpop.f32.mrf.mxu3 }
 0x251   : > { %7246 = vst [vmem:[#allocation75_spill] sm:$0xff] %v5876_v50  ;;  %v7502_v4 = vld [vmem:[#allocation72_spill] sm:$0xff] }
 0x252   : > { %7247 = vst [vmem:[#allocation76_spill] sm:$0xff] %v5879_v21  ;;  %3664 = vmatmul.msk.f32.gmra.mxu0 %vm725_vm1, %v5889_v1  ;;  %2535 = vmatmul.f32.gmra.mxu1 %v5418_v17  ;;  %v5895_v49 = vpop.f32.mrf.mxu2  ;;  %v1947_v21 = vrot.slane %v5472_v15, 1 }
 0x253   : > { %7248 = vst [vmem:[#allocation77_spill] sm:$0xff] %v5895_v49 }
 0x254   : > { %2261 = vmatmul.f32.gmra.mxu3 %v4930_v13  ;;  %v5909_v57 = vsel %vm683_vm0, %v1929_v8, %v1947_v21 }
 0x257   : > { %v5899_v50 = vpop.f32.mrf.mxu0  ;;  %v5901_v19 = vpop.f32.mrf.mxu1  ;;  %2651 = vmatmul.f32.gmra.mxu2 %v5421_v10 }
 0x258   : > { %7249 = vst [vmem:[#allocation78_spill] sm:$0xff] %v5899_v50  ;;  %v5905_v55 = vpop.f32.mrf.mxu3 }
 0x259   : > { %7250 = vst [vmem:[#allocation79_spill] sm:$0xff] %v5901_v19  ;;  %v2069_v19 = vld [vmem:[%s7102_s5 + $0x158] sm:$0xff] }
 0x25a   : > { %7251 = vst [vmem:[#allocation80_spill] sm:$0xff] %v5905_v55  ;;  %2425 = vmatmul.f32.gmra.mxu0 %v5909_v57  ;;  %3681 = vmatmul.msk.f32.gmra.mxu1 %vm597_vm4, %v5443_v35  ;;  %v5915_v37 = vpop.f32.mrf.mxu2  ;;  %v3746_v55 = vld [vmem:[%s7102_s5 + $0x458] sm:$0xff] }
 0x25b   : > { %7252 = vst [vmem:[#allocation81_spill] sm:$0xff] %v5915_v37  ;;  %2692 = vmatpush.msra.mxu3 %v2069_v19  ;;  %3080 = vmatpush.msra.mxu2 %v3746_v55  ;;  %v3714_v37 = vld [vmem:[%s7102_s5 + $0x358] sm:$0xff]  ;;  %v5939_v19 = vsel %vm683_vm0, %v1947_v21, %v1929_v8  ;;  %v1930_v21 = vrot.slane %v5515_v32, 1 }
 0x25c   : > { %2264 = vmatmul.f32.gmra.mxu3 %v4982_v44  ;;  %2854 = vmatpush.msra.mxu0 %v3714_v37 }
 0x25f   : > { %v5924_v49 = vpop.f32.mrf.mxu0  ;;  %v5926_v50 = vpop.f32.mrf.mxu1  ;;  %2654 = vmatmul.f32.gmra.mxu2 %v5425_v31 }
 0x260   : > { %7253 = vst [vmem:[#allocation82_spill] sm:$0xff] %v5924_v49  ;;  %v5929_v16 = vpop.f32.mrf.mxu3  ;;  %v3729_v49 = vld [vmem:[%s7102_s5 + $0x3d0] sm:$0xff] }
 0x261   : > { %7254 = vst [vmem:[#allocation83_spill] sm:$0xff] %v5926_v50  ;;  %2968 = vmatpush.msra.mxu1 %v3729_v49 }
 0x262   : > { %7255 = vst [vmem:[#allocation84_spill] sm:$0xff] %v5929_v16  ;;  %3665 = vmatmul.msk.f32.gmra.mxu0 %vm725_vm1, %v5939_v19  ;;  %2541 = vmatmul.f32.gmra.mxu1 %v5465_v38  ;;  %v5945_v55 = vpop.f32.mrf.mxu2  ;;  %v1948_v16 = vrot.slane %v5524_v0, 1 }
 0x263   : > { %7256 = vst [vmem:[#allocation85_spill] sm:$0xff] %v5945_v55 }
 0x264   : > { %2267 = vmatmul.f32.gmra.mxu3 %v4985_v6  ;;  %v5959_v37 = vsel %vm683_vm0, %v1930_v21, %v1948_v16  ;;  %v5987_v22 = vsel %vm683_vm0, %v1948_v16, %v1930_v21  ;;  %v1931_v16 = vrot.slane %v5567_v14, 1 }
 0x267   : > { %v5949_v50 = vpop.f32.mrf.mxu0  ;;  %2657 = vmatmul.f32.gmra.mxu2 %v5468_v24  ;;  %v5955_v63 = vpop.f32.mrf.mxu1 }
 0x268   : > { %7257 = vst [vmem:[#allocation86_spill] sm:$0xff] %v5949_v50  ;;  %v5953_v8 = vpop.f32.mrf.mxu3 }
 0x269   : > { %7258 = vst [vmem:[#allocation87_spill] sm:$0xff] %v5953_v8  ;;  %v2068_v8 = vld [vmem:[%s7102_s5 + $0x150] sm:$0xff] }
 0x26a   : > { %7259 = vst [vmem:[#allocation88_spill] sm:$0xff] %v5955_v63  ;;  %2431 = vmatmul.f32.gmra.mxu0 %v5959_v37  ;;  %3682 = vmatmul.msk.f32.gmra.mxu1 %vm597_vm4, %v5490_v60  ;;  %v5965_v55 = vpop.f32.mrf.mxu2  ;;  %v3745_v63 = vld [vmem:[%s7102_s5 + $0x450] sm:$0xff] }
 0x26b   : > { %7260 = vst [vmem:[#allocation89_spill] sm:$0xff] %v5965_v55  ;;  %2693 = vmatpush.msra.mxu3 %v2068_v8  ;;  %3081 = vmatpush.msra.mxu2 %v3745_v63  ;;  %v3713_v55 = vld [vmem:[%s7102_s5 + $0x350] sm:$0xff] }
 0x26c   : > { %2270 = vmatmul.f32.gmra.mxu3 %v5047_v39  ;;  %2855 = vmatpush.msra.mxu0 %v3713_v55 }
 0x26f   : > { %2660 = vmatmul.f32.gmra.mxu2 %v5472_v15  ;;  %v5983_v62 = vpop.f32.mrf.mxu0  ;;  %v5989_v8 = vpop.f32.mrf.mxu1 }
 0x270   : > { %v5975_v50 = vpop.f32.mrf.mxu3  ;;  %7262 = vst [vmem:[#allocation91_spill] sm:$0xff] %v5983_v62  ;;  %v3744_v62 = vld [vmem:[%s7102_s5 + $0x448] sm:$0xff] }
 0x271   : > { %7261 = vst [vmem:[#allocation90_spill] sm:$0xff] %v5975_v50  ;;  %v1949_v50 = vrot.slane %v5571_v5, 1  ;;  %3082 = vmatpush.msra.mxu2 %v3744_v62 }
 0x272   : > { %7263 = vst [vmem:[#allocation92_spill] sm:$0xff] %v5989_v8  ;;  %3666 = vmatmul.msk.f32.gmra.mxu0 %vm725_vm1, %v5987_v22  ;;  %2547 = vmatmul.f32.gmra.mxu1 %v5512_v43  ;;  %v5995_v63 = vpop.f32.mrf.mxu2 }
 0x273   : > { %7264 = vst [vmem:[#allocation93_spill] sm:$0xff] %v5995_v63  ;;  %v6005_v49 = vsel %vm683_vm0, %v1931_v16, %v1949_v50 }
 0x274   : > { %2273 = vmatmul.f32.gmra.mxu3 %v5053_v59  ;;  %7266 = vst [vmem:[#allocation95_spill] sm:$0xff] %v6005_v49 }
 0x277   : > { %2663 = vmatmul.f32.gmra.mxu2 %v5515_v32  ;;  %v6013_v63 = vpop.f32.mrf.mxu0  ;;  %v6015_v8 = vpop.f32.mrf.mxu1 }
 0x278   : > { %v6001_v55 = vpop.f32.mrf.mxu3  ;;  %7268 = vst [vmem:[#allocation97_spill] sm:$0xff] %v6013_v63  ;;  %v6035_v63 = vsel %vm683_vm0, %v1949_v50, %v1931_v16  ;;  %v1950_v50 = vrot.slane %v5618_v7, 1  ;;  %v1932_v16 = vrot.slane %v5614_v33, 1 }
 0x279   : > { %7265 = vst [vmem:[#allocation94_spill] sm:$0xff] %v6001_v55  ;;  %v2067_v55 = vld [vmem:[%s7102_s5 + $0x148] sm:$0xff] }
 0x27a   : > { %2437 = vmatmul.f32.gmra.mxu0 %v6005_v49  ;;  %3683 = vmatmul.msk.f32.gmra.mxu1 %vm597_vm4, %v5542_v61  ;;  %v6011_v21 = vpop.f32.mrf.mxu2  ;;  %7269 = vst [vmem:[#allocation98_spill] sm:$0xff] %v6015_v8  ;;  %v3728_v8 = vld [vmem:[%s7102_s5 + $0x3c8] sm:$0xff]  ;;  %v3726_v49 = vld [vmem:[%s7102_s5 + $0x3b8] sm:$0xff] }
 0x27b   : > { %7267 = vst [vmem:[#allocation96_spill] sm:$0xff] %v6011_v21  ;;  %2694 = vmatpush.msra.mxu3 %v2067_v55  ;;  %v3712_v21 = vld [vmem:[%s7102_s5 + $0x348] sm:$0xff]  ;;  %2969 = vmatpush.msra.mxu1 %v3728_v8  ;;  %v3743_v55 = vld [vmem:[%s7102_s5 + $0x440] sm:$0xff] }
 0x27c   : > { %2276 = vmatmul.f32.gmra.mxu3 %v5111_v11  ;;  %7271 = vst [vmem:[#allocation100_spill] sm:$0xff] %v6035_v63  ;;  %2856 = vmatpush.msra.mxu0 %v3712_v21 }
 0x27d   : > { %3083 = vmatpush.msra.mxu2 %v3743_v55  ;;  %v3727_v55 = vld [vmem:[%s7102_s5 + $0x3c0] sm:$0xff] }
 0x27e   : > { %2970 = vmatpush.msra.mxu1 %v3727_v55 }
 0x27f   : > { %2666 = vmatmul.f32.gmra.mxu2 %v5524_v0  ;;  %v6050_v8 = vpop.f32.mrf.mxu1 }
 0x280   : > { %v6025_v52 = vpop.f32.mrf.mxu3  ;;  %7274 = vst [vmem:[#allocation103_spill] sm:$0xff] %v6050_v8  ;;  %v6067_v8 = vsel %vm683_vm0, %v1932_v16, %v1950_v50  ;;  %2971 = vmatpush.msra.mxu1 %v3726_v49  ;;  %v3708_v49 = vld [vmem:[%s7102_s5 + $0x328] sm:$0xff] }
 0x281   : > { %7270 = vst [vmem:[#allocation99_spill] sm:$0xff] %v6025_v52  ;;  %v6047_v52 = vpop.f32.mrf.mxu0 }
 0x282   : > { %3667 = vmatmul.msk.f32.gmra.mxu0 %vm725_vm1, %v6035_v63  ;;  %2553 = vmatmul.f32.gmra.mxu1 %v5564_v29  ;;  %v6041_v62 = vpop.f32.mrf.mxu2  ;;  %7273 = vst [vmem:[#allocation102_spill] sm:$0xff] %v6047_v52  ;;  %v3711_v63 = vld [vmem:[%s7102_s5 + $0x340] sm:$0xff]  ;;  %v3710_v52 = vld [vmem:[%s7102_s5 + $0x338] sm:$0xff] }
 0x283   : > { %7272 = vst [vmem:[#allocation101_spill] sm:$0xff] %v6041_v62  ;;  %v3742_v62 = vld [vmem:[%s7102_s5 + $0x438] sm:$0xff]  ;;  %2857 = vmatpush.msra.mxu0 %v3711_v63  ;;  %v2066_v63 = vld [vmem:[%s7102_s5 + $0x140] sm:$0xff] }
 0x284   : > { %2279 = vmatmul.f32.gmra.mxu3 %v5116_v45  ;;  %7276 = vst [vmem:[#allocation105_spill] sm:$0xff] %v6067_v8  ;;  %3084 = vmatpush.msra.mxu2 %v3742_v62  ;;  %v3740_v62 = vld [vmem:[%s7102_s5 + $0x428] sm:$0xff] }
 0x285   : > { %2858 = vmatpush.msra.mxu0 %v3710_v52  ;;  %2695 = vmatpush.msra.mxu3 %v2066_v63  ;;  %v3725_v52 = vld [vmem:[%s7102_s5 + $0x3b0] sm:$0xff]  ;;  %v3724_v63 = vld [vmem:[%s7102_s5 + $0x3a8] sm:$0xff] }
 0x286   : > { %2972 = vmatpush.msra.mxu1 %v3725_v52  ;;  %v6121_v52 = vsel %vm683_vm0, %v1950_v50, %v1932_v16  ;;  %v3706_v50 = vld [vmem:[%s7102_s5 + $0x318] sm:$0xff] }
 0x287   : > { %2669 = vmatmul.f32.gmra.mxu2 %v5567_v14  ;;  %7281 = vst [vmem:[#allocation110_spill] sm:$0xff] %v6121_v52  ;;  %v3722_v16 = vld [vmem:[%s7102_s5 + $0x398] sm:$0xff] }
 0x288   : > { %v6054_v21 = vpop.f32.mrf.mxu3  ;;  %2973 = vmatpush.msra.mxu1 %v3724_v63  ;;  %v1951_v63 = vrot.slane %v5665_v54, 1 }
 0x289   : > { %7275 = vst [vmem:[#allocation104_spill] sm:$0xff] %v6054_v21  ;;  %v3741_v21 = vld [vmem:[%s7102_s5 + $0x430] sm:$0xff]  ;;  %v6100_v55 = vpop.f32.mrf.mxu0 }
 0x28a   : > { %2443 = vmatmul.f32.gmra.mxu0 %v6067_v8  ;;  %3684 = vmatmul.msk.f32.gmra.mxu1 %vm597_vm4, %v5589_v26  ;;  %v3709_v8 = vld [vmem:[%s7102_s5 + $0x330] sm:$0xff]  ;;  %v6092_v26 = vpop.f32.mrf.mxu2  ;;  %7278 = vst [vmem:[#allocation107_spill] sm:$0xff] %v6100_v55  ;;  %v3735_v55 = vld [vmem:[%s7102_s5 + $0x400] sm:$0xff] }
 0x28b   : > { %3085 = vmatpush.msra.mxu2 %v3741_v21  ;;  %7277 = vst [vmem:[#allocation106_spill] sm:$0xff] %v6092_v26  ;;  %v3739_v21 = vld [vmem:[%s7102_s5 + $0x420] sm:$0xff]  ;;  %2859 = vmatpush.msra.mxu0 %v3709_v8  ;;  %v6109_v26 = vpop.f32.mrf.mxu1  ;;  %v3738_v8 = vld [vmem:[%s7102_s5 + $0x418] sm:$0xff] }
 0x28c   : > { %2282 = vmatmul.f32.gmra.mxu3 %v5168_v20  ;;  %7279 = vst [vmem:[#allocation108_spill] sm:$0xff] %v6109_v26  ;;  %v3723_v26 = vld [vmem:[%s7102_s5 + $0x3a0] sm:$0xff] }
 0x28d   : > { %3086 = vmatpush.msra.mxu2 %v3740_v62  ;;  %2860 = vmatpush.msra.mxu0 %v3708_v49  ;;  %v3707_v62 = vld [vmem:[%s7102_s5 + $0x320] sm:$0xff]  ;;  %v3705_v49 = vld [vmem:[%s7102_s5 + $0x310] sm:$0xff] }
 0x28e   : > { %2974 = vmatpush.msra.mxu1 %v3723_v26  ;;  %v1933_v26 = vrot.slane %v5661_v2, 1 }
 0x28f   : > { %2672 = vmatmul.f32.gmra.mxu2 %v5571_v5  ;;  %2861 = vmatpush.msra.mxu0 %v3707_v62  ;;  %v3721_v62 = vld [vmem:[%s7102_s5 + $0x390] sm:$0xff] }
 0x290   : > { %v6111_v29 = vpop.f32.mrf.mxu3  ;;  %3087 = vmatpush.msra.mxu2 %v3739_v21  ;;  %v3737_v21 = vld [vmem:[%s7102_s5 + $0x410] sm:$0xff]  ;;  %2975 = vmatpush.msra.mxu1 %v3722_v16  ;;  %v3720_v16 = vld [vmem:[%s7102_s5 + $0x388] sm:$0xff] }
 0x291   : > { %7280 = vst [vmem:[#allocation109_spill] sm:$0xff] %v6111_v29  ;;  %2862 = vmatpush.msra.mxu0 %v3706_v50 }
 0x292   : > { %3668 = vmatmul.msk.f32.gmra.mxu0 %vm725_vm1, %v6121_v52  ;;  %2559 = vmatmul.f32.gmra.mxu1 %v5611_v12  ;;  %v6150_v29 = vpop.f32.mrf.mxu2  ;;  %v6194_v52 = vsel %vm683_vm0, %v1951_v63, %v1933_v26 }
 0x293   : > { %3088 = vmatpush.msra.mxu2 %v3738_v8  ;;  %v3736_v8 = vld [vmem:[%s7102_s5 + $0x408] sm:$0xff]  ;;  %7282 = vst [vmem:[#allocation111_spill] sm:$0xff] %v6150_v29  ;;  %2863 = vmatpush.msra.mxu0 %v3705_v49  ;;  %v6165_v29 = vpop.f32.mrf.mxu0  ;;  %v6169_v49 = vsel %vm683_vm0, %v1933_v26, %v1951_v63 }
 0x294   : > { %2285 = vmatmul.f32.gmra.mxu3 %v5171_v34  ;;  %2976 = vmatpush.msra.mxu1 %v3721_v62  ;;  %7284 = vst [vmem:[#allocation113_spill] sm:$0xff] %v6165_v29  ;;  %v6174_v62 = vpop.f32.mrf.mxu1  ;;  %v3719_v29 = vld [vmem:[%s7102_s5 + $0x380] sm:$0xff] }
 0x295   : > { %3089 = vmatpush.msra.mxu2 %v3737_v21  ;;  %v3704_v21 = vld [vmem:[%s7102_s5 + $0x308] sm:$0xff]  ;;  %7285 = vst [vmem:[#allocation114_spill] sm:$0xff] %v6169_v49 }
 0x296   : > { %2864 = vmatpush.msra.mxu0 %v3704_v21  ;;  %7286 = vst [vmem:[#allocation115_spill] sm:$0xff] %v6174_v62  ;;  %2977 = vmatpush.msra.mxu1 %v3720_v16  ;;  %v2065_v21 = vld [vmem:[%s7102_s5 + $0x138] sm:$0xff] }
 0x297   : > { %2675 = vmatmul.f32.gmra.mxu2 %v5614_v33  ;;  %2696 = vmatpush.msra.mxu3 %v2065_v21  ;;  %7290 = vst [vmem:[#allocation117_spill] sm:$0xff] %v6194_v52  ;;  %v1934_v21 = vrot.slane %v5717_v40, 1 }
 0x298   : > { %v6157_v50 = vpop.f32.mrf.mxu3  ;;  %3090 = vmatpush.msra.mxu2 %v3736_v8  ;;  %v3703_v8 = vld [vmem:[%s7102_s5 + $0x300] sm:$0xff]  ;;  %2978 = vmatpush.msra.mxu1 %v3719_v29 }
 0x299   : > { %7283 = vst [vmem:[#allocation112_spill] sm:$0xff] %v6157_v50  ;;  %v7287_v50 = vld [vmem:[#allocation40_spill] sm:$0xff]  ;;  %2865 = vmatpush.msra.mxu0 %v3703_v8  ;;  %v1952_v8 = vrot.slane %v5721_v23, 1 }
 0x29a   : > { %2449 = vmatmul.f32.gmra.mxu0 %v6169_v49  ;;  %3685 = vmatmul.msk.f32.gmra.mxu1 %vm597_vm4, %v7287_v50  ;;  %v6190_v49 = vpop.f32.mrf.mxu2 }
 0x29b   : > { %3091 = vmatpush.msra.mxu2 %v3735_v55  ;;  %7289 = vst [vmem:[#allocation116_spill] sm:$0xff] %v6190_v49  ;;  %v7291_v55 = vld [vmem:[#allocation43_spill] sm:$0xff]  ;;  %v6200_v16 = vpop.f32.mrf.mxu0  ;;  %v6212_v26 = vsel %vm683_vm0, %v1934_v21, %v1952_v8 }
 0x29c   : > { %2288 = vmatmul.f32.gmra.mxu3 %v5267_v41  ;;  %7292 = vst [vmem:[#allocation43_spill] sm:$0xff] %v6200_v16  ;;  %v6202_v29 = vpop.f32.mrf.mxu1 }
 0x29d   : > { %7293 = vst [vmem:[#allocation118_spill] sm:$0xff] %v6202_v29  ;;  %v2064_v29 = vld [vmem:[%s7102_s5 + $0x130] sm:$0xff] }
 0x29e   : > { %7295 = vst [vmem:[#allocation120_spill] sm:$0xff] %v6212_v26  ;;  %2697 = vmatpush.msra.mxu3 %v2064_v29 }
 0x29f   : > { %2678 = vmatmul.f32.gmra.mxu2 %v5618_v7 }
 0x2a0   : > { %v6188_v62 = vpop.f32.mrf.mxu3 }
 0x2a1   : > { %7288 = vst [vmem:[#allocation40_spill] sm:$0xff] %v6188_v62  ;;  %v7296_v62 = vld [vmem:[#allocation46_spill] sm:$0xff] }
 0x2a2   : > { %3669 = vmatmul.msk.f32.gmra.mxu0 %vm725_vm1, %v6194_v52  ;;  %2565 = vmatmul.f32.gmra.mxu1 %v7291_v55  ;;  %v6218_v49 = vpop.f32.mrf.mxu2  ;;  %v6233_v52 = vsel %vm683_vm0, %v1952_v8, %v1934_v21  ;;  %v7307_v8 = vld [vmem:[#allocation5_spill] sm:$0xff]  ;;  %v2063_v21 = vld [vmem:[%s7102_s5 + $0x128] sm:$0xff] }
 0x2a3   : > { %7297 = vst [vmem:[#allocation121_spill] sm:$0xff] %v6218_v49  ;;  %v6224_v16 = vpop.f32.mrf.mxu0  ;;  %2698 = vmatpush.msra.mxu3 %v2063_v21 }
 0x2a4   : > { %2291 = vmatmul.f32.gmra.mxu3 %v5279_v53  ;;  %7298 = vst [vmem:[#allocation122_spill] sm:$0xff] %v6224_v16 }
 0x2a5   : > { %7301 = vst [vmem:[#allocation125_spill] sm:$0xff] %v6233_v52 }
 0x2a7   : > { %2681 = vmatmul.f32.gmra.mxu2 %v5661_v2 }
 0x2a8   : > { %v6208_v63 = vpop.f32.mrf.mxu3 }
 0x2a9   : > { %7294 = vst [vmem:[#allocation119_spill] sm:$0xff] %v6208_v63  ;;  %v6226_v63 = vpop.f32.mrf.mxu1 }
 0x2aa   : > { %2455 = vmatmul.f32.gmra.mxu0 %v6212_v26  ;;  %3686 = vmatmul.msk.f32.gmra.mxu1 %vm597_vm4, %v7296_v62  ;;  %7299 = vst [vmem:[#allocation123_spill] sm:$0xff] %v6226_v63  ;;  %v6240_v49 = vpop.f32.mrf.mxu2  ;;  %v7304_v63 = vld [vmem:[#allocation21_spill] sm:$0xff]  ;;  %v7339_v62 = vld [vmem:[#allocation11_spill] sm:$0xff] }
 0x2ab   : > { %7302 = vst [vmem:[#allocation126_spill] sm:$0xff] %v6240_v49  ;;  %v6242_v29 = vpop.f32.mrf.mxu0 }
 0x2ac   : > { %2294 = vmatmul.f32.gmra.mxu3 %v5330_v46  ;;  %7303 = vst [vmem:[#allocation127_spill] sm:$0xff] %v6242_v29  ;;  %v7309_v29 = vld [vmem:[#allocation23_spill] sm:$0xff] }
 0x2af   : > { %2684 = vmatmul.f32.gmra.mxu2 %v5665_v54 }
 0x2b0   : > { %v6229_v26 = vpop.f32.mrf.mxu3 }
 0x2b1   : > { %7300 = vst [vmem:[#allocation124_spill] sm:$0xff] %v6229_v26  ;;  %v6245_v16 = vpop.f32.mrf.mxu1 }
 0x2b2   : > { %3670 = vmatmul.msk.f32.gmra.mxu0 %vm725_vm1, %v6233_v52  ;;  %2571 = vmatmul.f32.gmra.mxu1 %v5714_v27  ;;  %7305 = vst [vmem:[#allocation21_spill] sm:$0xff] %v6245_v16  ;;  %v6257_v49 = vpop.f32.mrf.mxu2  ;;  %v7314_v52 = vld [vmem:[#allocation25_spill] sm:$0xff]  ;;  %v7317_v27 = vld [vmem:[#allocation7_spill] sm:$0xff] }
 0x2b3   : > { %7308 = vst [vmem:[#allocation5_spill] sm:$0xff] %v6257_v49  ;;  %v6264_v16 = vpop.f32.mrf.mxu0 }
 0x2b4   : > { %2297 = vmatmul.f32.gmra.mxu3 %v5334_v56  ;;  %7311 = vst [vmem:[#allocation129_spill] sm:$0xff] %v6264_v16 }
 0x2b7   : > { %3092 = vmatmul.f32.vlgmr.msra.gmra.mxu2 %v7304_v63 }
 0x2b8   : > { %v6247_v26 = vpop.f32.mrf.mxu3 }
 0x2b9   : > { %7306 = vst [vmem:[#allocation128_spill] sm:$0xff] %v6247_v26 }
 0x2ba   : > { %3751 = vmatmul.msk.f32.vlgmr.msra.gmra.mxu0 %vm597_vm4, %v7307_v8  ;;  %2979 = vmatmul.f32.vlgmr.msra.gmra.mxu1 %v4925_v48  ;;  %v6266_v8 = vpop.f32.mrf.mxu1  ;;  %v7313_v48 = vld [vmem:[#allocation6_spill] sm:$0xff]  ;;  %v6274_v49 = vpop.f32.mrf.mxu2 }
 0x2bb   : > { %7312 = vst [vmem:[#allocation130_spill] sm:$0xff] %v6266_v8  ;;  %v6280_v16 = vpop.f32.mrf.mxu0 }
 0x2bc   : > { %2300 = vmatmul.f32.gmra.mxu3 %v5373_v36  ;;  %7316 = vst [vmem:[#allocation25_spill] sm:$0xff] %v6274_v49 }
 0x2bd   : > { %7318 = vst [vmem:[#allocation7_spill] sm:$0xff] %v6280_v16 }
 0x2bf   : > { %3767 = vmatmul.msk.f32.gmra.mxu2 %vm725_vm1, %v7309_v29 }
 0x2c0   : > { %v6262_v26 = vpop.f32.mrf.mxu3 }
 0x2c1   : > { %7310 = vst [vmem:[#allocation23_spill] sm:$0xff] %v6262_v26  ;;  %v7328_v26 = vld [vmem:[#allocation9_spill] sm:$0xff] }
 0x2c2   : > { %2869 = vmatmul.f32.gmra.mxu0 %v7313_v48  ;;  %2982 = vmatmul.f32.gmra.mxu1 %v4930_v13  ;;  %v6282_v8 = vpop.f32.mrf.mxu1  ;;  %v2062_v13 = vld [vmem:[%s7102_s5 + $0x120] sm:$0xff]  ;;  %v7320_v48 = vld [vmem:[#allocation27_spill] sm:$0xff] }
 0x2c3   : > { %7319 = vst [vmem:[#allocation131_spill] sm:$0xff] %v6282_v8  ;;  %2699 = vmatpush.msra.mxu3 %v2062_v13  ;;  %v6298_v8 = vpop.f32.mrf.mxu0 }
 0x2c4   : > { %2303 = vmatmul.f32.gmra.mxu3 %v5378_v42  ;;  %7324 = vst [vmem:[#allocation132_spill] sm:$0xff] %v6298_v8 }
 0x2c7   : > { %3098 = vmatmul.f32.gmra.mxu2 %v7314_v52 }
 0x2c8   : > { %v6272_v21 = vpop.f32.mrf.mxu3 }
 0x2c9   : > { %7315 = vst [vmem:[#allocation6_spill] sm:$0xff] %v6272_v21  ;;  %v7326_v21 = vld [vmem:[#allocation29_spill] sm:$0xff] }
 0x2ca   : > { %3752 = vmatmul.msk.f32.gmra.mxu0 %vm597_vm4, %v7317_v27  ;;  %2985 = vmatmul.f32.gmra.mxu1 %v4982_v44  ;;  %v7322_v27 = vld [vmem:[#allocation8_spill] sm:$0xff]  ;;  %v6295_v44 = vpop.f32.mrf.mxu2  ;;  %v6300_v16 = vpop.f32.mrf.mxu1 }
 0x2cb   : > { %7323 = vst [vmem:[#allocation8_spill] sm:$0xff] %v6295_v44  ;;  %v6315_v44 = vpop.f32.mrf.mxu0 }
 0x2cc   : > { %2306 = vmatmul.f32.gmra.mxu3 %v5421_v10  ;;  %7325 = vst [vmem:[#allocation133_spill] sm:$0xff] %v6300_v16  ;;  %v7331_v16 = vld [vmem:[#allocation31_spill] sm:$0xff] }
 0x2cd   : > { %7330 = vst [vmem:[#allocation134_spill] sm:$0xff] %v6315_v44 }
 0x2cf   : > { %3768 = vmatmul.msk.f32.gmra.mxu2 %vm725_vm1, %v7320_v48 }
 0x2d0   : > { %v6291_v49 = vpop.f32.mrf.mxu3 }
 0x2d1   : > { %7321 = vst [vmem:[#allocation27_spill] sm:$0xff] %v6291_v49 }
 0x2d2   : > { %2875 = vmatmul.f32.gmra.mxu0 %v7322_v27  ;;  %2988 = vmatmul.f32.gmra.mxu1 %v4985_v6  ;;  %v2061_v6 = vld [vmem:[%s7102_s5 + $0x118] sm:$0xff]  ;;  %v6313_v27 = vpop.f32.mrf.mxu2  ;;  %v6320_v8 = vpop.f32.mrf.mxu1 }
 0x2d3   : > { %7329 = vst [vmem:[#allocation9_spill] sm:$0xff] %v6313_v27  ;;  %2700 = vmatpush.msra.mxu3 %v2061_v6  ;;  %v7335_v27 = vld [vmem:[#allocation34_spill] sm:$0xff]  ;;  %v6332_v44 = vpop.f32.mrf.mxu0 }
 0x2d4   : > { %2309 = vmatmul.f32.gmra.mxu3 %v5425_v31  ;;  %7332 = vst [vmem:[#allocation31_spill] sm:$0xff] %v6320_v8  ;;  %v7345_v8 = vld [vmem:[#allocation39_spill] sm:$0xff] }
 0x2d5   : > { %7337 = vst [vmem:[#allocation135_spill] sm:$0xff] %v6332_v44  ;;  %v7342_v44 = vld [vmem:[#allocation12_spill] sm:$0xff] }
 0x2d7   : > { %3104 = vmatmul.f32.gmra.mxu2 %v7326_v21 }
 0x2d8   : > { %v6303_v13 = vpop.f32.mrf.mxu3 }
 0x2d9   : > { %7327 = vst [vmem:[#allocation29_spill] sm:$0xff] %v6303_v13 }
 0x2da   : > { %3753 = vmatmul.msk.f32.gmra.mxu0 %vm597_vm4, %v7328_v26  ;;  %2991 = vmatmul.f32.gmra.mxu1 %v5047_v39  ;;  %v7333_v39 = vld [vmem:[#allocation10_spill] sm:$0xff]  ;;  %v6327_v13 = vpop.f32.mrf.mxu2  ;;  %v6334_v49 = vpop.f32.mrf.mxu1 }
 0x2db   : > { %7334 = vst [vmem:[#allocation10_spill] sm:$0xff] %v6327_v13 }
 0x2dc   : > { %2312 = vmatmul.f32.gmra.mxu3 %v5468_v24  ;;  %7338 = vst [vmem:[#allocation136_spill] sm:$0xff] %v6334_v49 }
 0x2df   : > { %3769 = vmatmul.msk.f32.gmra.mxu2 %vm725_vm1, %v7331_v16 }
 0x2e0   : > { %v6322_v26 = vpop.f32.mrf.mxu3 }
 0x2e2   : > { %2881 = vmatmul.f32.gmra.mxu0 %v7333_v39  ;;  %2994 = vmatmul.f32.gmra.mxu1 %v5053_v59  ;;  %v2060_v59 = vld [vmem:[%s7102_s5 + $0x110] sm:$0xff]  ;;  %v7340_v39 = vld [vmem:[#allocation37_spill] sm:$0xff]  ;;  %v6349_v49 = vpop.f32.mrf.mxu2 }
 0x2e3   : > { %2701 = vmatpush.msra.mxu3 %v2060_v59  ;;  %7341 = vst [vmem:[#allocation11_spill] sm:$0xff] %v6349_v49 }
 0x2e4   : > { %2315 = vmatmul.f32.gmra.mxu3 %v5472_v15 }
 0x2e7   : > { %3110 = vmatmul.f32.gmra.mxu2 %v7335_v27 }
 0x2e8   : > { %v6330_v6 = vpop.f32.mrf.mxu3 }
 0x2e9   : > { %7336 = vst [vmem:[#allocation34_spill] sm:$0xff] %v6330_v6  ;;  %v7347_v6 = vld [vmem:[#allocation13_spill] sm:$0xff] }
 0x2ea   : > { %3754 = vmatmul.msk.f32.gmra.mxu0 %vm597_vm4, %v7339_v62  ;;  %2997 = vmatmul.f32.gmra.mxu1 %v5111_v11  ;;  %v6353_v11 = vpop.f32.mrf.mxu0  ;;  %v6355_v62 = vpop.f32.mrf.mxu1 }
 0x2eb   : > { %7343 = vst [vmem:[#allocation37_spill] sm:$0xff] %v6353_v11  ;;  %v6365_v49 = vpop.f32.mrf.mxu2  ;;  %v7351_v11 = vld [vmem:[#allocation42_spill] sm:$0xff] }
 0x2ec   : > { %2318 = vmatmul.f32.gmra.mxu3 %v5515_v32  ;;  %7344 = vst [vmem:[#allocation12_spill] sm:$0xff] %v6355_v62 }
 0x2ed   : > { %7348 = vst [vmem:[#allocation13_spill] sm:$0xff] %v6365_v49 }
 0x2ef   : > { %3770 = vmatmul.msk.f32.gmra.mxu2 %vm725_vm1, %v7340_v39 }
 0x2f0   : > { %v6347_v13 = vpop.f32.mrf.mxu3 }
 0x2f2   : > { %2887 = vmatmul.f32.gmra.mxu0 %v7342_v44  ;;  %3000 = vmatmul.f32.gmra.mxu1 %v5116_v45  ;;  %v2059_v45 = vld [vmem:[%s7102_s5 + $0x108] sm:$0xff]  ;;  %v6371_v44 = vpop.f32.mrf.mxu0  ;;  %v6373_v62 = vpop.f32.mrf.mxu1 }
 0x2f3   : > { %7349 = vst [vmem:[#allocation137_spill] sm:$0xff] %v6371_v44  ;;  %2702 = vmatpush.msra.mxu3 %v2059_v45  ;;  %v7354_v44 = vld [vmem:[#allocation45_spill] sm:$0xff] }
 0x2f4   : > { %2321 = vmatmul.f32.gmra.mxu3 %v5524_v0  ;;  %7350 = vst [vmem:[#allocation138_spill] sm:$0xff] %v6373_v62 }
 0x2f7   : > { %3116 = vmatmul.f32.gmra.mxu2 %v7345_v8 }
 0x2f8   : > { %v6359_v59 = vpop.f32.mrf.mxu3 }
 0x2f9   : > { %7346 = vst [vmem:[#allocation39_spill] sm:$0xff] %v6359_v59  ;;  %v7356_v59 = vld [vmem:[#allocation14_spill] sm:$0xff] }
 0x2fa   : > { %3755 = vmatmul.msk.f32.gmra.mxu0 %vm597_vm4, %v7347_v6  ;;  %3003 = vmatmul.f32.gmra.mxu1 %v5168_v20  ;;  %v6383_v20 = vpop.f32.mrf.mxu2  ;;  %v6385_v49 = vpop.f32.mrf.mxu0 }
 0x2fb   : > { %7352 = vst [vmem:[#allocation42_spill] sm:$0xff] %v6383_v20  ;;  %v6388_v45 = vpop.f32.mrf.mxu1  ;;  %v7358_v20 = vld [vmem:[#allocation48_spill] sm:$0xff] }
 0x2fc   : > { %2324 = vmatmul.f32.gmra.mxu3 %v5567_v14  ;;  %7353 = vst [vmem:[#allocation139_spill] sm:$0xff] %v6385_v49 }
 0x2fd   : > { %7355 = vst [vmem:[#allocation45_spill] sm:$0xff] %v6388_v45 }
 0x2ff   : > { %3771 = vmatmul.msk.f32.gmra.mxu2 %vm725_vm1, %v7351_v11 }
 0x300   : > { %v6378_v6 = vpop.f32.mrf.mxu3 }
 0x302   : > { %2893 = vmatmul.f32.gmra.mxu0 %v5255_v28  ;;  %3006 = vmatmul.f32.gmra.mxu1 %v5171_v34  ;;  %v2058_v34 = vld [vmem:[%s7102_s5 + $0x100] sm:$0xff]  ;;  %v6400_v28 = vpop.f32.mrf.mxu2  ;;  %v6407_v49 = vpop.f32.mrf.mxu0 }
 0x303   : > { %2703 = vmatpush.msra.mxu3 %v2058_v34  ;;  %7357 = vst [vmem:[#allocation14_spill] sm:$0xff] %v6400_v28 }
 0x304   : > { %2327 = vmatmul.f32.gmra.mxu3 %v5571_v5  ;;  %7359 = vst [vmem:[#allocation48_spill] sm:$0xff] %v6407_v49 }
 0x307   : > { %3122 = vmatmul.f32.gmra.mxu2 %v7354_v44 }
 0x308   : > { %v6390_v62 = vpop.f32.mrf.mxu3 }
 0x30a   : > { %3756 = vmatmul.msk.f32.gmra.mxu0 %vm597_vm4, %v7356_v59  ;;  %3009 = vmatmul.f32.gmra.mxu1 %v5267_v41  ;;  %v6409_v59 = vpop.f32.mrf.mxu1  ;;  %v7361_v41 = vld [vmem:[#allocation51_spill] sm:$0xff]  ;;  %v6417_v28 = vpop.f32.mrf.mxu2 }
 0x30b   : > { %7360 = vst [vmem:[#allocation140_spill] sm:$0xff] %v6409_v59  ;;  %v6423_v49 = vpop.f32.mrf.mxu0 }
 0x30c   : > { %2330 = vmatmul.f32.gmra.mxu3 %v5614_v33  ;;  %7362 = vst [vmem:[#allocation51_spill] sm:$0xff] %v6417_v28 }
 0x30d   : > { %7363 = vst [vmem:[#allocation141_spill] sm:$0xff] %v6423_v49 }
 0x30f   : > { %3772 = vmatmul.msk.f32.gmra.mxu2 %vm725_vm1, %v7358_v20 }
 0x310   : > { %v6405_v45 = vpop.f32.mrf.mxu3 }
 0x312   : > { %2899 = vmatmul.f32.gmra.mxu0 %v5323_v58  ;;  %3012 = vmatmul.f32.gmra.mxu1 %v5279_v53  ;;  %v6425_v59 = vpop.f32.mrf.mxu1  ;;  %v7365_v53 = vld [vmem:[#allocation54_spill] sm:$0xff]  ;;  %v6435_v28 = vpop.f32.mrf.mxu2 }
 0x313   : > { %7364 = vst [vmem:[#allocation142_spill] sm:$0xff] %v6425_v59 }
 0x314   : > { %2333 = vmatmul.f32.gmra.mxu3 %v5618_v7  ;;  %7366 = vst [vmem:[#allocation54_spill] sm:$0xff] %v6435_v28 }
 0x317   : > { %3128 = vmatmul.f32.gmra.mxu2 %v7361_v41 }
 0x318   : > { %v6415_v34 = vpop.f32.mrf.mxu3 }
 0x31a   : > { %3757 = vmatmul.msk.f32.gmra.mxu0 %vm597_vm4, %v5349_v51  ;;  %3015 = vmatmul.f32.gmra.mxu1 %v5330_v46  ;;  %v6438_v46 = vpop.f32.mrf.mxu0  ;;  %v6440_v51 = vpop.f32.mrf.mxu1 }
 0x31b   : > { %7367 = vst [vmem:[#allocation143_spill] sm:$0xff] %v6438_v46 }
 0x31c   : > { %2336 = vmatmul.f32.gmra.mxu3 %v5661_v2  ;;  %7368 = vst [vmem:[#allocation144_spill] sm:$0xff] %v6440_v51 }
 0x31f   : > { %3773 = vmatmul.msk.f32.gmra.mxu2 %vm725_vm1, %v7365_v53 }
 0x320   : > { %v6431_v58 = vpop.f32.mrf.mxu3 }
 0x322   : > { %2905 = vmatmul.f32.gmra.mxu0 %v5369_v47  ;;  %3018 = vmatmul.f32.gmra.mxu1 %v5334_v56  ;;  %v6450_v56 = vpop.f32.mrf.mxu2  ;;  %v6452_v47 = vpop.f32.mrf.mxu0 }
 0x323   : > { %7370 = vst [vmem:[#allocation146_spill] sm:$0xff] %v6450_v56  ;;  %v6457_v28 = vpop.f32.mrf.mxu1 }
 0x324   : > { %2339 = vmatmul.f32.gmra.mxu3 %v5665_v54  ;;  %7371 = vst [vmem:[#allocation147_spill] sm:$0xff] %v6452_v47  ;;  %v7375_v47 = vld [vmem:[#allocation16_spill] sm:$0xff] }
 0x325   : > { %7372 = vst [vmem:[#allocation148_spill] sm:$0xff] %v6457_v28  ;;  %v1918_v49 = vrot.slane %v7375_v47, 1 }
 0x327   : > { %3134 = vmatmul.f32.gmra.mxu2 %v5789_v25 }
 0x328   : > { %v6443_v59 = vpop.f32.mrf.mxu3 }
 0x329   : > { %7369 = vst [vmem:[#allocation145_spill] sm:$0xff] %v6443_v59 }
 0x32a   : > { %3758 = vmatmul.msk.f32.gmra.mxu0 %vm597_vm4, %v5395_v9  ;;  %3021 = vmatmul.f32.gmra.mxu1 %v5373_v36  ;;  %v7373_v36 = vld [vmem:[#allocation15_spill] sm:$0xff]  ;;  %v6465_v46 = vpop.f32.mrf.mxu2  ;;  %v6471_v59 = vpop.f32.mrf.mxu0 }
 0x32b   : > { %v1936_v9 = vrot.slane %v7373_v36, 1  ;;  %7374 = vst [vmem:[#allocation15_spill] sm:$0xff] %v6465_v46  ;;  %v6473_v28 = vpop.f32.mrf.mxu1 }
 0x32c   : > { %2342 = vmatmul.f32.gmra.mxu3 %v5717_v40  ;;  %7376 = vst [vmem:[#allocation16_spill] sm:$0xff] %v6471_v59 }
 0x32d   : > { %7377 = vst [vmem:[#allocation149_spill] sm:$0xff] %v6473_v28  ;;  %v7412_v28 = vld [vmem:[#allocation49_spill] sm:$0xff] }
 0x32f   : > { %3774 = vmatmul.msk.f32.gmra.mxu2 %vm725_vm1, %v5839_v18 }
 0x330   : > { %v6459_v51 = vpop.f32.mrf.mxu3 }
 0x332   : > { %2911 = vmatmul.f32.gmra.mxu0 %v5418_v17  ;;  %3024 = vmatmul.f32.gmra.mxu1 %v5378_v42  ;;  %v1954_v42 = vsel %vm683_vm0, %v1918_v49, %v1936_v9  ;;  %v6486_v47 = vpop.f32.mrf.mxu2  ;;  %v6490_v36 = vpop.f32.mrf.mxu0 }
 0x333   : > { %7379 = vst [vmem:[#allocation151_spill] sm:$0xff] %v6486_v47 }
 0x334   : > { %2345 = vmatmul.f32.gmra.mxu3 %v5721_v23  ;;  %7380 = vst [vmem:[#allocation152_spill] sm:$0xff] %v6490_v36  ;;  %v7409_v36 = vld [vmem:[#allocation46_spill] sm:$0xff] }
 0x337   : > { %3140 = vmatmul.f32.gmra.mxu2 %v5859_v30 }
 0x338   : > { %v6468_v56 = vpop.f32.mrf.mxu3 }
 0x33a   : > { %3759 = vmatmul.msk.f32.gmra.mxu0 %vm597_vm4, %v5443_v35  ;;  %3027 = vmatmul.f32.gmra.mxu1 %v5421_v10  ;;  %v1972_v10 = vsel %vm683_vm0, %v1936_v9, %v1918_v49  ;;  %v6494_v35 = vpop.f32.mrf.mxu1  ;;  %v6508_v49 = vpop.f32.mrf.mxu0 }
 0x33b   : > { %7381 = vst [vmem:[#allocation153_spill] sm:$0xff] %v6494_v35 }
 0x33c   : > { %2704 = vmatmul.f32.vlgmr.msra.gmra.mxu3 %v1954_v42 }
 0x33f   : > { %3775 = vmatmul.msk.f32.gmra.mxu2 %vm725_vm1, %v5889_v1 }
 0x340   : > { %v6484_v17 = vpop.f32.mrf.mxu3 }
 0x341   : > { %7378 = vst [vmem:[#allocation150_spill] sm:$0xff] %v6484_v17 }
 0x342   : > { %2917 = vmatmul.f32.gmra.mxu0 %v5465_v38  ;;  %3030 = vmatmul.f32.gmra.mxu1 %v5425_v31  ;;  %v6505_v31 = vpop.f32.mrf.mxu2  ;;  %v7384_v38 = vld [vmem:[#allocation17_spill] sm:$0xff]  ;;  %v6510_v9 = vpop.f32.mrf.mxu1 }
 0x343   : > { %7383 = vst [vmem:[#allocation155_spill] sm:$0xff] %v6505_v31 }
 0x344   : > { %3687 = vmatmul.msk.f32.gmra.mxu3 %vm725_vm1, %v1972_v10  ;;  %7385 = vst [vmem:[#allocation17_spill] sm:$0xff] %v6508_v49 }
 0x345   : > { %7386 = vst [vmem:[#allocation156_spill] sm:$0xff] %v6510_v9 }
 0x347   : > { %3146 = vmatmul.f32.gmra.mxu2 %v5909_v57 }
 0x348   : > { %v6499_v42 = vpop.f32.mrf.mxu3 }
 0x349   : > { %7382 = vst [vmem:[#allocation154_spill] sm:$0xff] %v6499_v42  ;;  %v7432_v42 = vld [vmem:[#allocation58_spill] sm:$0xff] }
 0x34a   : > { %3760 = vmatmul.msk.f32.gmra.mxu0 %vm597_vm4, %v5490_v60  ;;  %3033 = vmatmul.f32.gmra.mxu1 %v5468_v24  ;;  %v7388_v60 = vld [vmem:[#allocation19_spill] sm:$0xff]  ;;  %v6522_v24 = vpop.f32.mrf.mxu2  ;;  %v6527_v31 = vpop.f32.mrf.mxu1 }
 0x34b   : > { %7389 = vst [vmem:[#allocation19_spill] sm:$0xff] %v6522_v24 }
 0x34c   : > { %2710 = vmatmul.f32.gmra.mxu3 %v7384_v38  ;;  %v6524_v38 = vpop.f32.mrf.mxu0  ;;  %7391 = vst [vmem:[#allocation159_spill] sm:$0xff] %v6527_v31  ;;  %v7397_v31 = vld [vmem:[#allocation32_spill] sm:$0xff] }
 0x34d   : > { %7390 = vst [vmem:[#allocation158_spill] sm:$0xff] %v6524_v38 }
 0x34f   : > { %3776 = vmatmul.msk.f32.gmra.mxu2 %vm725_vm1, %v5939_v19 }
 0x350   : > { %v6515_v10 = vpop.f32.mrf.mxu3 }
 0x351   : > { %7387 = vst [vmem:[#allocation157_spill] sm:$0xff] %v6515_v10 }
 0x352   : > { %2923 = vmatmul.f32.gmra.mxu0 %v5512_v43  ;;  %3036 = vmatmul.f32.gmra.mxu1 %v5472_v15  ;;  %v6536_v15 = vpop.f32.mrf.mxu2  ;;  %v6545_v24 = vpop.f32.mrf.mxu1 }
 0x353   : > { %7393 = vst [vmem:[#allocation161_spill] sm:$0xff] %v6536_v15  ;;  %v7400_v15 = vld [vmem:[#allocation35_spill] sm:$0xff] }
 0x354   : > { %3688 = vmatmul.msk.f32.gmra.mxu3 %vm725_vm1, %v7388_v60  ;;  %v6543_v60 = vpop.f32.mrf.mxu0  ;;  %7396 = vst [vmem:[#allocation164_spill] sm:$0xff] %v6545_v24 }
 0x355   : > { %7395 = vst [vmem:[#allocation163_spill] sm:$0xff] %v6543_v60 }
 0x357   : > { %3152 = vmatmul.f32.gmra.mxu2 %v5959_v37 }
 0x358   : > { %v6529_v9 = vpop.f32.mrf.mxu3 }
 0x359   : > { %7392 = vst [vmem:[#allocation160_spill] sm:$0xff] %v6529_v9  ;;  %v7431_v9 = vld [vmem:[#allocation6_spill] sm:$0xff] }
 0x35a   : > { %3761 = vmatmul.msk.f32.gmra.mxu0 %vm597_vm4, %v5542_v61  ;;  %3039 = vmatmul.f32.gmra.mxu1 %v5515_v32  ;;  %v7398_v32 = vld [vmem:[#allocation95_spill] sm:$0xff] }
 0x35c   : > { %2716 = vmatmul.f32.gmra.mxu3 %v7304_v63  ;;  %v6555_v63 = vpop.f32.mrf.mxu2  ;;  %v6561_v24 = vpop.f32.mrf.mxu0 }
 0x35f   : > { %3777 = vmatmul.msk.f32.gmra.mxu2 %vm725_vm1, %v5987_v22 }
 0x360   : > { %v6541_v43 = vpop.f32.mrf.mxu3 }
 0x361   : > { %7394 = vst [vmem:[#allocation162_spill] sm:$0xff] %v6541_v43 }
 0x362   : > { %2929 = vmatmul.f32.gmra.mxu0 %v7397_v31  ;;  %3042 = vmatmul.f32.gmra.mxu1 %v5524_v0  ;;  %v6563_v31 = vpop.f32.mrf.mxu1  ;;  %v7401_v0 = vld [vmem:[#allocation100_spill] sm:$0xff] }
 0x364   : > { %3689 = vmatmul.msk.f32.gmra.mxu3 %vm725_vm1, %v7309_v29  ;;  %v6573_v60 = vpop.f32.mrf.mxu2 }
 0x367   : > { %3158 = vmatmul.f32.gmra.mxu2 %v7398_v32 }
 0x368   : > { %v6553_v61 = vpop.f32.mrf.mxu3 }
 0x369   : > { %7399 = vst [vmem:[#allocation32_spill] sm:$0xff] %v6553_v61 }
 0x36a   : > { %3762 = vmatmul.msk.f32.gmra.mxu0 %vm597_vm4, %v7400_v15  ;;  %3045 = vmatmul.f32.gmra.mxu1 %v5567_v14  ;;  %v6578_v14 = vpop.f32.mrf.mxu0  ;;  %v6580_v15 = vpop.f32.mrf.mxu1 }
 0x36c   : > { %2722 = vmatmul.f32.gmra.mxu3 %v7314_v52  ;;  %v7403_v52 = vld [vmem:[#allocation105_spill] sm:$0xff] }
 0x36f   : > { %3778 = vmatmul.msk.f32.gmra.mxu2 %vm725_vm1, %v7401_v0 }
 0x370   : > { %v6569_v29 = vpop.f32.mrf.mxu3 }
 0x371   : > { %7402 = vst [vmem:[#allocation95_spill] sm:$0xff] %v6569_v29  ;;  %v7425_v29 = vld [vmem:[#allocation65_spill] sm:$0xff] }
 0x372   : > { %2935 = vmatmul.f32.gmra.mxu0 %v5611_v12  ;;  %3048 = vmatmul.f32.gmra.mxu1 %v5571_v5  ;;  %v6590_v5 = vpop.f32.mrf.mxu2  ;;  %v6592_v12 = vpop.f32.mrf.mxu0 }
 0x373   : > { %v6597_v47 = vpop.f32.mrf.mxu1 }
 0x374   : > { %3690 = vmatmul.msk.f32.gmra.mxu3 %vm725_vm1, %v7320_v48  ;;  %v7405_v48 = vld [vmem:[#allocation110_spill] sm:$0xff] }
 0x377   : > { %3164 = vmatmul.f32.gmra.mxu2 %v7403_v52 }
 0x378   : > { %v6583_v38 = vpop.f32.mrf.mxu3 }
 0x379   : > { %7404 = vst [vmem:[#allocation35_spill] sm:$0xff] %v6583_v38 }
 0x37a   : > { %3763 = vmatmul.msk.f32.gmra.mxu0 %vm597_vm4, %v7287_v50  ;;  %3051 = vmatmul.f32.gmra.mxu1 %v5614_v33  ;;  %v6606_v33 = vpop.f32.mrf.mxu2  ;;  %v7407_v50 = vld [vmem:[#allocation114_spill] sm:$0xff]  ;;  %v6611_v35 = vpop.f32.mrf.mxu0 }
 0x37b   : > { %v6613_v46 = vpop.f32.mrf.mxu1 }
 0x37c   : > { %2728 = vmatmul.f32.gmra.mxu3 %v7326_v21 }
 0x37f   : > { %3779 = vmatmul.msk.f32.gmra.mxu2 %vm725_vm1, %v7405_v48 }
 0x380   : > { %v6599_v49 = vpop.f32.mrf.mxu3 }
 0x381   : > { %7406 = vst [vmem:[#allocation100_spill] sm:$0xff] %v6599_v49  ;;  %v7416_v49 = vld [vmem:[#allocation125_spill] sm:$0xff] }
 0x382   : > { %2941 = vmatmul.f32.gmra.mxu0 %v7291_v55  ;;  %3054 = vmatmul.f32.gmra.mxu1 %v5618_v7  ;;  %v7410_v7 = vld [vmem:[#allocation117_spill] sm:$0xff]  ;;  %v6629_v59 = vpop.f32.mrf.mxu0 }
 0x384   : > { %3691 = vmatmul.msk.f32.gmra.mxu3 %vm725_vm1, %v7331_v16  ;;  %v6625_v16 = vpop.f32.mrf.mxu2 }
 0x387   : > { %3170 = vmatmul.f32.gmra.mxu2 %v7407_v50 }
 0x388   : > { %v6609_v21 = vpop.f32.mrf.mxu3 }
 0x389   : > { %7408 = vst [vmem:[#allocation105_spill] sm:$0xff] %v6609_v21  ;;  %v6631_v21 = vpop.f32.mrf.mxu1 }
 0x38a   : > { %3764 = vmatmul.msk.f32.gmra.mxu0 %vm597_vm4, %v7409_v36  ;;  %3057 = vmatmul.f32.gmra.mxu1 %v5661_v2  ;;  %v7413_v2 = vld [vmem:[#allocation120_spill] sm:$0xff] }
 0x38b   : > { %v7415_v36 = vld [vmem:[#allocation52_spill] sm:$0xff] }
 0x38c   : > { %2734 = vmatmul.f32.gmra.mxu3 %v7335_v27 }
 0x38f   : > { %3780 = vmatmul.msk.f32.gmra.mxu2 %vm725_vm1, %v7410_v7 }
 0x390   : > { %v6623_v55 = vpop.f32.mrf.mxu3 }
 0x391   : > { %7411 = vst [vmem:[#allocation110_spill] sm:$0xff] %v6623_v55  ;;  %v6648_v55 = vpop.f32.mrf.mxu1 }
 0x392   : > { %2947 = vmatmul.f32.gmra.mxu0 %v7412_v28  ;;  %3060 = vmatmul.f32.gmra.mxu1 %v5665_v54  ;;  %v6643_v28 = vpop.f32.mrf.mxu2  ;;  %v6646_v54 = vpop.f32.mrf.mxu0 }
 0x394   : > { %3692 = vmatmul.msk.f32.gmra.mxu3 %vm725_vm1, %v7340_v39 }
 0x397   : > { %3176 = vmatmul.f32.gmra.mxu2 %v7413_v2  ;;  %v7418_v2 = vld [vmem:[#allocation55_spill] sm:$0xff] }
 0x398   : > { %v6637_v27 = vpop.f32.mrf.mxu3 }
 0x399   : > { %7414 = vst [vmem:[#allocation114_spill] sm:$0xff] %v6637_v27  ;;  %v6665_v27 = vpop.f32.mrf.mxu1 }
 0x39a   : > { %3765 = vmatmul.msk.f32.gmra.mxu0 %vm597_vm4, %v7415_v36  ;;  %3063 = vmatmul.f32.gmra.mxu1 %v5717_v40  ;;  %v6660_v40 = vpop.f32.mrf.mxu2  ;;  %v7419_v36 = vld [vmem:[#allocation62_spill] sm:$0xff] }
 0x39c   : > { %2740 = vmatmul.f32.gmra.mxu3 %v7345_v8  ;;  %v6662_v8 = vpop.f32.mrf.mxu0 }
 0x39f   : > { %3781 = vmatmul.msk.f32.gmra.mxu2 %vm725_vm1, %v7416_v49  ;;  %v7421_v49 = vld [vmem:[#allocation63_spill] sm:$0xff] }
 0x3a0   : > { %v6653_v39 = vpop.f32.mrf.mxu3 }
 0x3a1   : > { %7417 = vst [vmem:[#allocation46_spill] sm:$0xff] %v6653_v39 }
 0x3a2   : > { %2953 = vmatmul.f32.gmra.mxu0 %v7418_v2  ;;  %3066 = vmatmul.f32.gmra.mxu1 %v5721_v23  ;;  %v7422_v2 = vld [vmem:[#allocation56_spill] sm:$0xff]  ;;  %v6674_v23 = vpop.f32.mrf.mxu2 }
 0x3a4   : > { %3693 = vmatmul.msk.f32.gmra.mxu3 %vm725_vm1, %v7351_v11  ;;  %v7423_v11 = vld [vmem:[#allocation64_spill] sm:$0xff]  ;;  %v6681_v39 = vpop.f32.mrf.mxu0 }
 0x3a7   : > { %3182 = vmatmul.f32.gmra.mxu2 %v7419_v36 }
 0x3a8   : > { %v6667_v38 = vpop.f32.mrf.mxu3 }
 0x3a9   : > { %7420 = vst [vmem:[#allocation49_spill] sm:$0xff] %v6667_v38  ;;  %v6683_v38 = vpop.f32.mrf.mxu1 }
 0x3aa   : > { %3766 = vmatmul.msk.f32.gmra.mxu0 %vm597_vm4, %v7421_v49  ;;  %3069 = vmatmul.f32.gmra.mxu1 %v7422_v2  ;;  %v7427_v49 = vld [vmem:[#allocation18_spill] sm:$0xff]  ;;  %v7428_v2 = vld [vmem:[#allocation23_spill] sm:$0xff] }
 0x3ac   : > { %2746 = vmatmul.f32.gmra.mxu3 %v7354_v44  ;;  %v2254_v44 = vadd.f32 %v7428_v2, %v7427_v49  ;;  %v7434_v2 = vld [vmem:[#allocation61_spill] sm:$0xff] }
 0x3af   : > { %3782 = vmatmul.msk.f32.gmra.mxu2 %vm725_vm1, %v7423_v11  ;;  %v7429_v11 = vld [vmem:[#allocation57_spill] sm:$0xff] }
 0x3b0   : > { %v6679_v36 = vpop.f32.mrf.mxu3  ;;  %v2367_v61 = vadd.f32 %v7429_v11, %v2254_v44 }
 0x3b1   : > { %7424 = vst [vmem:[#allocation120_spill] sm:$0xff] %v6679_v36  ;;  %v7430_v36 = vld [vmem:[#allocation20_spill] sm:$0xff] }
 0x3b2   : > { %2959 = vmatmul.f32.gmra.mxu0 %v7425_v29  ;;  %3072 = vmatmul.f32.gmra.mxu1 %v7426_v3  ;;  %v2257_v10 = vadd.f32 %v7431_v9, %v7430_v36  ;;  %v2480_v7 = vadd.f32 %v7432_v42, %v2367_v61  ;;  %v2981_v29 = vadd.f32 %v6563_v31, %v6561_v24  ;;  %v7433_v3 = vld [vmem:[#allocation66_spill] sm:$0xff]  ;;  %v6708_v9 = vld [vmem:[%s7103_s6] ss:$0 sm:$0xff]  ;;  %v7436_v61 = vld [vmem:[#allocation27_spill] sm:$0xff] }
 0x3b3   : > { %v7435_v42 = vld [vmem:[#allocation22_spill] sm:$0xff]  ;;  %v7437_v31 = vld [vmem:[#allocation67_spill] sm:$0xff] }
 0x3b4   : > { %3694 = vmatmul.msk.f32.gmra.mxu3 %vm725_vm1, %v7358_v20  ;;  %v2370_v49 = vadd.f32 %v7433_v3, %v2257_v10  ;;  %v2593_v17 = vadd.f32 %v7434_v2, %v2480_v7  ;;  %v3094_v44 = vadd.f32 %v6555_v63, %v2981_v29  ;;  %v7438_v7 = vld [vmem:[#allocation70_spill] sm:$0xff]  ;;  %v7439_v3 = vld [vmem:[#allocation69_spill] sm:$0xff] }
 0x3b6   : > { %v2483_v10 = vadd.f32 %v7437_v31, %v2370_v49 }
 0x3b8   : > { %v6693_v43 = vpop.f32.mrf.mxu3  ;;  %v2596_v2 = vadd.f32 %v7439_v3, %v2483_v10  ;;  %v7443_v10 = vld [vmem:[#allocation74_spill] sm:$0xff]  ;;  %v6740_v3 = vpop.f32.mrf.mxu2 }
 0x3bc   : > { %2752 = vmatmul.f32.gmra.mxu3 %v7361_v41  ;;  %v2260_v41 = vadd.f32 %v7436_v61, %v7435_v42  ;;  %v7442_v61 = vld [vmem:[#allocation71_spill] sm:$0xff] }
 0x3be   : > { %v2373_v36 = vadd.f32 %v7438_v7, %v2260_v41  ;;  %v7444_v7 = vld [vmem:[#allocation73_spill] sm:$0xff] }
 0x3c0   : > { %v2705_v20 = vpop.f32.mrf.mxu3  ;;  %v2486_v41 = vadd.f32 %v7442_v61, %v2373_v36 }
 0x3c1   : > { %v2706_v11 = vadd.f32 %v2705_v20, %v2593_v17  ;;  %v2984_v17 = vadd.f32 %v6580_v15, %v6578_v14  ;;  %v6729_v14 = vpop.f32.mrf.mxu0 }
 0x3c3   : > { %v3189_v24 = vadd.f32 %v3094_v44, %v2706_v11  ;;  %v3097_v42 = vadd.f32 %v6573_v60, %v2984_v17  ;;  %v7441_v44 = vld [vmem:[#allocation29_spill] sm:$0xff]  ;;  %v2987_v60 = vadd.f32 %v6597_v47, %v6592_v12  ;;  %v7446_v47 = vld [vmem:[#allocation75_spill] sm:$0xff] }
 0x3c4   : > { %3695 = vmatmul.msk.f32.gmra.mxu3 %vm725_vm1, %v7365_v53  ;;  %v7440_v53 = vld [vmem:[#allocation24_spill] sm:$0xff] }
 0x3c5   : > { %v3225_v63 = vadd.f32 %v6708_v9, %v3189_v24  ;;  %v2263_v11 = vadd.f32 %v7441_v44, %v7440_v53  ;;  %v6732_v24 = vpop.f32.mrf.mxu1  ;;  %v2990_v53 = vadd.f32 %v6613_v46, %v6611_v35  ;;  %v7449_v46 = vld [vmem:[#allocation28_spill] sm:$0xff]  ;;  %v7450_v35 = vld [vmem:[#allocation34_spill] sm:$0xff] }
 0x3c7   : > { %v3257_v29 = vmax.f32 %v3225_v63, 0.0  ;;  %v2376_v17 = vadd.f32 %v7443_v10, %v2263_v11  ;;  %v3103_v10 = vadd.f32 %v6606_v33, %v2990_v53 }
 0x3c8   : > { %v2708_v20 = vpop.f32.mrf.mxu3 }
 0x3c9   : > { %3289 = vst [vmem:[%s6724_s28] sm:$0xff] %v3257_v29  ;;  %v2709_v49 = vadd.f32 %v2708_v20, %v2596_v2  ;;  %v2599_v29 = vadd.f32 %v7444_v7, %v2486_v41  ;;  %v3100_v20 = vadd.f32 %v6590_v5, %v2987_v60  ;;  %v2489_v12 = vadd.f32 %v7446_v47, %v2376_v17  ;;  %v6752_v44 = vpop.f32.mrf.mxu0  ;;  %v6761_v17 = vpop.f32.mrf.mxu2  ;;  %v7453_v47 = vld [vmem:[#allocation81_spill] sm:$0xff] }
 0x3cb   : > { %v3190_v15 = vadd.f32 %v3097_v42, %v2709_v49  ;;  %v7445_v42 = vld [vmem:[#allocation26_spill] sm:$0xff] }
 0x3cc   : > { %2758 = vmatmul.f32.gmra.mxu3 %v5789_v25  ;;  %v2266_v25 = vadd.f32 %v6322_v26, %v7445_v42  ;;  %v7448_v26 = vld [vmem:[#allocation77_spill] sm:$0xff]  ;;  %v7452_v42 = vld [vmem:[#allocation82_spill] sm:$0xff] }
 0x3cd   : > { %v3226_v31 = vadd.f32 %v6708_v9, %v3190_v15  ;;  %v6755_v11 = vpop.f32.mrf.mxu1  ;;  %v7447_v15 = vld [vmem:[#allocation78_spill] sm:$0xff]  ;;  %v2602_v60 = vadd.f32 %v7448_v26, %v2489_v12 }
 0x3ce   : > { %v2379_v61 = vadd.f32 %v7447_v15, %v2266_v25 }
 0x3cf   : > { %v3258_v63 = vmax.f32 %v3226_v31, 0.0 }
 0x3d0   : > { %v2711_v2 = vpop.f32.mrf.mxu3 }
 0x3d1   : > { %3290 = vst [vmem:[%s6724_s28 + $0x8] sm:$0xff] %v3258_v63  ;;  %v2712_v36 = vadd.f32 %v2711_v2, %v2599_v29  ;;  %v2269_v63 = vadd.f32 %v7450_v35, %v7449_v46  ;;  %v7451_v29 = vld [vmem:[#allocation79_spill] sm:$0xff]  ;;  %v6771_v25 = vpop.f32.mrf.mxu0  ;;  %v7457_v35 = vld [vmem:[#allocation85_spill] sm:$0xff] }
 0x3d2   : > { %v2492_v2 = vadd.f32 %v7451_v29, %v2379_v61  ;;  %v7454_v61 = vld [vmem:[#allocation30_spill] sm:$0xff] }
 0x3d3   : > { %v3191_v49 = vadd.f32 %v3100_v20, %v2712_v36  ;;  %v2993_v20 = vadd.f32 %v6631_v21, %v6629_v59  ;;  %v2382_v33 = vadd.f32 %v7452_v42, %v2269_v63  ;;  %v2272_v59 = vadd.f32 %v6347_v13, %v7454_v61  ;;  %v7460_v42 = vld [vmem:[#allocation88_spill] sm:$0xff] }
 0x3d4   : > { %3696 = vmatmul.msk.f32.gmra.mxu3 %vm725_vm1, %v5839_v18  ;;  %v2605_v12 = vadd.f32 %v7453_v47, %v2492_v2 }
 0x3d5   : > { %v3227_v5 = vadd.f32 %v6708_v9, %v3191_v49  ;;  %v6774_v53 = vpop.f32.mrf.mxu1  ;;  %v3106_v15 = vadd.f32 %v6625_v16, %v2993_v20 }
 0x3d7   : > { %v3259_v41 = vmax.f32 %v3227_v5, 0.0 }
 0x3d8   : > { %v2714_v31 = vpop.f32.mrf.mxu3 }
 0x3d9   : > { %3291 = vst [vmem:[%s6724_s28 + $0x10] sm:$0xff] %v3259_v41  ;;  %v2715_v18 = vadd.f32 %v2714_v31, %v2602_v60  ;;  %v7455_v41 = vld [vmem:[#allocation83_spill] sm:$0xff]  ;;  %v6781_v60 = vpop.f32.mrf.mxu2  ;;  %v2996_v31 = vadd.f32 %v6648_v55, %v6646_v54  ;;  %v6792_v29 = vpop.f32.mrf.mxu0 }
 0x3da   : > { %v2495_v26 = vadd.f32 %v7455_v41, %v2382_v33 }
 0x3db   : > { %v3192_v7 = vadd.f32 %v3103_v10, %v2715_v18  ;;  %v7456_v10 = vld [vmem:[#allocation86_spill] sm:$0xff] }
 0x3dc   : > { %2764 = vmatmul.f32.gmra.mxu3 %v5859_v30  ;;  %v2385_v18 = vadd.f32 %v7456_v10, %v2272_v59  ;;  %v2608_v63 = vadd.f32 %v7457_v35, %v2495_v26  ;;  %v7463_v26 = vld [vmem:[#allocation36_spill] sm:$0xff] }
 0x3dd   : > { %v3228_v36 = vadd.f32 %v6708_v9, %v3192_v7  ;;  %v3109_v7 = vadd.f32 %v6643_v28, %v2996_v31  ;;  %v6795_v20 = vpop.f32.mrf.mxu1 }
 0x3de   : > { %v2498_v33 = vadd.f32 %v7460_v42, %v2385_v18  ;;  %v3005_v42 = vadd.f32 %v6732_v24, %v6729_v14  ;;  %v7471_v14 = vld [vmem:[#allocation41_spill] sm:$0xff] }
 0x3df   : > { %v3260_v49 = vmax.f32 %v3228_v36, 0.0  ;;  %v7459_v36 = vld [vmem:[#allocation39_spill] sm:$0xff]  ;;  %v2284_v24 = vadd.f32 %v6405_v45, %v7471_v14 }
 0x3e0   : > { %v2717_v5 = vpop.f32.mrf.mxu3 }
 0x3e1   : > { %3292 = vst [vmem:[%s6724_s28 + $0x18] sm:$0xff] %v3260_v49  ;;  %v2718_v30 = vadd.f32 %v2717_v5, %v2605_v12  ;;  %v2999_v49 = vadd.f32 %v6665_v27, %v6662_v8  ;;  %v6804_v47 = vpop.f32.mrf.mxu2  ;;  %v7461_v12 = vld [vmem:[#allocation91_spill] sm:$0xff]  ;;  %v6812_v31 = vpop.f32.mrf.mxu0  ;;  %v7464_v8 = vld [vmem:[#allocation92_spill] sm:$0xff] }
 0x3e3   : > { %v3193_v21 = vadd.f32 %v3106_v15, %v2718_v30  ;;  %v7462_v30 = vld [vmem:[#allocation89_spill] sm:$0xff] }
 0x3e4   : > { %3697 = vmatmul.msk.f32.gmra.mxu3 %vm725_vm1, %v5889_v1  ;;  %v7458_v1 = vld [vmem:[#allocation33_spill] sm:$0xff]  ;;  %v2611_v61 = vadd.f32 %v7462_v30, %v2498_v33 }
 0x3e5   : > { %v3229_v16 = vadd.f32 %v6708_v9, %v3193_v21  ;;  %v2275_v55 = vadd.f32 %v7459_v36, %v7458_v1  ;;  %v3112_v21 = vadd.f32 %v6660_v40, %v2999_v49  ;;  %v6815_v10 = vpop.f32.mrf.mxu1  ;;  %v3002_v40 = vadd.f32 %v6683_v38, %v6681_v39  ;;  %v7468_v38 = vld [vmem:[#allocation98_spill] sm:$0xff] }
 0x3e7   : > { %v3261_v46 = vmax.f32 %v3229_v16, 0.0  ;;  %v2388_v5 = vadd.f32 %v7461_v12, %v2275_v55  ;;  %v3115_v1 = vadd.f32 %v6674_v23, %v3002_v40  ;;  %v7467_v55 = vld [vmem:[#allocation38_spill] sm:$0xff] }
 0x3e8   : > { %v2720_v13 = vpop.f32.mrf.mxu3  ;;  %v7469_v23 = vld [vmem:[#allocation102_spill] sm:$0xff] }
 0x3e9   : > { %3293 = vst [vmem:[%s6724_s28 + $0x20] sm:$0xff] %v3261_v46  ;;  %v2721_v2 = vadd.f32 %v2720_v13, %v2608_v63  ;;  %v2501_v16 = vadd.f32 %v7464_v8, %v2388_v5  ;;  %v7465_v46 = vld [vmem:[#allocation97_spill] sm:$0xff]  ;;  %v6835_v33 = vpop.f32.mrf.mxu0 }
 0x3eb   : > { %v3194_v54 = vadd.f32 %v3109_v7, %v2721_v2  ;;  %v6825_v7 = vpop.f32.mrf.mxu2 }
 0x3ec   : > { %2770 = vmatmul.f32.gmra.mxu3 %v5909_v57  ;;  %v2278_v57 = vadd.f32 %v6378_v6, %v7463_v26  ;;  %v7466_v6 = vld [vmem:[#allocation93_spill] sm:$0xff] }
 0x3ed   : > { %v3230_v28 = vadd.f32 %v6708_v9, %v3194_v54  ;;  %v2614_v13 = vadd.f32 %v7466_v6, %v2501_v16  ;;  %v7475_v6 = vld [vmem:[#allocation44_spill] sm:$0xff] }
 0x3ee   : > { %v2391_v35 = vadd.f32 %v7465_v46, %v2278_v57  ;;  %v3008_v57 = vadd.f32 %v6755_v11, %v6752_v44  ;;  %v2287_v44 = vadd.f32 %v6415_v34, %v7475_v6 }
 0x3ef   : > { %v3262_v15 = vmax.f32 %v3230_v28, 0.0  ;;  %v6838_v28 = vpop.f32.mrf.mxu1 }
 0x3f0   : > { %v2723_v59 = vpop.f32.mrf.mxu3  ;;  %v2504_v39 = vadd.f32 %v7468_v38, %v2391_v35  ;;  %v7478_v38 = vld [vmem:[#allocation106_spill] sm:$0xff] }
 0x3f1   : > { %3294 = vst [vmem:[%s6724_s28 + $0x28] sm:$0xff] %v3262_v15  ;;  %v2724_v41 = vadd.f32 %v2723_v59, %v2611_v61  ;;  %v7470_v15 = vld [vmem:[#allocation96_spill] sm:$0xff]  ;;  %v3118_v61 = vadd.f32 %v6740_v3, %v3005_v42  ;;  %v6856_v16 = vpop.f32.mrf.mxu0 }
 0x3f2   : > { %v2617_v30 = vadd.f32 %v7470_v15, %v2504_v39 }
 0x3f3   : > { %v3195_v27 = vadd.f32 %v3112_v21, %v2724_v41  ;;  %v6844_v59 = vpop.f32.mrf.mxu2  ;;  %v7472_v41 = vld [vmem:[#allocation103_spill] sm:$0xff] }
 0x3f4   : > { %3698 = vmatmul.msk.f32.gmra.mxu3 %vm725_vm1, %v5939_v19  ;;  %v2281_v19 = vadd.f32 %v6390_v62, %v7467_v55 }
 0x3f5   : > { %v3231_v18 = vadd.f32 %v6708_v9, %v3195_v27  ;;  %v7473_v27 = vld [vmem:[#allocation107_spill] sm:$0xff] }
 0x3f6   : > { %v2394_v12 = vadd.f32 %v7469_v23, %v2281_v19  ;;  %v2397_v8 = vadd.f32 %v7473_v27, %v2284_v24  ;;  %v7477_v19 = vld [vmem:[#allocation113_spill] sm:$0xff]  ;;  %v7482_v24 = vld [vmem:[#allocation111_spill] sm:$0xff] }
 0x3f7   : > { %v3263_v63 = vmax.f32 %v3231_v18, 0.0  ;;  %v7474_v18 = vld [vmem:[#allocation101_spill] sm:$0xff]  ;;  %v6859_v45 = vpop.f32.mrf.mxu1 }
 0x3f8   : > { %v2726_v2 = vpop.f32.mrf.mxu3  ;;  %v2507_v26 = vadd.f32 %v7472_v41, %v2394_v12 }
 0x3f9   : > { %3295 = vst [vmem:[%s6724_s28 + $0x30] sm:$0xff] %v3263_v63  ;;  %v2727_v36 = vadd.f32 %v2726_v2, %v2614_v13  ;;  %v3121_v63 = vadd.f32 %v6761_v17, %v3008_v57  ;;  %v7476_v13 = vld [vmem:[#allocation108_spill] sm:$0xff]  ;;  %v2400_v17 = vadd.f32 %v7477_v19, %v2287_v44  ;;  %v7483_v57 = vld [vmem:[#allocation50_spill] sm:$0xff]  ;;  %v7489_v19 = vld [vmem:[#allocation123_spill] sm:$0xff] }
 0x3fa   : > { %v2620_v46 = vadd.f32 %v7474_v18, %v2507_v26  ;;  %v2510_v2 = vadd.f32 %v7476_v13, %v2397_v8  ;;  %v3017_v18 = vadd.f32 %v6815_v10, %v6812_v31  ;;  %v3020_v10 = vadd.f32 %v6838_v28, %v6835_v33  ;;  %v7493_v28 = vld [vmem:[#allocation21_spill] sm:$0xff] }
 0x3fb   : > { %v3196_v54 = vadd.f32 %v3115_v1, %v2727_v36  ;;  %v6866_v1 = vpop.f32.mrf.mxu2  ;;  %v3011_v36 = vadd.f32 %v6774_v53, %v6771_v25 }
 0x3fc   : > { %2776 = vmatmul.f32.gmra.mxu3 %v5959_v37  ;;  %v2623_v39 = vadd.f32 %v7478_v38, %v2510_v2  ;;  %v3130_v13 = vadd.f32 %v6825_v7, %v3017_v18  ;;  %v7490_v38 = vld [vmem:[#allocation127_spill] sm:$0xff] }
 0x3fd   : > { %v3232_v49 = vadd.f32 %v6708_v9, %v3196_v54  ;;  %v3124_v34 = vadd.f32 %v6781_v60, %v3011_v36  ;;  %v3014_v60 = vadd.f32 %v6795_v20, %v6792_v29  ;;  %v7485_v20 = vld [vmem:[#allocation118_spill] sm:$0xff]  ;;  %v7488_v36 = vld [vmem:[#allocation53_spill] sm:$0xff] }
 0x3ff   : > { %v3264_v5 = vmax.f32 %v3232_v49, 0.0  ;;  %v6875_v49 = vpop.f32.mrf.mxu0  ;;  %v6878_v12 = vpop.f32.mrf.mxu1  ;;  %v3127_v41 = vadd.f32 %v6804_v47, %v3014_v60  ;;  %v7486_v47 = vld [vmem:[#allocation122_spill] sm:$0xff]  ;;  %v3023_v60 = vadd.f32 %v6859_v45, %v6856_v16 }
 0x400   : > { %v2729_v62 = vpop.f32.mrf.mxu3  ;;  %v7498_v16 = vld [vmem:[#allocation130_spill] sm:$0xff] }
 0x401   : > { %3296 = vst [vmem:[%s6724_s28 + $0x38] sm:$0xff] %v3264_v5  ;;  %v2730_v37 = vadd.f32 %v2729_v62, %v2617_v30  ;;  %v7480_v5 = vld [vmem:[#allocation115_spill] sm:$0xff] }
 0x402   : > { %v2513_v15 = vadd.f32 %v7480_v5, %v2400_v17 }
 0x403   : > { %v3197_v21 = vadd.f32 %v3118_v61, %v2730_v37  ;;  %v6889_v62 = vpop.f32.mrf.mxu2  ;;  %v7481_v61 = vld [vmem:[#allocation43_spill] sm:$0xff] }
 0x404   : > { %3699 = vmatmul.msk.f32.gmra.mxu3 %vm725_vm1, %v5987_v22 }
 0x405   : > { %v3233_v3 = vadd.f32 %v6708_v9, %v3197_v21  ;;  %v2626_v21 = vadd.f32 %v7482_v24, %v2513_v15  ;;  %v7495_v24 = vld [vmem:[#allocation126_spill] sm:$0xff] }
 0x407   : > { %v3265_v40 = vmax.f32 %v3233_v3, 0.0  ;;  %v6897_v27 = vpop.f32.mrf.mxu0 }
 0x408   : > { %v2732_v35 = vpop.f32.mrf.mxu3 }
 0x409   : > { %3297 = vst [vmem:[%s6724_s28 + $0x40] sm:$0xff] %v3265_v40  ;;  %v2733_v22 = vadd.f32 %v2732_v35, %v2620_v46  ;;  %v3028_v40 = vpop.f32.mrf.mxu1 }
 0x40b   : > { %v3198_v11 = vadd.f32 %v3121_v63, %v2733_v22  ;;  %v7487_v22 = vld [vmem:[#allocation116_spill] sm:$0xff]  ;;  %v3141_v44 = vpop.f32.mrf.mxu2 }
 0x40c   : > { %2782 = vmatmul.f32.gmra.mxu3 %v7398_v32  ;;  %v7479_v32 = vld [vmem:[#allocation47_spill] sm:$0xff] }
 0x40d   : > { %v3234_v55 = vadd.f32 %v6708_v9, %v3198_v11  ;;  %v2290_v25 = vadd.f32 %v6431_v58, %v7479_v32  ;;  %v3133_v32 = vadd.f32 %v6844_v59, %v3020_v10 }
 0x40f   : > { %v3266_v54 = vmax.f32 %v3234_v55, 0.0  ;;  %v2403_v37 = vadd.f32 %v7481_v61, %v2290_v25  ;;  %v2918_v17 = vpop.f32.mrf.mxu0  ;;  %v7494_v61 = vld [vmem:[#allocation129_spill] sm:$0xff] }
 0x410   : > { %v2735_v42 = vpop.f32.mrf.mxu3 }
 0x411   : > { %3298 = vst [vmem:[%s6724_s28 + $0x48] sm:$0xff] %v3266_v54  ;;  %v2736_v23 = vadd.f32 %v2735_v42, %v2623_v39  ;;  %v2516_v8 = vadd.f32 %v7485_v20, %v2403_v37  ;;  %v3031_v7 = vpop.f32.mrf.mxu1  ;;  %v7499_v20 = vld [vmem:[#allocation117_spill] sm:$0xff] }
 0x413   : > { %v3199_v53 = vadd.f32 %v3124_v34, %v2736_v23  ;;  %v2629_v6 = vadd.f32 %v7487_v22, %v2516_v8  ;;  %v7491_v34 = vld [vmem:[#allocation121_spill] sm:$0xff]  ;;  %v3026_v8 = vadd.f32 %v6878_v12, %v6875_v49  ;;  %v7504_v49 = vld [vmem:[#allocation131_spill] sm:$0xff] }
 0x414   : > { %3700 = vmatmul.msk.f32.gmra.mxu3 %vm725_vm1, %v7401_v0  ;;  %v7484_v0 = vld [vmem:[#allocation145_spill] sm:$0xff] }
 0x415   : > { %v3235_v30 = vadd.f32 %v6708_v9, %v3199_v53  ;;  %v2293_v3 = vadd.f32 %v7484_v0, %v7483_v57  ;;  %v3144_v53 = vpop.f32.mrf.mxu2  ;;  %v7496_v57 = vld [vmem:[#allocation68_spill] sm:$0xff] }
 0x417   : > { %v3267_v14 = vmax.f32 %v3235_v30, 0.0  ;;  %v2406_v35 = vadd.f32 %v7486_v47, %v2293_v3  ;;  %v2921_v59 = vpop.f32.mrf.mxu0 }
 0x418   : > { %v2738_v58 = vpop.f32.mrf.mxu3 }
 0x419   : > { %3299 = vst [vmem:[%s6724_s28 + $0x50] sm:$0xff] %v3267_v14  ;;  %v2739_v26 = vadd.f32 %v2738_v58, %v2626_v21  ;;  %v2519_v31 = vadd.f32 %v7489_v19, %v2406_v35  ;;  %v3034_v58 = vpop.f32.mrf.mxu1  ;;  %v7501_v35 = vld [vmem:[#allocation5_spill] sm:$0xff]  ;;  %v3029_v19 = vadd.f32 %v3028_v40, %v6897_v27 }
 0x41b   : > { %v3200_v29 = vadd.f32 %v3127_v41, %v2739_v26  ;;  %v2632_v23 = vadd.f32 %v7491_v34, %v2519_v31 }
 0x41c   : > { %2788 = vmatmul.f32.gmra.mxu3 %v7403_v52  ;;  %v2296_v52 = vadd.f32 %v6459_v51, %v7488_v36  ;;  %v7503_v36 = vld [vmem:[#allocation154_spill] sm:$0xff] }
 0x41d   : > { %v3236_v46 = vadd.f32 %v6708_v9, %v3200_v29  ;;  %v3147_v29 = vpop.f32.mrf.mxu2 }
 0x41e   : > { %v2409_v39 = vadd.f32 %v7490_v38, %v2296_v52  ;;  %v2305_v52 = vadd.f32 %v7503_v36, %v7502_v4 }
 0x41f   : > { %v3268_v63 = vmax.f32 %v3236_v46, 0.0 }
 0x420   : > { %v2741_v11 = vpop.f32.mrf.mxu3  ;;  %v2522_v15 = vadd.f32 %v7493_v28, %v2409_v39  ;;  %v7509_v28 = vld [vmem:[#allocation133_spill] sm:$0xff] }
 0x421   : > { %3300 = vst [vmem:[%s6724_s28 + $0x58] sm:$0xff] %v3268_v63  ;;  %v2742_v2 = vadd.f32 %v2741_v11, %v2629_v6  ;;  %v3139_v6 = vadd.f32 %v6889_v62, %v3026_v8  ;;  %v2924_v11 = vpop.f32.mrf.mxu0  ;;  %v7506_v62 = vld [vmem:[#allocation25_spill] sm:$0xff]  ;;  %v7515_v8 = vld [vmem:[#allocation135_spill] sm:$0xff] }
 0x422   : > { %v2635_v21 = vadd.f32 %v7495_v24, %v2522_v15  ;;  %v3032_v15 = vadd.f32 %v3031_v7, %v2918_v17  ;;  %v3035_v17 = vadd.f32 %v3034_v58, %v2921_v59  ;;  %v7519_v59 = vld [vmem:[#allocation136_spill] sm:$0xff] }
 0x423   : > { %v3201_v55 = vadd.f32 %v3130_v13, %v2742_v2  ;;  %v3037_v2 = vpop.f32.mrf.mxu1 }
 0x424   : > { %3701 = vmatmul.msk.f32.gmra.mxu3 %vm725_vm1, %v7405_v48  ;;  %v7492_v48 = vld [vmem:[#allocation59_spill] sm:$0xff] }
 0x425   : > { %v3237_v54 = vadd.f32 %v6708_v9, %v3201_v55  ;;  %v2299_v5 = vadd.f32 %v6468_v56, %v7492_v48  ;;  %v3136_v56 = vadd.f32 %v6866_v1, %v3023_v60  ;;  %v7500_v1 = vld [vmem:[#allocation7_spill] sm:$0xff]  ;;  %v3150_v10 = vpop.f32.mrf.mxu2 }
 0x427   : > { %v3269_v42 = vmax.f32 %v3237_v54, 0.0  ;;  %v2412_v37 = vadd.f32 %v7494_v61, %v2299_v5  ;;  %v7505_v54 = vld [vmem:[#allocation132_spill] sm:$0xff] }
 0x428   : > { %v2744_v51 = vpop.f32.mrf.mxu3  ;;  %v2418_v38 = vadd.f32 %v7505_v54, %v2305_v52  ;;  %v3038_v52 = vadd.f32 %v3037_v2, %v2924_v11  ;;  %v7521_v54 = vld [vmem:[#allocation10_spill] sm:$0xff] }
 0x429   : > { %3301 = vst [vmem:[%s6724_s28 + $0x60] sm:$0xff] %v3269_v42  ;;  %v2745_v25 = vadd.f32 %v2744_v51, %v2632_v23  ;;  %v2525_v45 = vadd.f32 %v7498_v16, %v2412_v37  ;;  %v3142_v23 = vadd.f32 %v3141_v44, %v3029_v19  ;;  %v2927_v5 = vpop.f32.mrf.mxu0 }
 0x42a   : > { %v2531_v27 = vadd.f32 %v7509_v28, %v2418_v38  ;;  %v7525_v28 = vld [vmem:[#allocation137_spill] sm:$0xff] }
 0x42b   : > { %v3202_v33 = vadd.f32 %v3133_v32, %v2745_v25  ;;  %v2638_v63 = vadd.f32 %v7501_v35, %v2525_v45  ;;  %v7507_v32 = vld [vmem:[#allocation76_spill] sm:$0xff]  ;;  %v7508_v25 = vld [vmem:[#allocation157_spill] sm:$0xff]  ;;  %v3040_v40 = vpop.f32.mrf.mxu1 }
 0x42c   : > { %2794 = vmatmul.f32.gmra.mxu3 %v7407_v50  ;;  %v7497_v50 = vld [vmem:[#allocation150_spill] sm:$0xff]  ;;  %v2308_v48 = vadd.f32 %v7508_v25, %v7507_v32  ;;  %v7524_v25 = vld [vmem:[#allocation12_spill] sm:$0xff] }
 0x42d   : > { %v3238_v30 = vadd.f32 %v6708_v9, %v3202_v33  ;;  %v2302_v0 = vadd.f32 %v7497_v50, %v7496_v57  ;;  %v3153_v44 = vpop.f32.mrf.mxu2  ;;  %v7513_v57 = vld [vmem:[#allocation160_spill] sm:$0xff] }
 0x42f   : > { %v3270_v14 = vmax.f32 %v3238_v30, 0.0  ;;  %v2415_v46 = vadd.f32 %v7500_v1, %v2302_v0  ;;  %v7510_v30 = vld [vmem:[#allocation134_spill] sm:$0xff] }
 0x430   : > { %v2747_v41 = vpop.f32.mrf.mxu3  ;;  %v2421_v61 = vadd.f32 %v7510_v30, %v2308_v48  ;;  %v3041_v48 = vadd.f32 %v3040_v40, %v2927_v5 }
 0x431   : > { %3302 = vst [vmem:[%s6724_s28 + $0x68] sm:$0xff] %v3270_v14  ;;  %v2748_v26 = vadd.f32 %v2747_v41, %v2635_v21  ;;  %v2528_v12 = vadd.f32 %v7504_v49, %v2415_v46  ;;  %v7511_v14 = vld [vmem:[#allocation8_spill] sm:$0xff]  ;;  %v3145_v41 = vadd.f32 %v3144_v53, %v3032_v15  ;;  %v2930_v7 = vpop.f32.mrf.mxu0  ;;  %v7516_v46 = vld [vmem:[#allocation9_spill] sm:$0xff]  ;;  %v3148_v53 = vadd.f32 %v3147_v29, %v3035_v17 }
 0x432   : > { %v2644_v24 = vadd.f32 %v7511_v14, %v2531_v27  ;;  %v7520_v49 = vld [vmem:[#allocation37_spill] sm:$0xff] }
 0x433   : > { %v3203_v3 = vadd.f32 %v3136_v56, %v2748_v26  ;;  %v2641_v42 = vadd.f32 %v7506_v62, %v2528_v12  ;;  %v7512_v26 = vld [vmem:[#allocation80_spill] sm:$0xff]  ;;  %v3151_v62 = vadd.f32 %v3150_v10, %v3038_v52  ;;  %v7536_v52 = vld [vmem:[#allocation42_spill] sm:$0xff] }
 0x434   : > { %3702 = vmatmul.msk.f32.gmra.mxu3 %vm725_vm1, %v7499_v20  ;;  %v2311_v50 = vadd.f32 %v7513_v57, %v7512_v26  ;;  %v3043_v20 = vpop.f32.mrf.mxu1  ;;  %v7529_v57 = vld [vmem:[#allocation138_spill] sm:$0xff] }
 0x435   : > { %v3239_v18 = vadd.f32 %v6708_v9, %v3203_v3  ;;  %v7514_v3 = vld [vmem:[#allocation31_spill] sm:$0xff]  ;;  %v3044_v40 = vadd.f32 %v3043_v20, %v2930_v7 }
 0x436   : > { %v2534_v16 = vadd.f32 %v7514_v3, %v2421_v61  ;;  %v7530_v3 = vld [vmem:[#allocation139_spill] sm:$0xff] }
 0x437   : > { %v3271_v47 = vmax.f32 %v3239_v18, 0.0  ;;  %v2424_v18 = vadd.f32 %v7515_v8, %v2311_v50 }
 0x438   : > { %v2750_v22 = vpop.f32.mrf.mxu3 }
 0x439   : > { %3303 = vst [vmem:[%s6724_s28 + $0x70] sm:$0xff] %v3271_v47  ;;  %v2751_v13 = vadd.f32 %v2750_v22, %v2638_v63  ;;  %v2647_v47 = vadd.f32 %v7516_v46, %v2534_v16  ;;  %v3156_v22 = vpop.f32.mrf.mxu2  ;;  %v2537_v58 = vadd.f32 %v7519_v59, %v2424_v18  ;;  %v2933_v19 = vpop.f32.mrf.mxu0  ;;  %v7532_v46 = vld [vmem:[#allocation94_spill] sm:$0xff] }
 0x43a   : > { %v3157_v18 = vadd.f32 %v3156_v22, %v3044_v40 }
 0x43b   : > { %v3204_v55 = vadd.f32 %v3139_v6, %v2751_v13  ;;  %v7517_v6 = vld [vmem:[#allocation84_spill] sm:$0xff]  ;;  %v7518_v13 = vld [vmem:[#allocation162_spill] sm:$0xff]  ;;  %v2650_v38 = vadd.f32 %v7521_v54, %v2537_v58  ;;  %v7537_v54 = vld [vmem:[#allocation99_spill] sm:$0xff] }
 0x43c   : > { %v2314_v4 = vadd.f32 %v7518_v13, %v7517_v6  ;;  %v3046_v29 = vpop.f32.mrf.mxu1  ;;  %v7534_v6 = vld [vmem:[#allocation45_spill] sm:$0xff] }
 0x43d   : > { %v3240_v31 = vadd.f32 %v6708_v9, %v3204_v55  ;;  %v3047_v13 = vadd.f32 %v3046_v29, %v2933_v19 }
 0x43e   : > { %v2427_v12 = vadd.f32 %v7520_v49, %v2314_v4 }
 0x43f   : > { %v3272_v39 = vmax.f32 %v3240_v31, 0.0 }
 0x440   : > { %v2753_v34 = vpop.f32.mrf.mxu3  ;;  %v2540_v11 = vadd.f32 %v7524_v25, %v2427_v12 }
 0x441   : > { %3304 = vst [vmem:[%s6724_s28 + $0x78] sm:$0xff] %v3272_v39  ;;  %v2754_v51 = vadd.f32 %v2753_v34, %v2641_v42  ;;  %v7522_v34 = vld [vmem:[#allocation87_spill] sm:$0xff]  ;;  %v3159_v2 = vpop.f32.mrf.mxu2  ;;  %v2936_v10 = vpop.f32.mrf.mxu0 }
 0x442   : > { %v3160_v12 = vadd.f32 %v3159_v2, %v3047_v13 }
 0x443   : > { %v3205_v33 = vadd.f32 %v3142_v23, %v2754_v51  ;;  %v7523_v23 = vld [vmem:[#allocation32_spill] sm:$0xff] }
 0x444   : > { %v2317_v51 = vadd.f32 %v7523_v23, %v7522_v34 }
 0x445   : > { %v3241_v60 = vadd.f32 %v6708_v9, %v3205_v33 }
 0x446   : > { %v2430_v27 = vadd.f32 %v7525_v28, %v2317_v51 }
 0x447   : > { %v3273_v37 = vmax.f32 %v3241_v60, 0.0  ;;  %v7526_v60 = vld [vmem:[#allocation11_spill] sm:$0xff] }
 0x448   : > { %v2756_v21 = vpop.f32.mrf.mxu3  ;;  %v2653_v30 = vadd.f32 %v7526_v60, %v2540_v11  ;;  %v2543_v5 = vadd.f32 %v7529_v57, %v2430_v27  ;;  %v7542_v60 = vld [vmem:[#allocation104_spill] sm:$0xff] }
 0x449   : > { %3305 = vst [vmem:[%s6724_s28 + $0x80] sm:$0xff] %v3273_v37  ;;  %v2757_v56 = vadd.f32 %v2756_v21, %v2644_v24  ;;  %v3154_v37 = vadd.f32 %v3153_v44, %v3041_v48  ;;  %v3049_v24 = vpop.f32.mrf.mxu1  ;;  %v7527_v21 = vld [vmem:[#allocation90_spill] sm:$0xff] }
 0x44a   : > { %v3050_v19 = vadd.f32 %v3049_v24, %v2936_v10  ;;  %v7541_v48 = vld [vmem:[#allocation14_spill] sm:$0xff] }
 0x44b   : > { %v3206_v0 = vadd.f32 %v3145_v41, %v2757_v56  ;;  %v7528_v41 = vld [vmem:[#allocation95_spill] sm:$0xff]  ;;  %v7544_v10 = vld [vmem:[#allocation142_spill] sm:$0xff] }
 0x44c   : > { %v2320_v56 = vadd.f32 %v7528_v41, %v7527_v21  ;;  %v7545_v41 = vld [vmem:[#allocation143_spill] sm:$0xff] }
 0x44d   : > { %v3242_v45 = vadd.f32 %v6708_v9, %v3206_v0  ;;  %v3162_v0 = vpop.f32.mrf.mxu2 }
 0x44e   : > { %v2433_v16 = vadd.f32 %v7530_v3, %v2320_v56  ;;  %v3163_v2 = vadd.f32 %v3162_v0, %v3050_v19  ;;  %v7556_v19 = vld [vmem:[#allocation146_spill] sm:$0xff] }
 0x44f   : > { %v3274_v1 = vmax.f32 %v3242_v45, 0.0  ;;  %v7531_v45 = vld [vmem:[#allocation13_spill] sm:$0xff] }
 0x450   : > { %v2759_v35 = vpop.f32.mrf.mxu3  ;;  %v2656_v44 = vadd.f32 %v7531_v45, %v2543_v5  ;;  %v2546_v7 = vadd.f32 %v7534_v6, %v2433_v16  ;;  %v7546_v5 = vld [vmem:[#allocation51_spill] sm:$0xff]  ;;  %v7548_v45 = vld [vmem:[#allocation110_spill] sm:$0xff] }
 0x451   : > { %3306 = vst [vmem:[%s6724_s28 + $0x88] sm:$0xff] %v3274_v1  ;;  %v2760_v63 = vadd.f32 %v2759_v35, %v2647_v47  ;;  %v7533_v47 = vld [vmem:[#allocation35_spill] sm:$0xff]  ;;  %v3052_v20 = vpop.f32.mrf.mxu1 }
 0x452   : > { %v2323_v35 = vadd.f32 %v7533_v47, %v7532_v46 }
 0x453   : > { %v3207_v36 = vadd.f32 %v3148_v53, %v2760_v63  ;;  %v2939_v53 = vpop.f32.mrf.mxu0 }
 0x454   : > { %v3053_v24 = vadd.f32 %v3052_v20, %v2939_v53  ;;  %v7550_v53 = vld [vmem:[#allocation147_spill] sm:$0xff] }
 0x455   : > { %v3243_v55 = vadd.f32 %v6708_v9, %v3207_v36  ;;  %v7535_v36 = vld [vmem:[#allocation48_spill] sm:$0xff]  ;;  %v3165_v22 = vpop.f32.mrf.mxu2 }
 0x456   : > { %v2436_v59 = vadd.f32 %v7535_v36, %v2323_v35  ;;  %v3166_v3 = vadd.f32 %v3165_v22, %v3053_v24 }
 0x457   : > { %v3275_v31 = vmax.f32 %v3243_v55, 0.0  ;;  %v2659_v55 = vadd.f32 %v7536_v52, %v2546_v7  ;;  %v7551_v7 = vld [vmem:[#allocation54_spill] sm:$0xff]  ;;  %v7552_v52 = vld [vmem:[#allocation112_spill] sm:$0xff] }
 0x458   : > { %v2762_v39 = vpop.f32.mrf.mxu3 }
 0x459   : > { %3307 = vst [vmem:[%s6724_s28 + $0x90] sm:$0xff] %v3275_v31  ;;  %v2763_v42 = vadd.f32 %v2762_v39, %v2650_v38  ;;  %v7538_v38 = vld [vmem:[#allocation100_spill] sm:$0xff]  ;;  %v3055_v51 = vpop.f32.mrf.mxu1 }
 0x45a   : > { %v2326_v39 = vadd.f32 %v7538_v38, %v7537_v54 }
 0x45b   : > { %v3208_v32 = vadd.f32 %v3151_v62, %v2763_v42  ;;  %v7539_v42 = vld [vmem:[#allocation140_spill] sm:$0xff]  ;;  %v2942_v29 = vpop.f32.mrf.mxu0 }
 0x45c   : > { %v2549_v34 = vadd.f32 %v7539_v42, %v2436_v59  ;;  %v3056_v47 = vadd.f32 %v3055_v51, %v2942_v29 }
 0x45d   : > { %v3244_v33 = vadd.f32 %v6708_v9, %v3208_v32  ;;  %v7540_v32 = vld [vmem:[#allocation141_spill] sm:$0xff] }
 0x45e   : > { %v2439_v25 = vadd.f32 %v7540_v32, %v2326_v39 }
 0x45f   : > { %v3276_v15 = vmax.f32 %v3244_v33, 0.0  ;;  %v2662_v33 = vadd.f32 %v7541_v48, %v2549_v34 }
 0x460   : > { %v2765_v61 = vpop.f32.mrf.mxu3 }
 0x461   : > { %3308 = vst [vmem:[%s6724_s28 + $0x98] sm:$0xff] %v3276_v15  ;;  %v2766_v14 = vadd.f32 %v2765_v61, %v2653_v30  ;;  %v3168_v15 = vpop.f32.mrf.mxu2  ;;  %v7543_v30 = vld [vmem:[#allocation105_spill] sm:$0xff] }
 0x462   : > { %v2329_v61 = vadd.f32 %v7543_v30, %v7542_v60 }
 0x463   : > { %v3209_v26 = vadd.f32 %v3154_v37, %v2766_v14  ;;  %v2552_v14 = vadd.f32 %v7544_v10, %v2439_v25  ;;  %v7557_v25 = vld [vmem:[#allocation40_spill] sm:$0xff] }
 0x464   : > { %v2442_v56 = vadd.f32 %v7545_v41, %v2329_v61  ;;  %v7560_v61 = vld [vmem:[#allocation152_spill] sm:$0xff] }
 0x465   : > { %v3245_v50 = vadd.f32 %v6708_v9, %v3209_v26  ;;  %v2945_v26 = vpop.f32.mrf.mxu0  ;;  %v2665_v40 = vadd.f32 %v7546_v5, %v2552_v14  ;;  %v7561_v14 = vld [vmem:[#allocation15_spill] sm:$0xff]  ;;  %v7563_v5 = vld [vmem:[#allocation49_spill] sm:$0xff] }
 0x467   : > { %v3277_v17 = vmax.f32 %v3245_v50, 0.0  ;;  %v3058_v50 = vpop.f32.mrf.mxu1 }
 0x468   : > { %v2768_v8 = vpop.f32.mrf.mxu3  ;;  %v3059_v54 = vadd.f32 %v3058_v50, %v2945_v26 }
 0x469   : > { %3309 = vst [vmem:[%s6724_s28 + $0xa0] sm:$0xff] %v3277_v17  ;;  %v2769_v1 = vadd.f32 %v2768_v8, %v2656_v44  ;;  %v7547_v17 = vld [vmem:[#allocation109_spill] sm:$0xff]  ;;  %v3171_v46 = vpop.f32.mrf.mxu2 }
 0x46a   : > { %v2332_v44 = vadd.f32 %v7548_v45, %v7547_v17  ;;  %v3172_v51 = vadd.f32 %v3171_v46, %v3059_v54  ;;  %v7566_v46 = vld [vmem:[#allocation151_spill] sm:$0xff] }
 0x46b   : > { %v3210_v63 = vadd.f32 %v3157_v18, %v2769_v1  ;;  %v7549_v18 = vld [vmem:[#allocation144_spill] sm:$0xff] }
 0x46c   : > { %v2555_v1 = vadd.f32 %v7549_v18, %v2442_v56 }
 0x46d   : > { %v3246_v4 = vadd.f32 %v6708_v9, %v3210_v63  ;;  %v2445_v63 = vadd.f32 %v7550_v53, %v2332_v44  ;;  %v2948_v36 = vpop.f32.mrf.mxu0 }
 0x46e   : > { %v2668_v20 = vadd.f32 %v7551_v7, %v2555_v1  ;;  %v7567_v7 = vld [vmem:[#allocation124_spill] sm:$0xff] }
 0x46f   : > { %v3278_v58 = vmax.f32 %v3246_v4, 0.0  ;;  %v3169_v4 = vadd.f32 %v3168_v15, %v3056_v47 }
 0x470   : > { %v2771_v49 = vpop.f32.mrf.mxu3 }
 0x471   : > { %3310 = vst [vmem:[%s6724_s28 + $0xa8] sm:$0xff] %v3278_v58  ;;  %v2772_v31 = vadd.f32 %v2771_v49, %v2659_v55  ;;  %v3061_v58 = vpop.f32.mrf.mxu1  ;;  %v7553_v55 = vld [vmem:[#allocation114_spill] sm:$0xff]  ;;  %v3174_v39 = vpop.f32.mrf.mxu2 }
 0x472   : > { %v2335_v22 = vadd.f32 %v7553_v55, %v7552_v52  ;;  %v3062_v60 = vadd.f32 %v3061_v58, %v2948_v36  ;;  %v7569_v36 = vld [vmem:[#allocation156_spill] sm:$0xff]  ;;  %v7570_v55 = vld [vmem:[#allocation158_spill] sm:$0xff] }
 0x473   : > { %v3211_v62 = vadd.f32 %v3160_v12, %v2772_v31  ;;  %v7554_v12 = vld [vmem:[#allocation148_spill] sm:$0xff] }
 0x474   : > { %v2558_v31 = vadd.f32 %v7554_v12, %v2445_v63  ;;  %v3175_v56 = vadd.f32 %v3174_v39, %v3062_v60 }
 0x475   : > { %v3247_v23 = vadd.f32 %v6708_v9, %v3211_v62  ;;  %v7555_v62 = vld [vmem:[#allocation16_spill] sm:$0xff] }
 0x476   : > { %v2448_v42 = vadd.f32 %v7555_v62, %v2335_v22  ;;  %v2671_v29 = vadd.f32 %v7556_v19, %v2558_v31  ;;  %v7571_v31 = vld [vmem:[#allocation155_spill] sm:$0xff] }
 0x477   : > { %v3279_v11 = vmax.f32 %v3247_v23, 0.0 }
 0x478   : > { %v2774_v28 = vpop.f32.mrf.mxu3 }
 0x479   : > { %3311 = vst [vmem:[%s6724_s28 + $0xb0] sm:$0xff] %v3279_v11  ;;  %v2775_v27 = vadd.f32 %v2774_v28, %v2662_v33  ;;  %v7558_v11 = vld [vmem:[#allocation46_spill] sm:$0xff]  ;;  %v2951_v33 = vpop.f32.mrf.mxu0  ;;  %v3064_v15 = vpop.f32.mrf.mxu1 }
 0x47a   : > { %v2338_v48 = vadd.f32 %v7558_v11, %v7557_v25 }
 0x47b   : > { %v3212_v37 = vadd.f32 %v3163_v2, %v2775_v27  ;;  %v7559_v2 = vld [vmem:[#allocation149_spill] sm:$0xff] }
 0x47c   : > { %v2561_v27 = vadd.f32 %v7559_v2, %v2448_v42  ;;  %v7575_v2 = vld [vmem:[#allocation19_spill] sm:$0xff] }
 0x47d   : > { %v3248_v21 = vadd.f32 %v6708_v9, %v3212_v37  ;;  %v2451_v37 = vadd.f32 %v7560_v61, %v2338_v48  ;;  %v7574_v48 = vld [vmem:[#allocation163_spill] sm:$0xff] }
 0x47e   : > { %v2674_v24 = vadd.f32 %v7561_v14, %v2561_v27 }
 0x47f   : > { %v3280_v57 = vmax.f32 %v3248_v21, 0.0  ;;  %v3177_v21 = vpop.f32.mrf.mxu2 }
 0x480   : > { %v2777_v0 = vpop.f32.mrf.mxu3 }
 0x481   : > { %3312 = vst [vmem:[%s6724_s28 + $0xb8] sm:$0xff] %v3280_v57  ;;  %v2778_v16 = vadd.f32 %v2777_v0, %v2665_v40  ;;  %v7562_v57 = vld [vmem:[#allocation119_spill] sm:$0xff]  ;;  %v7564_v0 = vld [vmem:[#allocation153_spill] sm:$0xff]  ;;  %v2954_v17 = vpop.f32.mrf.mxu0  ;;  %v3067_v44 = vpop.f32.mrf.mxu1 }
 0x482   : > { %v2341_v40 = vadd.f32 %v7563_v5, %v7562_v57  ;;  %v3068_v58 = vadd.f32 %v3067_v44, %v2954_v17 }
 0x483   : > { %v3213_v8 = vadd.f32 %v3166_v3, %v2778_v16  ;;  %v2564_v3 = vadd.f32 %v7564_v0, %v2451_v37  ;;  %v3065_v16 = vadd.f32 %v3064_v15, %v2951_v33 }
 0x485   : > { %v3249_v35 = vadd.f32 %v6708_v9, %v3213_v8  ;;  %v7565_v8 = vld [vmem:[#allocation17_spill] sm:$0xff]  ;;  %v2677_v47 = vadd.f32 %v7566_v46, %v2564_v3  ;;  %v3178_v53 = vadd.f32 %v3177_v21, %v3065_v16 }
 0x486   : > { %v2454_v18 = vadd.f32 %v7565_v8, %v2341_v40 }
 0x487   : > { %v3281_v6 = vmax.f32 %v3249_v35, 0.0 }
 0x488   : > { %v2780_v13 = vpop.f32.mrf.mxu3 }
 0x489   : > { %3313 = vst [vmem:[%s6724_s28 + $0xc0] sm:$0xff] %v3281_v6  ;;  %v2781_v59 = vadd.f32 %v2780_v13, %v2668_v20  ;;  %v3180_v6 = vpop.f32.mrf.mxu2  ;;  %v7568_v20 = vld [vmem:[#allocation120_spill] sm:$0xff] }
 0x48a   : > { %v2344_v13 = vadd.f32 %v7568_v20, %v7567_v7  ;;  %v3181_v62 = vadd.f32 %v3180_v6, %v3068_v58 }
 0x48b   : > { %v3214_v49 = vadd.f32 %v3169_v4, %v2781_v59  ;;  %v2567_v59 = vadd.f32 %v7569_v36, %v2454_v18 }
 0x48c   : > { %v2457_v22 = vadd.f32 %v7570_v55, %v2344_v13 }
 0x48d   : > { %v3250_v38 = vadd.f32 %v6708_v9, %v3214_v49  ;;  %v2957_v49 = vpop.f32.mrf.mxu0  ;;  %v2680_v54 = vadd.f32 %v7571_v31, %v2567_v59 }
 0x48f   : > { %v3282_v34 = vmax.f32 %v3250_v38, 0.0  ;;  %v3070_v38 = vpop.f32.mrf.mxu1 }
 0x490   : > { %v2783_v23 = vpop.f32.mrf.mxu3  ;;  %v3071_v25 = vadd.f32 %v3070_v38, %v2957_v49 }
 0x491   : > { %3314 = vst [vmem:[%s6724_s28 + $0xc8] sm:$0xff] %v3282_v34  ;;  %v2784_v32 = vadd.f32 %v2783_v23, %v2671_v29  ;;  %v7572_v34 = vld [vmem:[#allocation128_spill] sm:$0xff]  ;;  %v7573_v23 = vld [vmem:[#allocation159_spill] sm:$0xff] }
 0x492   : > { %v2347_v19 = vadd.f32 %v6693_v43, %v7572_v34 }
 0x493   : > { %v3215_v28 = vadd.f32 %v3172_v51, %v2784_v32  ;;  %v2570_v51 = vadd.f32 %v7573_v23, %v2457_v22  ;;  %v3183_v32 = vpop.f32.mrf.mxu2 }
 0x494   : > { %v2460_v33 = vadd.f32 %v7574_v48, %v2347_v19  ;;  %v3184_v60 = vadd.f32 %v3183_v32, %v3071_v25 }
 0x495   : > { %v3251_v30 = vadd.f32 %v6708_v9, %v3215_v28  ;;  %v2683_v27 = vadd.f32 %v7575_v2, %v2570_v51  ;;  %v2960_v61 = vpop.f32.mrf.mxu0 }
 0x497   : > { %v3283_v10 = vmax.f32 %v3251_v30, 0.0  ;;  %v3073_v43 = vpop.f32.mrf.mxu1 }
 0x498   : > { %v2786_v41 = vpop.f32.mrf.mxu3 }
 0x499   : > { %3315 = vst [vmem:[%s6724_s28 + $0xd0] sm:$0xff] %v3283_v10  ;;  %v2787_v26 = vadd.f32 %v2786_v41, %v2674_v24  ;;  %v7576_v10 = vld [vmem:[#allocation164_spill] sm:$0xff]  ;;  %v3074_v24 = vadd.f32 %v3073_v43, %v2960_v61 }
 0x49a   : > { %v2573_v14 = vadd.f32 %v7576_v10, %v2460_v33 }
 0x49b   : > { %v3216_v50 = vadd.f32 %v3175_v56, %v2787_v26  ;;  %v3186_v41 = vpop.f32.mrf.mxu2  ;;  %v7577_v26 = vld [vmem:[#allocation161_spill] sm:$0xff] }
 0x49c   : > { %v2686_v57 = vadd.f32 %v7577_v26, %v2573_v14  ;;  %v3187_v40 = vadd.f32 %v3186_v41, %v3074_v24 }
 0x49d   : > { %v3252_v45 = vadd.f32 %v6708_v9, %v3216_v50 }
 0x49f   : > { %v3284_v1 = vmax.f32 %v3252_v45, 0.0 }
 0x4a0   : > { %v2789_v35 = vpop.f32.mrf.mxu3 }
 0x4a1   : > { %3316 = vst [vmem:[%s6724_s28 + $0xd8] sm:$0xff] %v3284_v1  ;;  %v2790_v63 = vadd.f32 %v2789_v35, %v2677_v47 }
 0x4a3   : > { %v3217_v4 = vadd.f32 %v3178_v53, %v2790_v63 }
 0x4a5   : > { %v3253_v52 = vadd.f32 %v6708_v9, %v3217_v4 }
 0x4a7   : > { %v3285_v12 = vmax.f32 %v3253_v52, 0.0 }
 0x4a8   : > { %v2792_v39 = vpop.f32.mrf.mxu3 }
 0x4a9   : > { %3317 = vst [vmem:[%s6724_s28 + $0xe0] sm:$0xff] %v3285_v12  ;;  %v2793_v42 = vadd.f32 %v2792_v39, %v2680_v54 }
 0x4ab   : > { %v3218_v29 = vadd.f32 %v3181_v62, %v2793_v42 }
 0x4ad   : > { %v3254_v11 = vadd.f32 %v6708_v9, %v3218_v29 }
 0x4af   : > { %v3286_v28 = vmax.f32 %v3254_v11, 0.0 }
 0x4b0   : > { %v2795_v15 = vpop.f32.mrf.mxu3 }
 0x4b1   : > { %3318 = vst [vmem:[%s6724_s28 + $0xe8] sm:$0xff] %v3286_v28  ;;  %v2796_v30 = vadd.f32 %v2795_v15, %v2683_v27 }
 0x4b3   : > { %v3219_v37 = vadd.f32 %v3184_v60, %v2796_v30 }
 0x4b5   : > { %v3255_v21 = vadd.f32 %v6708_v9, %v3219_v37 }
 0x4b7   : > { %v3287_v56 = vmax.f32 %v3255_v21, 0.0 }
 0x4b8   : > { %v2798_v5 = vpop.f32.mrf.mxu3 }
 0x4b9   : > { %3319 = vst [vmem:[%s6724_s28 + $0xf0] sm:$0xff] %v3287_v56  ;;  %v2799_v50 = vadd.f32 %v2798_v5, %v2686_v57 }
 0x4bb   : > { %v3220_v0 = vadd.f32 %v3187_v40, %v2799_v50 }
 0x4bd   : > { %v3256_v3 = vadd.f32 %v6708_v9, %v3220_v0 }
 0x4bf   : > { %v3288_v16 = vmax.f32 %v3256_v3, 0.0 }
 0x4c1   : > { %3320 = vst [vmem:[%s6724_s28 + $0xf8] sm:$0xff] %v3288_v16 }
 0x4c2   : > { %3902 = shalt.err (!%p3899_p5)
}
 0x4c3   : > { %s3958_s20 = smov 128  }
 0x4c4   : > { %3793 = dma.vmem_to_hbm [thread:$0]  (%p4039_p4), %s3338_s15, 4096, %s3340_s16, %s3322_s25, %s3958_s20, %s3958_s20, %s3957_s19  }
 0x4c5 PF: > { %p3799_p6 = scmp.ge.s32.totalorder %s3953_s27, 2  ;;  %s3354_s28 = sand.u32 1, %s3933_s23  }
 0x4c6   : > { %s3355_s8 = scalar_lea.sflag [#allocation3], %s3354_s28 }
 0x4c7   : > { %p3796_p7 = pnand %p3799_p6, %p4046_p8 }
 0x4c9   : > { %p3797_p9 = pneg %p3796_p7 }
 0x4cb   : > { %3928 = dma.done.wait (%p3797_p9), %s3355_s8, 4096  }
 0x4cc   : > { %3930 = vsyncadd (%p3797_p9), %s3355_s8, 4294963200  ;;  %s20_s27 = sadd.s32 1, %s3953_s27   ;;  %s7578_s23 = smov %s3937_s2 }
 0x4cd   : > { %p17_p10 = scmp.ge.s32.totalorder %s20_s27, 4   ;;  %s7579_s2 = smov %s3941_s24 }
 0x4ce   : > { %s7580_s24 = smov %s4052_s12  ;;  %s7581_s25 = smov %s3949_s26 }
 0x4cf   : > { %s7582_s26 = smov %s7584_s30  ;;  %19 = sbr.rel (!%p17_p10) target bundleno = 4 (0x4), region = 93 }
 0x4d4   :  { %3361 = vsyncpa [#allocation3], 1 }
 0x4d5   :  { %3363 = vsyncpa [#allocation3 + $0x1], 1 }

</bundles_post_ra>
